<compile_context>
chip_gen: v5e
topology: v5e:2x2
jax: 0.10.0
libtpu: 0.0.40
codegen_flags: <defaults>
</compile_context>

<pallas_src>
import math

import jax
import jax.numpy as jnp
from jax.experimental import pallas as pl
from jax.experimental.pallas import tpu as pltpu

# ---- Acrobot physical constants (match AcrobotEnv class attributes) --------
DT = 0.05
M1 = 1.0
M2 = 1.0
L1 = 1.0
LC1 = 0.5
LC2 = 0.5
I1 = 1.0
I2 = 1.0
G = 9.8
PI = math.pi
TWO_PI = 2.0 * PI
INV_2PI = 1.0 / TWO_PI
MAX_VEL_1 = 4.0 * PI
MAX_VEL_2 = 9.0 * PI

LANE = 128       # lane width
SUB = 8          # sublane count (f32)
TILE_R_MAX = 256 # rows per grid step (256*128 = 32768 batch elems per tile)


def _dynamics(th1, th2, th1d, th2d, tau, *, in_kernel):
    """Acrobot dynamics (module's `_dynamics`), elementwise over the batch.

    torch.linalg.solve on the 2x2 symmetric mass matrix is replaced by the
    closed-form 2x2 solve (same math, same result).
    """
    cos2 = jnp.cos(th2)
    sin2 = jnp.sin(th2)
    cos1 = jnp.cos(th1)
    cos12 = jnp.cos(th1 + th2)          # computed once, reused for phi1/phi2

    # m11 = M1*LC1^2 + M2*(L1^2 + LC2^2) + I1 + I2  +  2*M2*L1*LC2 * cos2
    m11 = (M1 * LC1 ** 2 + M2 * (L1 ** 2 + LC2 ** 2) + I1 + I2) \
        + (2.0 * M2 * L1 * LC2) * cos2
    m22 = M2 * LC2 ** 2 + I2            # scalar constant
    m12 = (M2 * LC2 ** 2 + I2) + (M2 * L1 * LC2) * cos2

    c = M2 * L1 * LC2 * sin2
    h1 = -c * th2d * th2d - 2.0 * c * th2d * th1d
    h2 = c * th1d * th1d

    phi2 = (M2 * LC2 * G) * cos12
    phi1 = ((M1 * LC1 + M2 * L1) * G) * cos1 + phi2

    # rhs = TAU - H - PHI with TAU = [0, tau]
    b1 = -h1 - phi1
    b2 = tau - h2 - phi2

    # 2x2 symmetric solve: M @ d2th = b
    det = m11 * m22 - m12 * m12
    if in_kernel:
        inv_det = pl.reciprocal(det, approx=True)
        inv_det = inv_det * (2.0 - det * inv_det)   # 1 Newton step -> ~f32 exact
    else:
        inv_det = 1.0 / det
    dd1 = (m22 * b1 - m12 * b2) * inv_det
    dd2 = (m11 * b2 - m12 * b1) * inv_det

    return (th1d, th2d, dd1, dd2, jnp.zeros_like(th1d))


def _rk4_step(th1, th2, th1d, th2d, tau, *, in_kernel):
    """One RK4 step over t = [0, DT] of the augmented state (rk4 with len(t)==2)."""
    y0 = (th1, th2, th1d, th2d, tau)
    dt = DT
    dt2 = DT / 2.0
    k1 = _dynamics(*y0, in_kernel=in_kernel)
    k2 = _dynamics(*tuple(y + dt2 * k for y, k in zip(y0, k1)), in_kernel=in_kernel)
    k3 = _dynamics(*tuple(y + dt2 * k for y, k in zip(y0, k2)), in_kernel=in_kernel)
    k4 = _dynamics(*tuple(y + dt * k for y, k in zip(y0, k3)), in_kernel=in_kernel)
    yn = tuple(
        y + (dt / 6.0) * (ka + 2.0 * kb + 2.0 * kc + kd)
        for y, ka, kb, kc, kd in zip(y0, k1, k2, k3, k4)
    )
    return yn[0], yn[1], yn[2], yn[3]


def _angle_normalize_fast(x):
    # Same as (x + PI) % (2*PI) - PI, but with a constant-reciprocal multiply
    # + floor instead of an EUP divide (can differ by ~1 ulp near the wrap).
    return x - TWO_PI * jnp.floor((x + PI) * INV_2PI)


def _acrobot_kernel(s_ref, a_ref, ns_ref, rew_ref, term_ref):
    # s_ref: (4, TILE_R, 128), a_ref: (TILE_R, 128); each component slab is a
    # full set of (8,128) vregs.
    th1 = s_ref[0, :, :]
    th2 = s_ref[1, :, :]
    th1d = s_ref[2, :, :]
    th2d = s_ref[3, :, :]
    tau = a_ref[...]

    nth1, nth2, nv1, nv2 = _rk4_step(th1, th2, th1d, th2d, tau, in_kernel=True)

    nth1 = _angle_normalize_fast(nth1)
    nth2 = _angle_normalize_fast(nth2)
    nv1 = jnp.clip(nv1, -MAX_VEL_1, MAX_VEL_1)
    nv2 = jnp.clip(nv2, -MAX_VEL_2, MAX_VEL_2)

    ns_ref[0, :, :] = nth1
    ns_ref[1, :, :] = nth2
    ns_ref[2, :, :] = nv1
    ns_ref[3, :, :] = nv2

    sum12 = nth1 + nth2
    # terminal = (-cos(th1) - cos(th1 + th2) > 1.0).float()
    term_ref[...] = ((-jnp.cos(nth1) - jnp.cos(sum12)) > 1.0).astype(jnp.float32)
    # reward = sin(th1) + sin(th1 + th2)
    rew_ref[...] = jnp.sin(nth1) + jnp.sin(sum12)


def acrobot_forward(s, a):
    """Pallas implementation of AcrobotEnv.forward (continuous=True).

    s: (B, 4) float32, a: (B, 1) float32.
    Returns (ns (B, 4), reward (B,), terminal (B, 1)).
    """
    B = s.shape[0]

    # Lane/sublane-dense padding: rows of 128 lanes, rows rounded to a
    # multiple of 8 (full sublanes) and to the row-tile size.
    rows = -(-B // LANE)
    tile_r = min(TILE_R_MAX, ((rows + SUB - 1) // SUB) * SUB)
    R = ((rows + tile_r - 1) // tile_r) * tile_r
    Bp = R * LANE

    s32 = jnp.asarray(s, jnp.float32)
    a32 = jnp.asarray(a, jnp.float32)
    if Bp != B:
        s32 = jnp.pad(s32, ((0, Bp - B), (0, 0)))
        a32 = jnp.pad(a32, ((0, Bp - B), (0, 0)))

    # Component-major slabs: (4, R, 128) and (R, 128).
    s_cm = s32.T.reshape(4, R, LANE)
    a_cm = a32.T.reshape(R, LANE)

    grid = (R // tile_r,)
    ns_cm, rew_cm, term_cm = pl.pallas_call(
        _acrobot_kernel,
        grid=grid,
        in_specs=[
            pl.BlockSpec((4, tile_r, LANE), lambda i: (0, i, 0)),
            pl.BlockSpec((tile_r, LANE), lambda i: (i, 0)),
        ],
        out_specs=(
            pl.BlockSpec((4, tile_r, LANE), lambda i: (0, i, 0)),
            pl.BlockSpec((tile_r, LANE), lambda i: (i, 0)),
            pl.BlockSpec((tile_r, LANE), lambda i: (i, 0)),
        ),
        out_shape=(
            jax.ShapeDtypeStruct((4, R, LANE), jnp.float32),
            jax.ShapeDtypeStruct((R, LANE), jnp.float32),
            jax.ShapeDtypeStruct((R, LANE), jnp.float32),
        ),
        compiler_params=pltpu.CompilerParams(
            dimension_semantics=("parallel",)),
    )(s_cm, a_cm)

    ns = ns_cm.reshape(4, Bp).T[:B]          # (B, 4)
    reward = rew_cm.reshape(Bp)[:B]          # (B,)
    terminal = term_cm.reshape(Bp)[:B, None] # (B, 1)
    return ns, reward, terminal


def reference_forward(s, a):
    """Plain-JAX mirror of the PyTorch forward (for correctness checking)."""
    th1, th2, th1d, th2d = s[:, 0], s[:, 1], s[:, 2], s[:, 3]
    tau = a[:, 0]
    nth1, nth2, nv1, nv2 = _rk4_step(th1, th2, th1d, th2d, tau, in_kernel=False)
    nth1 = jnp.mod(nth1 + PI, TWO_PI) - PI
    nth2 = jnp.mod(nth2 + PI, TWO_PI) - PI
    nv1 = jnp.clip(nv1, -MAX_VEL_1, MAX_VEL_1)
    nv2 = jnp.clip(nv2, -MAX_VEL_2, MAX_VEL_2)
    ns = jnp.stack([nth1, nth2, nv1, nv2], axis=1)
    terminal = ((-jnp.cos(nth1) - jnp.cos(nth2 + nth1)) > 1.0).astype(jnp.float32)[:, None]
    reward = jnp.sin(nth1) + jnp.sin(nth1 + nth2)
    return ns, reward, terminal


if __name__ == "__main__":
    B = 64  # matches AcrobotEnv default batch_size
    key = jax.random.PRNGKey(0)
    ks, ka = jax.random.split(key)

    # State sampled like AcrobotEnv.reset(): uniform [-1,1] scaled per component
    u = jax.random.uniform(ks, (B, 4), jnp.float32, -1.0, 1.0)
    scale = jnp.array([PI, PI, MAX_VEL_1, MAX_VEL_2], jnp.float32)
    s = u * scale
    a = jax.random.uniform(ka, (B, 1), jnp.float32, -1.0, 1.0)  # continuous torque

    ns, reward, terminal = acrobot_forward(s, a)
    jax.block_until_ready((ns, reward, terminal))

    # Correctness check against plain-JAX reference (angles compared circularly)
    ns_r, rew_r, term_r = reference_forward(s, a)
    assert ns.shape == (B, 4) and reward.shape == (B,) and terminal.shape == (B, 1)
    assert bool(jnp.all(jnp.isfinite(ns)))
    assert bool(jnp.allclose(jnp.sin(ns[:, :2]), jnp.sin(ns_r[:, :2]), atol=2e-3))
    assert bool(jnp.allclose(jnp.cos(ns[:, :2]), jnp.cos(ns_r[:, :2]), atol=2e-3))
    assert bool(jnp.allclose(ns[:, 2:], ns_r[:, 2:], atol=2e-3, rtol=2e-3))
    assert bool(jnp.allclose(reward, rew_r, atol=2e-3))
    assert bool(jnp.allclose(terminal, term_r))

    print("KERNEL_OK")
</pallas_src>

<mosaic_0001>
module attributes {stable_mosaic.version = 11 : i64} {
  func.func @_acrobot_kernel(%arg0: i32, %arg1: memref<4x8x128xf32, #tpu.memory_space<vmem>>, %arg2: memref<8x128xf32, #tpu.memory_space<vmem>>, %arg3: memref<4x8x128xf32, #tpu.memory_space<vmem>>, %arg4: memref<8x128xf32, #tpu.memory_space<vmem>>, %arg5: memref<8x128xf32, #tpu.memory_space<vmem>>) attributes {dimension_semantics = [#tpu.dimension_semantics<parallel>], iteration_bounds = array<i64: 1>, scalar_prefetch = 0 : i64, scratch_operands = 0 : i64, tpu.core_type = #tpu.core_type<tc>, window_params = [{transform_indices = @transform_0, window_bounds = array<i64: 4, 8, 128>}, {transform_indices = @transform_1, window_bounds = array<i64: 8, 128>}, {transform_indices = @transform_2, window_bounds = array<i64: 4, 8, 128>}, {transform_indices = @transform_3, window_bounds = array<i64: 8, 128>}, {transform_indices = @transform_4, window_bounds = array<i64: 8, 128>}]} {
    %c0 = arith.constant 0 : index
    %c0_0 = arith.constant 0 : index
    %c0_1 = arith.constant 0 : index
    %0 = vector.load %arg1[%c0, %c0_0, %c0_1] : memref<4x8x128xf32, #tpu.memory_space<vmem>>, vector<1x8x128xf32>
    %1 = vector.shape_cast %0 : vector<1x8x128xf32> to vector<8x128xf32>
    %c1 = arith.constant 1 : index
    %c0_2 = arith.constant 0 : index
    %c0_3 = arith.constant 0 : index
    %2 = vector.load %arg1[%c1, %c0_2, %c0_3] : memref<4x8x128xf32, #tpu.memory_space<vmem>>, vector<1x8x128xf32>
    %3 = vector.shape_cast %2 : vector<1x8x128xf32> to vector<8x128xf32>
    %c2 = arith.constant 2 : index
    %c0_4 = arith.constant 0 : index
    %c0_5 = arith.constant 0 : index
    %4 = vector.load %arg1[%c2, %c0_4, %c0_5] : memref<4x8x128xf32, #tpu.memory_space<vmem>>, vector<1x8x128xf32>
    %5 = vector.shape_cast %4 : vector<1x8x128xf32> to vector<8x128xf32>
    %c3 = arith.constant 3 : index
    %c0_6 = arith.constant 0 : index
    %c0_7 = arith.constant 0 : index
    %6 = vector.load %arg1[%c3, %c0_6, %c0_7] : memref<4x8x128xf32, #tpu.memory_space<vmem>>, vector<1x8x128xf32>
    %7 = vector.shape_cast %6 : vector<1x8x128xf32> to vector<8x128xf32>
    %c0_8 = arith.constant 0 : index
    %c0_9 = arith.constant 0 : index
    %8 = vector.load %arg2[%c0_8, %c0_9] : memref<8x128xf32, #tpu.memory_space<vmem>>, vector<8x128xf32>
    %9 = math.cos %3 : vector<8x128xf32>
    %10 = math.sin %3 : vector<8x128xf32>
    %11 = math.cos %1 : vector<8x128xf32>
    %12 = arith.addf %1, %3 : vector<8x128xf32>
    %13 = math.cos %12 : vector<8x128xf32>
    %cst = arith.constant 1.000000e+00 : f32
    %14 = vector.broadcast %cst : f32 to vector<8x128xf32>
    %15 = arith.mulf %14, %9 : vector<8x128xf32>
    %cst_10 = arith.constant 3.500000e+00 : f32
    %16 = vector.broadcast %cst_10 : f32 to vector<8x128xf32>
    %17 = arith.addf %16, %15 : vector<8x128xf32>
    %cst_11 = arith.constant 5.000000e-01 : f32
    %18 = vector.broadcast %cst_11 : f32 to vector<8x128xf32>
    %19 = arith.mulf %18, %9 : vector<8x128xf32>
    %cst_12 = arith.constant 1.250000e+00 : f32
    %20 = vector.broadcast %cst_12 : f32 to vector<8x128xf32>
    %21 = arith.addf %20, %19 : vector<8x128xf32>
    %cst_13 = arith.constant 5.000000e-01 : f32
    %22 = vector.broadcast %cst_13 : f32 to vector<8x128xf32>
    %23 = arith.mulf %22, %10 : vector<8x128xf32>
    %cst_14 = arith.constant 0.000000e+00 : f32
    %24 = vector.broadcast %cst_14 : f32 to vector<8x128xf32>
    %25 = arith.subf %24, %23 : vector<8x128xf32>
    %26 = arith.mulf %25, %7 : vector<8x128xf32>
    %27 = arith.mulf %26, %7 : vector<8x128xf32>
    %cst_15 = arith.constant 2.000000e+00 : f32
    %28 = vector.broadcast %cst_15 : f32 to vector<8x128xf32>
    %29 = arith.mulf %28, %23 : vector<8x128xf32>
    %30 = arith.mulf %29, %7 : vector<8x128xf32>
    %31 = arith.mulf %30, %5 : vector<8x128xf32>
    %32 = arith.subf %27, %31 : vector<8x128xf32>
    %33 = arith.mulf %23, %5 : vector<8x128xf32>
    %34 = arith.mulf %33, %5 : vector<8x128xf32>
    %cst_16 = arith.constant 4.900000e+00 : f32
    %35 = vector.broadcast %cst_16 : f32 to vector<8x128xf32>
    %36 = arith.mulf %35, %13 : vector<8x128xf32>
    %cst_17 = arith.constant 1.470000e+01 : f32
    %37 = vector.broadcast %cst_17 : f32 to vector<8x128xf32>
    %38 = arith.mulf %37, %11 : vector<8x128xf32>
    %39 = arith.addf %38, %36 : vector<8x128xf32>
    %cst_18 = arith.constant 0.000000e+00 : f32
    %40 = vector.broadcast %cst_18 : f32 to vector<8x128xf32>
    %41 = arith.subf %40, %32 : vector<8x128xf32>
    %42 = arith.subf %41, %39 : vector<8x128xf32>
    %43 = arith.subf %8, %34 : vector<8x128xf32>
    %44 = arith.subf %43, %36 : vector<8x128xf32>
    %cst_19 = arith.constant 1.250000e+00 : f32
    %45 = vector.broadcast %cst_19 : f32 to vector<8x128xf32>
    %46 = arith.mulf %17, %45 : vector<8x128xf32>
    %47 = arith.mulf %21, %21 : vector<8x128xf32>
    %48 = arith.subf %46, %47 : vector<8x128xf32>
    %49 = tpu.reciprocal %48 {approx = true} : vector<8x128xf32> -> vector<8x128xf32>
    %50 = arith.mulf %48, %49 : vector<8x128xf32>
    %cst_20 = arith.constant 2.000000e+00 : f32
    %51 = vector.broadcast %cst_20 : f32 to vector<8x128xf32>
    %52 = arith.subf %51, %50 : vector<8x128xf32>
    %53 = arith.mulf %49, %52 : vector<8x128xf32>
    %cst_21 = arith.constant 1.250000e+00 : f32
    %54 = vector.broadcast %cst_21 : f32 to vector<8x128xf32>
    %55 = arith.mulf %54, %42 : vector<8x128xf32>
    %56 = arith.mulf %21, %44 : vector<8x128xf32>
    %57 = arith.subf %55, %56 : vector<8x128xf32>
    %58 = arith.mulf %57, %53 : vector<8x128xf32>
    %59 = arith.mulf %17, %44 : vector<8x128xf32>
    %60 = arith.mulf %21, %42 : vector<8x128xf32>
    %61 = arith.subf %59, %60 : vector<8x128xf32>
    %62 = arith.mulf %61, %53 : vector<8x128xf32>
    %cst_22 = arith.constant 0.000000e+00 : f32
    %63 = vector.broadcast %cst_22 : f32 to vector<8x128xf32>
    %cst_23 = arith.constant 2.500000e-02 : f32
    %64 = vector.broadcast %cst_23 : f32 to vector<8x128xf32>
    %65 = arith.mulf %64, %5 : vector<8x128xf32>
    %66 = arith.addf %1, %65 : vector<8x128xf32>
    %cst_24 = arith.constant 2.500000e-02 : f32
    %67 = vector.broadcast %cst_24 : f32 to vector<8x128xf32>
    %68 = arith.mulf %67, %7 : vector<8x128xf32>
    %69 = arith.addf %3, %68 : vector<8x128xf32>
    %cst_25 = arith.constant 2.500000e-02 : f32
    %70 = vector.broadcast %cst_25 : f32 to vector<8x128xf32>
    %71 = arith.mulf %70, %58 : vector<8x128xf32>
    %72 = arith.addf %5, %71 : vector<8x128xf32>
    %cst_26 = arith.constant 2.500000e-02 : f32
    %73 = vector.broadcast %cst_26 : f32 to vector<8x128xf32>
    %74 = arith.mulf %73, %62 : vector<8x128xf32>
    %75 = arith.addf %7, %74 : vector<8x128xf32>
    %cst_27 = arith.constant 2.500000e-02 : f32
    %76 = vector.broadcast %cst_27 : f32 to vector<8x128xf32>
    %77 = arith.mulf %76, %63 : vector<8x128xf32>
    %78 = arith.addf %8, %77 : vector<8x128xf32>
    %79 = math.cos %69 : vector<8x128xf32>
    %80 = math.sin %69 : vector<8x128xf32>
    %81 = math.cos %66 : vector<8x128xf32>
    %82 = arith.addf %66, %69 : vector<8x128xf32>
    %83 = math.cos %82 : vector<8x128xf32>
    %cst_28 = arith.constant 1.000000e+00 : f32
    %84 = vector.broadcast %cst_28 : f32 to vector<8x128xf32>
    %85 = arith.mulf %84, %79 : vector<8x128xf32>
    %cst_29 = arith.constant 3.500000e+00 : f32
    %86 = vector.broadcast %cst_29 : f32 to vector<8x128xf32>
    %87 = arith.addf %86, %85 : vector<8x128xf32>
    %cst_30 = arith.constant 5.000000e-01 : f32
    %88 = vector.broadcast %cst_30 : f32 to vector<8x128xf32>
    %89 = arith.mulf %88, %79 : vector<8x128xf32>
    %cst_31 = arith.constant 1.250000e+00 : f32
    %90 = vector.broadcast %cst_31 : f32 to vector<8x128xf32>
    %91 = arith.addf %90, %89 : vector<8x128xf32>
    %cst_32 = arith.constant 5.000000e-01 : f32
    %92 = vector.broadcast %cst_32 : f32 to vector<8x128xf32>
    %93 = arith.mulf %92, %80 : vector<8x128xf32>
    %cst_33 = arith.constant 0.000000e+00 : f32
    %94 = vector.broadcast %cst_33 : f32 to vector<8x128xf32>
    %95 = arith.subf %94, %93 : vector<8x128xf32>
    %96 = arith.mulf %95, %75 : vector<8x128xf32>
    %97 = arith.mulf %96, %75 : vector<8x128xf32>
    %cst_34 = arith.constant 2.000000e+00 : f32
    %98 = vector.broadcast %cst_34 : f32 to vector<8x128xf32>
    %99 = arith.mulf %98, %93 : vector<8x128xf32>
    %100 = arith.mulf %99, %75 : vector<8x128xf32>
    %101 = arith.mulf %100, %72 : vector<8x128xf32>
    %102 = arith.subf %97, %101 : vector<8x128xf32>
    %103 = arith.mulf %93, %72 : vector<8x128xf32>
    %104 = arith.mulf %103, %72 : vector<8x128xf32>
    %cst_35 = arith.constant 4.900000e+00 : f32
    %105 = vector.broadcast %cst_35 : f32 to vector<8x128xf32>
    %106 = arith.mulf %105, %83 : vector<8x128xf32>
    %cst_36 = arith.constant 1.470000e+01 : f32
    %107 = vector.broadcast %cst_36 : f32 to vector<8x128xf32>
    %108 = arith.mulf %107, %81 : vector<8x128xf32>
    %109 = arith.addf %108, %106 : vector<8x128xf32>
    %cst_37 = arith.constant 0.000000e+00 : f32
    %110 = vector.broadcast %cst_37 : f32 to vector<8x128xf32>
    %111 = arith.subf %110, %102 : vector<8x128xf32>
    %112 = arith.subf %111, %109 : vector<8x128xf32>
    %113 = arith.subf %78, %104 : vector<8x128xf32>
    %114 = arith.subf %113, %106 : vector<8x128xf32>
    %cst_38 = arith.constant 1.250000e+00 : f32
    %115 = vector.broadcast %cst_38 : f32 to vector<8x128xf32>
    %116 = arith.mulf %87, %115 : vector<8x128xf32>
    %117 = arith.mulf %91, %91 : vector<8x128xf32>
    %118 = arith.subf %116, %117 : vector<8x128xf32>
    %119 = tpu.reciprocal %118 {approx = true} : vector<8x128xf32> -> vector<8x128xf32>
    %120 = arith.mulf %118, %119 : vector<8x128xf32>
    %cst_39 = arith.constant 2.000000e+00 : f32
    %121 = vector.broadcast %cst_39 : f32 to vector<8x128xf32>
    %122 = arith.subf %121, %120 : vector<8x128xf32>
    %123 = arith.mulf %119, %122 : vector<8x128xf32>
    %cst_40 = arith.constant 1.250000e+00 : f32
    %124 = vector.broadcast %cst_40 : f32 to vector<8x128xf32>
    %125 = arith.mulf %124, %112 : vector<8x128xf32>
    %126 = arith.mulf %91, %114 : vector<8x128xf32>
    %127 = arith.subf %125, %126 : vector<8x128xf32>
    %128 = arith.mulf %127, %123 : vector<8x128xf32>
    %129 = arith.mulf %87, %114 : vector<8x128xf32>
    %130 = arith.mulf %91, %112 : vector<8x128xf32>
    %131 = arith.subf %129, %130 : vector<8x128xf32>
    %132 = arith.mulf %131, %123 : vector<8x128xf32>
    %cst_41 = arith.constant 0.000000e+00 : f32
    %133 = vector.broadcast %cst_41 : f32 to vector<8x128xf32>
    %cst_42 = arith.constant 2.500000e-02 : f32
    %134 = vector.broadcast %cst_42 : f32 to vector<8x128xf32>
    %135 = arith.mulf %134, %72 : vector<8x128xf32>
    %136 = arith.addf %1, %135 : vector<8x128xf32>
    %cst_43 = arith.constant 2.500000e-02 : f32
    %137 = vector.broadcast %cst_43 : f32 to vector<8x128xf32>
    %138 = arith.mulf %137, %75 : vector<8x128xf32>
    %139 = arith.addf %3, %138 : vector<8x128xf32>
    %cst_44 = arith.constant 2.500000e-02 : f32
    %140 = vector.broadcast %cst_44 : f32 to vector<8x128xf32>
    %141 = arith.mulf %140, %128 : vector<8x128xf32>
    %142 = arith.addf %5, %141 : vector<8x128xf32>
    %cst_45 = arith.constant 2.500000e-02 : f32
    %143 = vector.broadcast %cst_45 : f32 to vector<8x128xf32>
    %144 = arith.mulf %143, %132 : vector<8x128xf32>
    %145 = arith.addf %7, %144 : vector<8x128xf32>
    %cst_46 = arith.constant 2.500000e-02 : f32
    %146 = vector.broadcast %cst_46 : f32 to vector<8x128xf32>
    %147 = arith.mulf %146, %133 : vector<8x128xf32>
    %148 = arith.addf %8, %147 : vector<8x128xf32>
    %149 = math.cos %139 : vector<8x128xf32>
    %150 = math.sin %139 : vector<8x128xf32>
    %151 = math.cos %136 : vector<8x128xf32>
    %152 = arith.addf %136, %139 : vector<8x128xf32>
    %153 = math.cos %152 : vector<8x128xf32>
    %cst_47 = arith.constant 1.000000e+00 : f32
    %154 = vector.broadcast %cst_47 : f32 to vector<8x128xf32>
    %155 = arith.mulf %154, %149 : vector<8x128xf32>
    %cst_48 = arith.constant 3.500000e+00 : f32
    %156 = vector.broadcast %cst_48 : f32 to vector<8x128xf32>
    %157 = arith.addf %156, %155 : vector<8x128xf32>
    %cst_49 = arith.constant 5.000000e-01 : f32
    %158 = vector.broadcast %cst_49 : f32 to vector<8x128xf32>
    %159 = arith.mulf %158, %149 : vector<8x128xf32>
    %cst_50 = arith.constant 1.250000e+00 : f32
    %160 = vector.broadcast %cst_50 : f32 to vector<8x128xf32>
    %161 = arith.addf %160, %159 : vector<8x128xf32>
    %cst_51 = arith.constant 5.000000e-01 : f32
    %162 = vector.broadcast %cst_51 : f32 to vector<8x128xf32>
    %163 = arith.mulf %162, %150 : vector<8x128xf32>
    %cst_52 = arith.constant 0.000000e+00 : f32
    %164 = vector.broadcast %cst_52 : f32 to vector<8x128xf32>
    %165 = arith.subf %164, %163 : vector<8x128xf32>
    %166 = arith.mulf %165, %145 : vector<8x128xf32>
    %167 = arith.mulf %166, %145 : vector<8x128xf32>
    %cst_53 = arith.constant 2.000000e+00 : f32
    %168 = vector.broadcast %cst_53 : f32 to vector<8x128xf32>
    %169 = arith.mulf %168, %163 : vector<8x128xf32>
    %170 = arith.mulf %169, %145 : vector<8x128xf32>
    %171 = arith.mulf %170, %142 : vector<8x128xf32>
    %172 = arith.subf %167, %171 : vector<8x128xf32>
    %173 = arith.mulf %163, %142 : vector<8x128xf32>
    %174 = arith.mulf %173, %142 : vector<8x128xf32>
    %cst_54 = arith.constant 4.900000e+00 : f32
    %175 = vector.broadcast %cst_54 : f32 to vector<8x128xf32>
    %176 = arith.mulf %175, %153 : vector<8x128xf32>
    %cst_55 = arith.constant 1.470000e+01 : f32
    %177 = vector.broadcast %cst_55 : f32 to vector<8x128xf32>
    %178 = arith.mulf %177, %151 : vector<8x128xf32>
    %179 = arith.addf %178, %176 : vector<8x128xf32>
    %cst_56 = arith.constant 0.000000e+00 : f32
    %180 = vector.broadcast %cst_56 : f32 to vector<8x128xf32>
    %181 = arith.subf %180, %172 : vector<8x128xf32>
    %182 = arith.subf %181, %179 : vector<8x128xf32>
    %183 = arith.subf %148, %174 : vector<8x128xf32>
    %184 = arith.subf %183, %176 : vector<8x128xf32>
    %cst_57 = arith.constant 1.250000e+00 : f32
    %185 = vector.broadcast %cst_57 : f32 to vector<8x128xf32>
    %186 = arith.mulf %157, %185 : vector<8x128xf32>
    %187 = arith.mulf %161, %161 : vector<8x128xf32>
    %188 = arith.subf %186, %187 : vector<8x128xf32>
    %189 = tpu.reciprocal %188 {approx = true} : vector<8x128xf32> -> vector<8x128xf32>
    %190 = arith.mulf %188, %189 : vector<8x128xf32>
    %cst_58 = arith.constant 2.000000e+00 : f32
    %191 = vector.broadcast %cst_58 : f32 to vector<8x128xf32>
    %192 = arith.subf %191, %190 : vector<8x128xf32>
    %193 = arith.mulf %189, %192 : vector<8x128xf32>
    %cst_59 = arith.constant 1.250000e+00 : f32
    %194 = vector.broadcast %cst_59 : f32 to vector<8x128xf32>
    %195 = arith.mulf %194, %182 : vector<8x128xf32>
    %196 = arith.mulf %161, %184 : vector<8x128xf32>
    %197 = arith.subf %195, %196 : vector<8x128xf32>
    %198 = arith.mulf %197, %193 : vector<8x128xf32>
    %199 = arith.mulf %157, %184 : vector<8x128xf32>
    %200 = arith.mulf %161, %182 : vector<8x128xf32>
    %201 = arith.subf %199, %200 : vector<8x128xf32>
    %202 = arith.mulf %201, %193 : vector<8x128xf32>
    %cst_60 = arith.constant 0.000000e+00 : f32
    %203 = vector.broadcast %cst_60 : f32 to vector<8x128xf32>
    %cst_61 = arith.constant 5.000000e-02 : f32
    %204 = vector.broadcast %cst_61 : f32 to vector<8x128xf32>
    %205 = arith.mulf %204, %142 : vector<8x128xf32>
    %206 = arith.addf %1, %205 : vector<8x128xf32>
    %cst_62 = arith.constant 5.000000e-02 : f32
    %207 = vector.broadcast %cst_62 : f32 to vector<8x128xf32>
    %208 = arith.mulf %207, %145 : vector<8x128xf32>
    %209 = arith.addf %3, %208 : vector<8x128xf32>
    %cst_63 = arith.constant 5.000000e-02 : f32
    %210 = vector.broadcast %cst_63 : f32 to vector<8x128xf32>
    %211 = arith.mulf %210, %198 : vector<8x128xf32>
    %212 = arith.addf %5, %211 : vector<8x128xf32>
    %cst_64 = arith.constant 5.000000e-02 : f32
    %213 = vector.broadcast %cst_64 : f32 to vector<8x128xf32>
    %214 = arith.mulf %213, %202 : vector<8x128xf32>
    %215 = arith.addf %7, %214 : vector<8x128xf32>
    %cst_65 = arith.constant 5.000000e-02 : f32
    %216 = vector.broadcast %cst_65 : f32 to vector<8x128xf32>
    %217 = arith.mulf %216, %203 : vector<8x128xf32>
    %218 = arith.addf %8, %217 : vector<8x128xf32>
    %219 = math.cos %209 : vector<8x128xf32>
    %220 = math.sin %209 : vector<8x128xf32>
    %221 = math.cos %206 : vector<8x128xf32>
    %222 = arith.addf %206, %209 : vector<8x128xf32>
    %223 = math.cos %222 : vector<8x128xf32>
    %cst_66 = arith.constant 1.000000e+00 : f32
    %224 = vector.broadcast %cst_66 : f32 to vector<8x128xf32>
    %225 = arith.mulf %224, %219 : vector<8x128xf32>
    %cst_67 = arith.constant 3.500000e+00 : f32
    %226 = vector.broadcast %cst_67 : f32 to vector<8x128xf32>
    %227 = arith.addf %226, %225 : vector<8x128xf32>
    %cst_68 = arith.constant 5.000000e-01 : f32
    %228 = vector.broadcast %cst_68 : f32 to vector<8x128xf32>
    %229 = arith.mulf %228, %219 : vector<8x128xf32>
    %cst_69 = arith.constant 1.250000e+00 : f32
    %230 = vector.broadcast %cst_69 : f32 to vector<8x128xf32>
    %231 = arith.addf %230, %229 : vector<8x128xf32>
    %cst_70 = arith.constant 5.000000e-01 : f32
    %232 = vector.broadcast %cst_70 : f32 to vector<8x128xf32>
    %233 = arith.mulf %232, %220 : vector<8x128xf32>
    %cst_71 = arith.constant 0.000000e+00 : f32
    %234 = vector.broadcast %cst_71 : f32 to vector<8x128xf32>
    %235 = arith.subf %234, %233 : vector<8x128xf32>
    %236 = arith.mulf %235, %215 : vector<8x128xf32>
    %237 = arith.mulf %236, %215 : vector<8x128xf32>
    %cst_72 = arith.constant 2.000000e+00 : f32
    %238 = vector.broadcast %cst_72 : f32 to vector<8x128xf32>
    %239 = arith.mulf %238, %233 : vector<8x128xf32>
    %240 = arith.mulf %239, %215 : vector<8x128xf32>
    %241 = arith.mulf %240, %212 : vector<8x128xf32>
    %242 = arith.subf %237, %241 : vector<8x128xf32>
    %243 = arith.mulf %233, %212 : vector<8x128xf32>
    %244 = arith.mulf %243, %212 : vector<8x128xf32>
    %cst_73 = arith.constant 4.900000e+00 : f32
    %245 = vector.broadcast %cst_73 : f32 to vector<8x128xf32>
    %246 = arith.mulf %245, %223 : vector<8x128xf32>
    %cst_74 = arith.constant 1.470000e+01 : f32
    %247 = vector.broadcast %cst_74 : f32 to vector<8x128xf32>
    %248 = arith.mulf %247, %221 : vector<8x128xf32>
    %249 = arith.addf %248, %246 : vector<8x128xf32>
    %cst_75 = arith.constant 0.000000e+00 : f32
    %250 = vector.broadcast %cst_75 : f32 to vector<8x128xf32>
    %251 = arith.subf %250, %242 : vector<8x128xf32>
    %252 = arith.subf %251, %249 : vector<8x128xf32>
    %253 = arith.subf %218, %244 : vector<8x128xf32>
    %254 = arith.subf %253, %246 : vector<8x128xf32>
    %cst_76 = arith.constant 1.250000e+00 : f32
    %255 = vector.broadcast %cst_76 : f32 to vector<8x128xf32>
    %256 = arith.mulf %227, %255 : vector<8x128xf32>
    %257 = arith.mulf %231, %231 : vector<8x128xf32>
    %258 = arith.subf %256, %257 : vector<8x128xf32>
    %259 = tpu.reciprocal %258 {approx = true} : vector<8x128xf32> -> vector<8x128xf32>
    %260 = arith.mulf %258, %259 : vector<8x128xf32>
    %cst_77 = arith.constant 2.000000e+00 : f32
    %261 = vector.broadcast %cst_77 : f32 to vector<8x128xf32>
    %262 = arith.subf %261, %260 : vector<8x128xf32>
    %263 = arith.mulf %259, %262 : vector<8x128xf32>
    %cst_78 = arith.constant 1.250000e+00 : f32
    %264 = vector.broadcast %cst_78 : f32 to vector<8x128xf32>
    %265 = arith.mulf %264, %252 : vector<8x128xf32>
    %266 = arith.mulf %231, %254 : vector<8x128xf32>
    %267 = arith.subf %265, %266 : vector<8x128xf32>
    %268 = arith.mulf %267, %263 : vector<8x128xf32>
    %269 = arith.mulf %227, %254 : vector<8x128xf32>
    %270 = arith.mulf %231, %252 : vector<8x128xf32>
    %271 = arith.subf %269, %270 : vector<8x128xf32>
    %272 = arith.mulf %271, %263 : vector<8x128xf32>
    %cst_79 = arith.constant 2.000000e+00 : f32
    %273 = vector.broadcast %cst_79 : f32 to vector<8x128xf32>
    %274 = arith.mulf %273, %72 : vector<8x128xf32>
    %275 = arith.addf %5, %274 : vector<8x128xf32>
    %cst_80 = arith.constant 2.000000e+00 : f32
    %276 = vector.broadcast %cst_80 : f32 to vector<8x128xf32>
    %277 = arith.mulf %276, %142 : vector<8x128xf32>
    %278 = arith.addf %275, %277 : vector<8x128xf32>
    %279 = arith.addf %278, %212 : vector<8x128xf32>
    %cst_81 = arith.constant 0.00833333377 : f32
    %280 = vector.broadcast %cst_81 : f32 to vector<8x128xf32>
    %281 = arith.mulf %280, %279 : vector<8x128xf32>
    %282 = arith.addf %1, %281 : vector<8x128xf32>
    %cst_82 = arith.constant 2.000000e+00 : f32
    %283 = vector.broadcast %cst_82 : f32 to vector<8x128xf32>
    %284 = arith.mulf %283, %75 : vector<8x128xf32>
    %285 = arith.addf %7, %284 : vector<8x128xf32>
    %cst_83 = arith.constant 2.000000e+00 : f32
    %286 = vector.broadcast %cst_83 : f32 to vector<8x128xf32>
    %287 = arith.mulf %286, %145 : vector<8x128xf32>
    %288 = arith.addf %285, %287 : vector<8x128xf32>
    %289 = arith.addf %288, %215 : vector<8x128xf32>
    %cst_84 = arith.constant 0.00833333377 : f32
    %290 = vector.broadcast %cst_84 : f32 to vector<8x128xf32>
    %291 = arith.mulf %290, %289 : vector<8x128xf32>
    %292 = arith.addf %3, %291 : vector<8x128xf32>
    %cst_85 = arith.constant 2.000000e+00 : f32
    %293 = vector.broadcast %cst_85 : f32 to vector<8x128xf32>
    %294 = arith.mulf %293, %128 : vector<8x128xf32>
    %295 = arith.addf %58, %294 : vector<8x128xf32>
    %cst_86 = arith.constant 2.000000e+00 : f32
    %296 = vector.broadcast %cst_86 : f32 to vector<8x128xf32>
    %297 = arith.mulf %296, %198 : vector<8x128xf32>
    %298 = arith.addf %295, %297 : vector<8x128xf32>
    %299 = arith.addf %298, %268 : vector<8x128xf32>
    %cst_87 = arith.constant 0.00833333377 : f32
    %300 = vector.broadcast %cst_87 : f32 to vector<8x128xf32>
    %301 = arith.mulf %300, %299 : vector<8x128xf32>
    %302 = arith.addf %5, %301 : vector<8x128xf32>
    %cst_88 = arith.constant 2.000000e+00 : f32
    %303 = vector.broadcast %cst_88 : f32 to vector<8x128xf32>
    %304 = arith.mulf %303, %132 : vector<8x128xf32>
    %305 = arith.addf %62, %304 : vector<8x128xf32>
    %cst_89 = arith.constant 2.000000e+00 : f32
    %306 = vector.broadcast %cst_89 : f32 to vector<8x128xf32>
    %307 = arith.mulf %306, %202 : vector<8x128xf32>
    %308 = arith.addf %305, %307 : vector<8x128xf32>
    %309 = arith.addf %308, %272 : vector<8x128xf32>
    %cst_90 = arith.constant 0.00833333377 : f32
    %310 = vector.broadcast %cst_90 : f32 to vector<8x128xf32>
    %311 = arith.mulf %310, %309 : vector<8x128xf32>
    %312 = arith.addf %7, %311 : vector<8x128xf32>
    %cst_91 = arith.constant 3.14159274 : f32
    %313 = vector.broadcast %cst_91 : f32 to vector<8x128xf32>
    %314 = arith.addf %282, %313 : vector<8x128xf32>
    %cst_92 = arith.constant 0.159154937 : f32
    %315 = vector.broadcast %cst_92 : f32 to vector<8x128xf32>
    %316 = arith.mulf %314, %315 : vector<8x128xf32>
    %317 = math.floor %316 : vector<8x128xf32>
    %cst_93 = arith.constant 6.28318548 : f32
    %318 = vector.broadcast %cst_93 : f32 to vector<8x128xf32>
    %319 = arith.mulf %318, %317 : vector<8x128xf32>
    %320 = arith.subf %282, %319 : vector<8x128xf32>
    %cst_94 = arith.constant 3.14159274 : f32
    %321 = vector.broadcast %cst_94 : f32 to vector<8x128xf32>
    %322 = arith.addf %292, %321 : vector<8x128xf32>
    %cst_95 = arith.constant 0.159154937 : f32
    %323 = vector.broadcast %cst_95 : f32 to vector<8x128xf32>
    %324 = arith.mulf %322, %323 : vector<8x128xf32>
    %325 = math.floor %324 : vector<8x128xf32>
    %cst_96 = arith.constant 6.28318548 : f32
    %326 = vector.broadcast %cst_96 : f32 to vector<8x128xf32>
    %327 = arith.mulf %326, %325 : vector<8x128xf32>
    %328 = arith.subf %292, %327 : vector<8x128xf32>
    %cst_97 = arith.constant -12.566371 : f32
    %cst_98 = arith.constant 12.566371 : f32
    %329 = vector.broadcast %cst_97 : f32 to vector<8x128xf32>
    %330 = arith.maximumf %329, %302 : vector<8x128xf32>
    %331 = vector.broadcast %cst_98 : f32 to vector<8x128xf32>
    %332 = arith.minimumf %331, %330 : vector<8x128xf32>
    %cst_99 = arith.constant -28.274334 : f32
    %cst_100 = arith.constant 28.274334 : f32
    %333 = vector.broadcast %cst_99 : f32 to vector<8x128xf32>
    %334 = arith.maximumf %333, %312 : vector<8x128xf32>
    %335 = vector.broadcast %cst_100 : f32 to vector<8x128xf32>
    %336 = arith.minimumf %335, %334 : vector<8x128xf32>
    %c0_101 = arith.constant 0 : index
    %c0_102 = arith.constant 0 : index
    %c0_103 = arith.constant 0 : index
    %337 = vector.load %arg3[%c0_101, %c0_102, %c0_103] : memref<4x8x128xf32, #tpu.memory_space<vmem>>, vector<1x8x128xf32>
    %338 = vector.shape_cast %337 : vector<1x8x128xf32> to vector<8x128xf32>
    %339 = vector.shape_cast %320 : vector<8x128xf32> to vector<1x8x128xf32>
    tpu.vector_store %arg3[%c0_101, %c0_102, %c0_103], %339 {strides = array<i32>} : memref<4x8x128xf32, #tpu.memory_space<vmem>>, vector<1x8x128xf32>,
    %c1_104 = arith.constant 1 : index
    %c0_105 = arith.constant 0 : index
    %c0_106 = arith.constant 0 : index
    %340 = vector.load %arg3[%c1_104, %c0_105, %c0_106] : memref<4x8x128xf32, #tpu.memory_space<vmem>>, vector<1x8x128xf32>
    %341 = vector.shape_cast %340 : vector<1x8x128xf32> to vector<8x128xf32>
    %342 = vector.shape_cast %328 : vector<8x128xf32> to vector<1x8x128xf32>
    tpu.vector_store %arg3[%c1_104, %c0_105, %c0_106], %342 {strides = array<i32>} : memref<4x8x128xf32, #tpu.memory_space<vmem>>, vector<1x8x128xf32>,
    %c2_107 = arith.constant 2 : index
    %c0_108 = arith.constant 0 : index
    %c0_109 = arith.constant 0 : index
    %343 = vector.load %arg3[%c2_107, %c0_108, %c0_109] : memref<4x8x128xf32, #tpu.memory_space<vmem>>, vector<1x8x128xf32>
    %344 = vector.shape_cast %343 : vector<1x8x128xf32> to vector<8x128xf32>
    %345 = vector.shape_cast %332 : vector<8x128xf32> to vector<1x8x128xf32>
    tpu.vector_store %arg3[%c2_107, %c0_108, %c0_109], %345 {strides = array<i32>} : memref<4x8x128xf32, #tpu.memory_space<vmem>>, vector<1x8x128xf32>,
    %c3_110 = arith.constant 3 : index
    %c0_111 = arith.constant 0 : index
    %c0_112 = arith.constant 0 : index
    %346 = vector.load %arg3[%c3_110, %c0_111, %c0_112] : memref<4x8x128xf32, #tpu.memory_space<vmem>>, vector<1x8x128xf32>
    %347 = vector.shape_cast %346 : vector<1x8x128xf32> to vector<8x128xf32>
    %348 = vector.shape_cast %336 : vector<8x128xf32> to vector<1x8x128xf32>
    tpu.vector_store %arg3[%c3_110, %c0_111, %c0_112], %348 {strides = array<i32>} : memref<4x8x128xf32, #tpu.memory_space<vmem>>, vector<1x8x128xf32>,
    %349 = arith.addf %320, %328 : vector<8x128xf32>
    %350 = math.cos %320 : vector<8x128xf32>
    %cst_113 = arith.constant 0.000000e+00 : f32
    %351 = vector.broadcast %cst_113 : f32 to vector<8x128xf32>
    %352 = arith.subf %351, %350 : vector<8x128xf32>
    %353 = math.cos %349 : vector<8x128xf32>
    %354 = arith.subf %352, %353 : vector<8x128xf32>
    %cst_114 = arith.constant 1.000000e+00 : f32
    %355 = vector.broadcast %cst_114 : f32 to vector<8x128xf32>
    %356 = arith.cmpf ogt, %354, %355 : vector<8x128xf32>
    %357 = arith.extui %356 : vector<8x128xi1> to vector<8x128xi32>
    %358 = arith.sitofp %357 : vector<8x128xi32> to vector<8x128xf32>
    %c0_115 = arith.constant 0 : index
    %c0_116 = arith.constant 0 : index
    %359 = vector.load %arg5[%c0_115, %c0_116] : memref<8x128xf32, #tpu.memory_space<vmem>>, vector<8x128xf32>
    tpu.vector_store %arg5[%c0_115, %c0_116], %358 {strides = array<i32>} : memref<8x128xf32, #tpu.memory_space<vmem>>, vector<8x128xf32>,
    %360 = math.sin %320 : vector<8x128xf32>
    %361 = math.sin %349 : vector<8x128xf32>
    %362 = arith.addf %360, %361 : vector<8x128xf32>
    %c0_117 = arith.constant 0 : index
    %c0_118 = arith.constant 0 : index
    %363 = vector.load %arg4[%c0_117, %c0_118] : memref<8x128xf32, #tpu.memory_space<vmem>>, vector<8x128xf32>
    tpu.vector_store %arg4[%c0_117, %c0_118], %362 {strides = array<i32>} : memref<8x128xf32, #tpu.memory_space<vmem>>, vector<8x128xf32>,
    return
  }
  func.func @transform_0(%arg0: i32) -> (i32, i32, i32) {
    %c0_i32 = arith.constant 0 : i32
    %c0_i32_0 = arith.constant 0 : i32
    %c0_i32_1 = arith.constant 0 : i32
    return %c0_i32, %arg0, %c0_i32_0 : i32, i32, i32
  }
  func.func @transform_1(%arg0: i32) -> (i32, i32) {
    %c0_i32 = arith.constant 0 : i32
    %c0_i32_0 = arith.constant 0 : i32
    return %arg0, %c0_i32 : i32, i32
  }
  func.func @transform_2(%arg0: i32) -> (i32, i32, i32) {
    %c0_i32 = arith.constant 0 : i32
    %c0_i32_0 = arith.constant 0 : i32
    %c0_i32_1 = arith.constant 0 : i32
    return %c0_i32, %arg0, %c0_i32_0 : i32, i32, i32
  }
  func.func @transform_3(%arg0: i32) -> (i32, i32) {
    %c0_i32 = arith.constant 0 : i32
    %c0_i32_0 = arith.constant 0 : i32
    return %arg0, %c0_i32 : i32, i32
  }
  func.func @transform_4(%arg0: i32) -> (i32, i32) {
    %c0_i32 = arith.constant 0 : i32
    %c0_i32_0 = arith.constant 0 : i32
    return %arg0, %c0_i32 : i32, i32
  }
}

</mosaic_0001>

<bundles_post_ra>
// kernel: tpu_custom_call.1
= control target key start
LH: loop header
LB: loop body
LE: loop exit
PB: predicated region body
PF: predicated region fallthrough
CT: control target
= control target key end

     0   :  { %10 = vsyncpa [#allocation3], 0  ;;  %s5819_s0 = inlined_call_operand.hbm [shape: f32[4,8,128], index: 0, kind: input, shape index: {}]   ;;  %s5820_s1 = inlined_call_operand.hbm [shape: f32[8,128], index: 1, kind: input, shape index: {}]   ;;  %s5821_s2 = inlined_call_operand.hbm [shape: f32[4,8,128], index: 2, kind: output, shape index: {0}]   ;;  %s5822_s3 = inlined_call_operand.hbm [shape: f32[8,128], index: 3, kind: output, shape index: {1}]   ;;  %s5823_s4 = inlined_call_operand.hbm [shape: f32[8,128], index: 4, kind: output, shape index: {2}]  }
   0x1   :  { %11 = vsyncpa [#allocation6], 0 }
   0x2   :  { %12 = vsyncpa [#allocation4], 0 }
   0x3   :  { %13 = vsyncpa [#allocation9], 0  ;;  %s18_s17 = sshll.u32 %s5819_s0, 4  ;;  %s3642_s18 = smov [#allocation2]   ;;  %s19_s17 = int_to_ptr.hbm [resolvable:$true] %s18_s17 }
   0x4   :  { %s20_s19 = sshll.u32 %s3642_s18, 4  ;;  %s32_s22 = sshll.u32 %s5820_s1, 4  ;;  %s21_s19 = int_to_ptr.vmem [resolvable:$true] %s20_s19  ;;  %s33_s22 = int_to_ptr.hbm [resolvable:$true] %s32_s22 }
   0x5   :  { %s3643_s23 = smov 128   ;;  %s3644_s24 = smov 8  }
   0x6   :  { %26 = dma.hbm_to_vmem [thread:$0]  %s19_s17, 512, %s21_s19, [#allocation3], %s3643_s23, %s3643_s23, %s3644_s24  }
   0x7   :  { %s3645_s25 = smov [#allocation5]  }
   0x8   :  { %s34_s26 = sshll.u32 %s3645_s25, 4  ;;  %s35_s26 = int_to_ptr.vmem [resolvable:$true] %s34_s26 }
   0x9   :  { %37 = dma.hbm_to_vmem [thread:$0]  %s33_s22, 128, %s35_s26, [#allocation6]  }
   0xa   :  { %3634 = dma.done.wait [#allocation3], 512  }
   0xb   :  { %3635 = vsyncadd [#allocation3], 4294966784 }
   0xc   :  { %3636 = dma.done.wait [#allocation6], 128  }
   0xd   :  { %3637 = vsyncadd [#allocation6], 4294967168  ;;  %v3691_v0 = vld [vmem:[#allocation2] sm:$0xff]  ;;  %v3693_v1 = vld [vmem:[#allocation2 + $0x8] sm:$0xff]  ;;  %v5825_v27 = vmov 683565275  }
   0xe   :  { %v54_v2 = vand.u32 2147483647, %v3693_v1  ;;  %v57_v3 = vand.u32 2139095040, %v3693_v1  ;;  %v3699_v4 = vadd.f32 %v3693_v1, %v3691_v0  ;;  %v363_v5 = vand.u32 2147483647, %v3691_v0  ;;  %s3653_s0 = smov [#allocation8]  }
   0xf   :  { %v366_v6 = vand.u32 2139095040, %v3691_v0  ;;  %v5837_v29 = vmov 2475754826   ;;  %v5835_v31 = vmov 2131351028   ;;  %s5567_s1 = sshll.u32 %s3653_s0, 4  ;;  %s3386_s1 = int_to_ptr.vmem [resolvable:$true] %s5567_s1 }
  0x10   :  { %v58_v7 = vshrl.u32 %v57_v3, 23  ;;  %v61_v8 = vand.u32 8388607, %v54_v2  ;;  %v521_v10 = vand.u32 2139095040, %v3699_v4  ;;  %v370_v14 = vand.u32 8388607, %v363_v5 }
  0x11   :  { %v367_v9 = vshrl.u32 %v366_v6, 23  ;;  %v5831_v33 = vmov 2102212464   ;;  %v5827_v35 = vmov 920167782   ;;  %s3387_s29 = sshll.u32 %s5822_s3, 4  ;;  %s3388_s29 = int_to_ptr.hbm [resolvable:$true] %s3387_s29 }
  0x12   :  { %v3418_v11 = vadd.s32 4294967169, %v58_v7  ;;  %v62_v12 = vor.u32 8388608, %v61_v8  ;;  %v522_v17 = vshrl.u32 %v521_v10, 23  ;;  %v371_v20 = vor.u32 8388608, %v370_v14  ;;  %s3654_s3 = smov [#allocation10]   ;;  %s3398_s7 = sshll.u32 %s5823_s4, 4  ;;  %s3399_s7 = int_to_ptr.hbm [resolvable:$true] %s3398_s7 }
  0x13   :  { %v3424_v13 = vadd.s32 4294967169, %v367_v9  ;;  %v5829_v44 = vmov 1326507024   ;;  %s3396_s30 = sshll.u32 %s3654_s3, 4  ;;  %s3656_s4 = smov [#allocation7]   ;;  %s3397_s30 = int_to_ptr.vmem [resolvable:$true] %s3396_s30 }
  0x14   :  { %v64_v15 = vadd.s32 1, %v3418_v11  ;;  %v3708_v19 = vshll.u32 %v62_v12, 8  ;;  %v3714_v25 = vadd.s32 4294967169, %v522_v17  ;;  %v3722_v38 = vshll.u32 %v371_v20, 8  ;;  %s3371_s8 = sshll.u32 %s3656_s4, 4  ;;  %s3373_s11 = sshll.u32 %s5821_s2, 4  ;;  %s3372_s8 = int_to_ptr.vmem [resolvable:$true] %s3371_s8  ;;  %s3374_s11 = int_to_ptr.hbm [resolvable:$true] %s3373_s11 }
  0x15   :  { %v373_v16 = vadd.s32 1, %v3424_v13 }
  0x16   :  { %vm65_vm0 = vcmp.gt.s32.totalorder %v64_v15, 0  ;;  %v103_v37 = vand.u32 65535, %v3708_v19  ;;  %v104_v42 = vshrl.u32 %v3708_v19, 16 }
  0x17   :  { %v66_v18 = vsel %vm65_vm0, %v64_v15, 0  ;;  %vm374_vm1 = vcmp.gt.s32.totalorder %v373_v16, 0 }
  0x18   :  { %v68_v21 = vand.u32 31, %v66_v18  ;;  %v375_v22 = vsel %vm374_vm1, %v373_v16, 0  ;;  %v3710_v23 = vshrl.u32 %v66_v18, 5 }
  0x19   :  { %v3712_v24 = vand.u32 31, %v375_v22  ;;  %v3742_v55 = vshrl.u32 %v375_v22, 5 }
  0x1a   :  { %v69_v26 = vsub.s32 32, %v68_v21  ;;  %v71_v28 = vshll.u32 %v5825_v27, %v68_v21  ;;  %v74_v30 = vshll.u32 %v5837_v29, %v68_v21  ;;  %v77_v32 = vshll.u32 %v5835_v31, %v68_v21 }
  0x1b   :  { %v80_v34 = vshll.u32 %v5831_v33, %v68_v21  ;;  %v83_v36 = vshll.u32 %v5827_v35, %v68_v21  ;;  %vm86_vm2 = vcmp.lt.s32.totalorder %v3710_v23, 1  ;;  %vm89_vm3 = vcmp.lt.s32.totalorder %v3710_v23, 4 }
  0x1c   :  { %v72_v39 = vshrl.u32 %v5837_v29, %v69_v26  ;;  %v75_v40 = vshrl.u32 %v5835_v31, %v69_v26  ;;  %v78_v41 = vshrl.u32 %v5831_v33, %v69_v26  ;;  %v81_v43 = vshrl.u32 %v5827_v35, %v69_v26 }
  0x1d   :  { %v84_v45 = vshrl.u32 %v5829_v44, %v69_v26  ;;  %v3733_v49 = vsub.s32 32, %v3712_v24  ;;  %v70_v50 = vshrl.u32 %v5825_v27, %v69_v26  ;;  %vm88_vm4 = vcmp.lt.s32.totalorder %v3710_v23, 3 }
  0x1e   :  { %v73_v46 = vor.u32 %v72_v39, %v71_v28  ;;  %v76_v47 = vor.u32 %v75_v40, %v74_v30  ;;  %v79_v48 = vor.u32 %v78_v41, %v77_v32  ;;  %v82_v51 = vor.u32 %v81_v43, %v80_v34 }
  0x1f   :  { %v85_v52 = vor.u32 %v84_v45, %v83_v36  ;;  %vm87_vm5 = vcmp.lt.s32.totalorder %v3710_v23, 2  ;;  %v380_v58 = vshll.u32 %v5825_v27, %v3712_v24  ;;  %v383_v59 = vshll.u32 %v5837_v29, %v3712_v24 }
  0x20   :  { %v94_v53 = vsel %vm86_vm2, %v73_v46, %v76_v47  ;;  %v98_v54 = vsel %vm86_vm2, %v76_v47, %v79_v48  ;;  %v95_v56 = vsel %vm89_vm3, %v82_v51, 920167782  ;;  %v91_v60 = vsel %vm89_vm3, %v79_v48, 2102212464 }
  0x21   :  { %v99_v57 = vsel %vm89_vm3, %v85_v52, 1326507024  ;;  %v96_v61 = vsel %vm88_vm4, %v79_v48, %v95_v56  ;;  %v381_v63 = vshrl.u32 %v5837_v29, %v3733_v49  ;;  %v90_v3 = vsel %vm86_vm2, %v70_v50, %v73_v46 }
  0x22   :  { %v100_v62 = vsel %vm88_vm4, %v82_v51, %v99_v57  ;;  %v97_v6 = vsel %vm87_vm5, %v94_v53, %v96_v61  ;;  %v384_v8 = vshrl.u32 %v5835_v31, %v3733_v49  ;;  %v92_v13 = vsel %vm88_vm4, %v76_v47, %v91_v60 }
  0x23   :  { %v101_v7 = vsel %vm87_vm5, %v98_v54, %v100_v62  ;;  %v127_v11 = vand.u32 65535, %v97_v6  ;;  %v128_v12 = vshrl.u32 %v97_v6, 16  ;;  %v3770_v14 = vor.u32 %v381_v63, %v380_v58 }
  0x24   :  { %v105_v9 = vand.u32 65535, %v101_v7  ;;  %v106_v10 = vshrl.u32 %v101_v7, 16  ;;  %v3772_v15 = vor.u32 %v384_v8, %v383_v59  ;;  %v386_v16 = vshll.u32 %v5835_v31, %v3712_v24 }
  0x25   :  { %v387_v21 = vshrl.u32 %v5831_v33, %v3733_v49  ;;  %v129_v26 = vmul.u32 %v127_v11, %v103_v37  ;;  %v130_v28 = vmul.u32 %v128_v12, %v103_v37  ;;  %v131_v30 = vmul.u32 %v127_v11, %v104_v42 }
  0x26   :  { %v107_v17 = vmul.u32 %v105_v9, %v103_v37  ;;  %v108_v18 = vmul.u32 %v106_v10, %v103_v37  ;;  %v109_v20 = vmul.u32 %v105_v9, %v104_v42  ;;  %v110_v22 = vmul.u32 %v106_v10, %v104_v42 }
  0x27   :  { %v132_v39 = vmul.u32 %v128_v12, %v104_v42  ;;  %v133_v41 = vshll.u32 %v130_v28, 16  ;;  %v134_v43 = vshrl.u32 %v130_v28, 16  ;;  %v135_v45 = vshll.u32 %v131_v30, 16 }
  0x28   :  { %v111_v32 = vshll.u32 %v108_v18, 16  ;;  %v112_v34 = vshrl.u32 %v108_v18, 16  ;;  %v113_v36 = vshll.u32 %v109_v20, 16  ;;  %v114_v40 = vshrl.u32 %v109_v20, 16 }
  0x29   :  { %v136_v47 = vshrl.u32 %v131_v30, 16  ;;  %v389_v48 = vshll.u32 %v5831_v33, %v3712_v24  ;;  %v3652_v50 = vmov 0   ;;  %vm137_vm7 = vc.u32 %v129_v26, %v133_v41 }
  0x2a   :  { %vm115_vm6 = vc.u32 %v107_v17, %v111_v32  ;;  %v117_v46 = vadd.s32 %v111_v32, %v107_v17  ;;  %v139_v37 = vadd.s32 %v133_v41, %v129_v26  ;;  %v390_v52 = vshrl.u32 %v5827_v35, %v3733_v49 }
  0x2b   :  { %v116_v51 = vsel %vm115_vm6, 1, %v3652_v50  ;;  %v138_v42 = vsel %vm137_vm7, 1, %v3652_v50  ;;  %v392_v54 = vshll.u32 %v5827_v35, %v3712_v24  ;;  %v388_v58 = vor.u32 %v387_v21, %v386_v16 }
  0x2c   :  { %v118_v53 = vadd.s32 %v116_v51, %v110_v22  ;;  %vm119_vm8 = vc.u32 %v117_v46, %v113_v36  ;;  %v140_v57 = vadd.s32 %v138_v42, %v132_v39  ;;  %vm141_vm9 = vc.u32 %v139_v37, %v135_v45 }
  0x2d   :  { %v120_v56 = vsel %vm119_vm8, 1, %v3652_v50  ;;  %v142_v60 = vsel %vm141_vm9, 1, %v3652_v50  ;;  %v391_v61 = vor.u32 %v390_v52, %v389_v48  ;;  %v393_v62 = vshrl.u32 %v5829_v44, %v3733_v49 }
  0x2e   :  { %v122_v59 = vadd.s32 %v120_v56, %v118_v53  ;;  %v3790_v63 = vadd.s32 %v139_v37, %v135_v45  ;;  %v144_v6 = vadd.s32 %v142_v60, %v140_v57  ;;  %vm395_vm10 = vcmp.lt.s32.totalorder %v3742_v55, 1 }
  0x2f   :  { %vm397_vm11 = vcmp.lt.s32.totalorder %v3742_v55, 3  ;;  %v394_v7 = vor.u32 %v393_v62, %v392_v54  ;;  %vm396_vm12 = vcmp.lt.s32.totalorder %v3742_v55, 2  ;;  %vm398_vm13 = vcmp.lt.s32.totalorder %v3742_v55, 4 }
  0x30   :  { %v123_v24 = vadd.s32 %v122_v59, %v112_v34  ;;  %v93_v8 = vsel %vm87_vm5, %v90_v3, %v92_v13  ;;  %v145_v9 = vadd.s32 %v144_v6, %v134_v43  ;;  %v403_v10 = vsel %vm395_vm10, %v3770_v14, %v3772_v15 }
  0x31   :  { %v404_v11 = vsel %vm398_vm13, %v391_v61, 920167782  ;;  %v407_v17 = vsel %vm395_vm10, %v3772_v15, %v388_v58  ;;  %v413_v23 = vshrl.u32 %v3722_v38, 16  ;;  %v408_v18 = vsel %vm398_vm13, %v394_v7, 1326507024 }
  0x32   :  { %v3804_v12 = vadd.s32 %v123_v24, %v114_v40  ;;  %v405_v16 = vsel %vm397_vm11, %v388_v58, %v404_v11  ;;  %v146_v3 = vadd.s32 %v145_v9, %v136_v47  ;;  %v412_v20 = vand.u32 65535, %v3722_v38 }
  0x33   :  { %v406_v13 = vsel %vm396_vm12, %v403_v10, %v405_v16  ;;  %v147_v21 = vmul.u32 %v3708_v19, %v93_v8  ;;  %v409_v22 = vsel %vm397_vm11, %v391_v61, %v408_v18  ;;  %v528_v34 = vadd.s32 1, %v3714_v25 }
  0x34   :  { %vm149_vm14 = vc.u32 %v3804_v12, %v3790_v63  ;;  %v436_v26 = vand.u32 65535, %v406_v13  ;;  %v150_v28 = vadd.s32 1, %v146_v3  ;;  %v410_v30 = vsel %vm396_vm12, %v407_v17, %v409_v22 }
  0x35   :  { %v437_v32 = vshrl.u32 %v406_v13, 16  ;;  %v379_v36 = vshrl.u32 %v5825_v27, %v3733_v49  ;;  %v414_v39 = vand.u32 65535, %v410_v30  ;;  %v415_v40 = vshrl.u32 %v410_v30, 16 }
  0x36   :  { %v440_v19 = vmul.u32 %v436_v26, %v413_v23  ;;  %v151_v41 = vsel %vm149_vm14, %v150_v28, %v146_v3  ;;  %v400_v43 = vsel %vm398_vm13, %v388_v58, 2102212464  ;;  %v438_v45 = vmul.u32 %v436_v26, %v412_v20 }
  0x37   :  { %v439_v46 = vmul.u32 %v437_v32, %v412_v20  ;;  %v152_v47 = vadd.s32 %v151_v41, %v147_v21  ;;  %v416_v48 = vmul.u32 %v414_v39, %v412_v20  ;;  %v417_v51 = vmul.u32 %v415_v40, %v412_v20 }
  0x38   :  { %v418_v37 = vmul.u32 %v414_v39, %v413_v23  ;;  %v441_v52 = vmul.u32 %v437_v32, %v413_v23  ;;  %v444_v42 = vshll.u32 %v440_v19, 16  ;;  %vm529_vm15 = vcmp.gt.s32.totalorder %v528_v34, 0 }
  0x39   :  { %v442_v53 = vshll.u32 %v439_v46, 16  ;;  %v153_v25 = vadd.s32 536870912, %v152_v47  ;;  %v419_v54 = vmul.u32 %v415_v40, %v413_v23  ;;  %v420_v49 = vshll.u32 %v417_v51, 16 }
  0x3a   :  { %v422_v56 = vshll.u32 %v418_v37, 16  ;;  %v399_v57 = vsel %vm395_vm10, %v379_v36, %v3770_v14  ;;  %v401_v58 = vsel %vm397_vm11, %v3772_v15, %v400_v43  ;;  %v443_v24 = vshrl.u32 %v439_v46, 16 }
  0x3b   :  { %vm446_vm0 = vc.u32 %v438_v45, %v442_v53  ;;  %v448_v59 = vadd.s32 %v442_v53, %v438_v45  ;;  %v3835_v60 = vshrl.u32 %v153_v25, 30  ;;  %vm424_vm1 = vc.u32 %v416_v48, %v420_v49 }
  0x3c   :  { %v426_v61 = vadd.s32 %v420_v49, %v416_v48  ;;  %v447_v62 = vsel %vm446_vm0, 1, %v3652_v50  ;;  %v425_v6 = vsel %vm424_vm1, 1, %v3652_v50  ;;  %v421_v14 = vshrl.u32 %v417_v51, 16 }
  0x3d   :  { %v449_v7 = vadd.s32 %v447_v62, %v441_v52  ;;  %vm450_vm2 = vc.u32 %v448_v59, %v444_v42  ;;  %v155_v8 = vshll.u32 %v3835_v60, 30  ;;  %v427_v9 = vadd.s32 %v425_v6, %v419_v54 }
  0x3e   :  { %vm428_vm3 = vc.u32 %v426_v61, %v422_v56  ;;  %v451_v10 = vsel %vm450_vm2, 1, %v3652_v50  ;;  %v530_v11 = vsel %vm529_vm15, %v528_v34, 0  ;;  %v423_v16 = vshrl.u32 %v418_v37, 16 }
  0x3f   :  { %v429_v15 = vsel %vm428_vm3, 1, %v3652_v50  ;;  %v445_v23 = vshrl.u32 %v440_v19, 16  ;;  %v453_v3 = vadd.s32 %v451_v10, %v449_v7  ;;  %v3843_v13 = vsub.s32 %v152_v47, %v155_v8 }
  0x40   :  { %v431_v17 = vadd.s32 %v429_v15, %v427_v9  ;;  %v402_v18 = vsel %vm396_vm12, %v399_v57, %v401_v58  ;;  %v3847_v21 = vadd.s32 %v448_v59, %v444_v42  ;;  %v532_v26 = vand.u32 31, %v530_v11 }
  0x41   :  { %v454_v22 = vadd.s32 %v453_v3, %v443_v24  ;;  %v158_v32 = vsub.s32 0, %v3843_v13  ;;  %v456_v34 = vmul.u32 %v3722_v38, %v402_v18  ;;  %vm157_vm4 = vcmp.lt.s32.totalorder %v3843_v13, 0 }
  0x42   :  { %v432_v20 = vadd.s32 %v431_v17, %v421_v14  ;;  %v3856_v55 = vsub.s32 32, %v532_v26  ;;  %v518_v41 = vand.u32 2147483647, %v3699_v4  ;;  %v3860_v43 = vshrl.u32 %v530_v11, 5 }
  0x43   :  { %v455_v30 = vadd.s32 %v454_v22, %v445_v23  ;;  %v159_v40 = vsel %vm157_vm4, %v158_v32, %v3843_v13  ;;  %v538_v45 = vshll.u32 %v5837_v29, %v532_v26  ;;  %v544_v46 = vshll.u32 %v5831_v33, %v532_v26 }
  0x44   :  { %v3849_v28 = vadd.s32 %v432_v20, %v423_v16  ;;  %v539_v38 = vshrl.u32 %v5835_v31, %v3856_v55  ;;  %v545_v47 = vshrl.u32 %v5827_v35, %v3856_v55  ;;  %v541_v48 = vshll.u32 %v5835_v31, %v532_v26 }
  0x45   :  { %v459_v36 = vadd.s32 1, %v455_v30  ;;  %v542_v51 = vshrl.u32 %v5831_v33, %v3856_v55  ;;  %v547_v37 = vshll.u32 %v5827_v35, %v532_v26  ;;  %v548_v52 = vshrl.u32 %v5829_v44, %v3856_v55 }
  0x46   :  { %vm458_vm5 = vc.u32 %v3849_v28, %v3847_v21  ;;  %v160_v53 = vclz %v159_v40  ;;  %v535_v25 = vshll.u32 %v5825_v27, %v532_v26  ;;  %v536_v54 = vshrl.u32 %v5837_v29, %v3856_v55 }
  0x47   :  { %v460_v39 = vsel %vm458_vm5, %v459_v36, %v455_v30  ;;  %v525_v49 = vand.u32 8388607, %v518_v41  ;;  %v546_v57 = vor.u32 %v545_v47, %v544_v46  ;;  %v3881_v58 = vor.u32 %v539_v38, %v538_v45 }
  0x48   :  { %v461_v19 = vadd.s32 %v460_v39, %v456_v34  ;;  %v543_v59 = vor.u32 %v542_v51, %v541_v48  ;;  %v549_v61 = vor.u32 %v548_v52, %v547_v37  ;;  %vm553_vm6 = vcmp.lt.s32.totalorder %v3860_v43, 4 }
  0x49   :  { %v3419_v62 = vadd.s32 4294967294, %v160_v53  ;;  %v3885_v24 = vor.u32 %v536_v54, %v535_v25  ;;  %vm550_vm7 = vcmp.lt.s32.totalorder %v3860_v43, 1  ;;  %v526_v7 = vor.u32 8388608, %v525_v49 }
  0x4a   :  { %v462_v42 = vadd.s32 536870912, %v461_v19  ;;  %vm552_vm8 = vcmp.lt.s32.totalorder %v3860_v43, 3  ;;  %v559_v14 = vsel %vm553_vm6, %v546_v57, 920167782  ;;  %vm551_vm9 = vcmp.lt.s32.totalorder %v3860_v43, 2 }
  0x4b   :  { %v562_v9 = vsel %vm550_vm7, %v3881_v58, %v543_v59  ;;  %v563_v15 = vsel %vm553_vm6, %v549_v61, 1326507024  ;;  %vm3420_vm10 = vcmp.lt.s32.totalorder %v3419_v62, 0  ;;  %v558_v11 = vsel %vm550_vm7, %v3885_v24, %v3881_v58 }
  0x4c   :  { %v3879_v56 = vshrl.u32 %v462_v42, 30  ;;  %v560_v16 = vsel %vm552_vm8, %v543_v59, %v559_v14  ;;  %v564_v17 = vsel %vm552_vm8, %v546_v57, %v563_v15  ;;  %v3909_v23 = vshll.u32 %v526_v7, 8 }
  0x4d   :  { %v565_v3 = vsel %vm551_vm9, %v562_v9, %v564_v17  ;;  %v163_v18 = vsel %vm3420_vm10, 0, %v3419_v62  ;;  %v561_v20 = vsel %vm551_vm9, %v558_v11, %v560_v16  ;;  %v148_v48 = vadd.s32 %v3790_v63, %v3804_v12 }
  0x4e   :  { %v464_v6 = vshll.u32 %v3879_v56, 30  ;;  %v567_v22 = vand.u32 65535, %v3909_v23  ;;  %v568_v30 = vshrl.u32 %v3909_v23, 16  ;;  %v569_v32 = vand.u32 65535, %v565_v3 }
  0x4f   :  { %v570_v34 = vshrl.u32 %v565_v3, 16  ;;  %v168_v39 = vsub.s32 4294967266, %v163_v18  ;;  %v591_v47 = vand.u32 65535, %v561_v20  ;;  %v164_v51 = vsub.s32 32, %v163_v18 }
  0x50   :  { %v3889_v8 = vsub.s32 %v461_v19, %v464_v6  ;;  %v592_v19 = vshrl.u32 %v561_v20, 16  ;;  %v571_v45 = vmul.u32 %v569_v32, %v567_v22  ;;  %v573_v38 = vmul.u32 %v569_v32, %v568_v30 }
  0x51   :  { %v572_v36 = vmul.u32 %v570_v34, %v567_v22  ;;  %v574_v37 = vmul.u32 %v570_v34, %v568_v30  ;;  %v169_v52 = vadd.s32 127, %v168_v39  ;;  %v595_v54 = vmul.u32 %v591_v47, %v568_v30 }
  0x52   :  { %v467_v10 = vsub.s32 0, %v3889_v8  ;;  %vm466_vm11 = vcmp.lt.s32.totalorder %v3889_v8, 0  ;;  %v594_v42 = vmul.u32 %v592_v19, %v567_v22  ;;  %v577_v25 = vshll.u32 %v573_v38, 16 }
  0x53   :  { %v575_v46 = vshll.u32 %v572_v36, 16  ;;  %v165_v49 = vshll.u32 %v3843_v13, %v163_v18  ;;  %v166_v57 = vshrl.u32 %v148_v48, %v164_v51  ;;  %v593_v7 = vmul.u32 %v591_v47, %v567_v22 }
  0x54   :  { %v468_v26 = vsel %vm466_vm11, %v467_v10, %v3889_v8  ;;  %v170_v14 = vshll.u32 %v169_v52, 23  ;;  %v597_v9 = vshll.u32 %v594_v42, 16  ;;  %v576_v63 = vshrl.u32 %v572_v36, 16 }
  0x55   :  { %v469_v40 = vclz %v468_v26  ;;  %vm579_vm12 = vc.u32 %v571_v45, %v575_v46  ;;  %v581_v62 = vadd.s32 %v575_v46, %v571_v45  ;;  %v596_v12 = vmul.u32 %v592_v19, %v568_v30 }
  0x56   :  { %v580_v61 = vsel %vm579_vm12, 1, %v3652_v50  ;;  %v599_v15 = vshll.u32 %v595_v54, 16  ;;  %v167_v10 = vor.u32 %v166_v57, %v165_v49  ;;  %v534_v11 = vshrl.u32 %v5825_v27, %v3856_v55 }
  0x57   :  { %v3425_v53 = vadd.s32 4294967294, %v469_v40  ;;  %v582_v6 = vadd.s32 %v580_v61, %v574_v37  ;;  %vm583_vm14 = vc.u32 %v581_v62, %v577_v25  ;;  %v555_v13 = vsel %vm553_vm6, %v543_v59, 2102212464 }
  0x58   :  { %v584_v16 = vsel %vm583_vm14, 1, %v3652_v50  ;;  %vm601_vm15 = vc.u32 %v593_v7, %v597_v9  ;;  %v603_v3 = vadd.s32 %v597_v9, %v593_v7  ;;  %v171_v18 = vor.u32 4788187, %v170_v14 }
  0x59   :  { %vm3426_vm13 = vcmp.lt.s32.totalorder %v3425_v53, 0  ;;  %v586_v17 = vadd.s32 %v584_v16, %v582_v6  ;;  %v578_v22 = vshrl.u32 %v573_v38, 16  ;;  %v602_v26 = vsel %vm601_vm15, 1, %v3652_v50 }
  0x5a   :  { %v472_v20 = vsel %vm3426_vm13, 0, %v3425_v53  ;;  %v598_v30 = vshrl.u32 %v594_v42, 16  ;;  %v604_v34 = vadd.s32 %v602_v26, %v596_v12  ;;  %vm605_vm0 = vc.u32 %v603_v3, %v599_v15  ;;  %v3967_v26 = vld [vmem:[#allocation2 + $0x18] sm:$0xff] }
  0x5b   :  { %v587_v32 = vadd.s32 %v586_v17, %v576_v63  ;;  %v554_v55 = vsel %vm550_vm7, %v534_v11, %v3885_v24  ;;  %v556_v59 = vsel %vm552_vm8, %v3881_v58, %v555_v13  ;;  %v606_v36 = vsel %vm605_vm0, 1, %v3652_v50 }
  0x5c   :  { %v477_v39 = vsub.s32 4294967266, %v472_v20  ;;  %v600_v40 = vshrl.u32 %v595_v54, 16  ;;  %v608_v19 = vadd.s32 %v606_v36, %v604_v34  ;;  %v172_v45 = vand.u32 2147483647, %v171_v18 }
  0x5d   :  { %v174_v38 = vcvt.s32.f32 %v167_v10  ;;  %v588_v46 = vadd.s32 %v587_v32, %v578_v22  ;;  %v607_v47 = vadd.s32 %v603_v3, %v599_v15  ;;  %v557_v48 = vsel %vm551_vm9, %v554_v55, %v556_v59 }
  0x5e   :  { %v609_v51 = vadd.s32 %v608_v19, %v598_v30  ;;  %v457_v24 = vadd.s32 %v3847_v21, %v3849_v28  ;;  %v473_v37 = vsub.s32 32, %v472_v20  ;;  %v478_v52 = vadd.s32 127, %v477_v39 }
  0x5f   :  { %v175_v58 = vmul.f32 %v174_v38, %v172_v45  ;;  %v611_v42 = vmul.u32 %v3909_v23, %v557_v48  ;;  %vm613_vm1 = vc.u32 %v588_v46, %v607_v47  ;;  %v474_v54 = vshll.u32 %v3889_v8, %v472_v20 }
  0x60   :  { %v610_v53 = vadd.s32 %v609_v51, %v600_v40  ;;  %v475_v49 = vshrl.u32 %v457_v24, %v473_v37  ;;  %v479_v57 = vshll.u32 %v478_v52, 23  ;;  %vm56_vm2 = vcmp.lt.s32.totalorder %v3693_v1, 0 }
  0x61   :  { %v176_v62 = vxor.u32 2147483648, %v175_v58  ;;  %vm3944_vm3 = vcmp.le.f32.partialorder %v54_v2, 0.7853982  ;;  %vm365_vm5 = vcmp.lt.s32.totalorder %v3691_v0, 0  ;;  %vm3963_vm6 = vcmp.le.f32.partialorder %v363_v5, 0.7853982 }
  0x62   :  { %v614_v25 = vadd.s32 1, %v610_v53  ;;  %v476_v7 = vor.u32 %v475_v49, %v474_v54  ;;  %v480_v21 = vor.u32 4788187, %v479_v57  ;;  %v612_v22 = vadd.s32 %v607_v47, %v588_v46 }
  0x63   :  { %v177_v23 = vsel %vm56_vm2, %v176_v62, %v175_v58  ;;  %v178_v40 = vsub.s32 4, %v3835_v60  ;;  %v709_v45 = vmul.f32 0.025, %v3967_v26  ;;  %vm520_vm8 = vcmp.lt.s32.totalorder %v3699_v4, 0 }
  0x64   :  { %v615_v61 = vsel %vm613_vm1, %v614_v25, %v610_v53  ;;  %v3956_v9 = vsel %vm3944_vm3, %v3693_v1, %v177_v23  ;;  %v481_v63 = vand.u32 2147483647, %v480_v21  ;;  %v483_v12 = vcvt.s32.f32 %v476_v7 }
  0x65   :  { %v616_v43 = vadd.s32 %v615_v61, %v611_v42  ;;  %v182_v2 = vmul.f32 %v3956_v9, %v3956_v9  ;;  %v3979_v24 = vadd.f32 %v709_v45, %v3693_v1  ;;  %v179_v37 = vsel %vm56_vm2, %v178_v40, %v3835_v60 }
  0x66   :  { %v484_v11 = vmul.f32 %v483_v12, %v481_v63  ;;  %v181_v49 = vsel %vm3944_vm3, 0, %v179_v37  ;;  %v487_v12 = vsub.s32 4, %v3879_v56  ;;  %vm4008_vm11 = vcmp.le.f32.partialorder %v518_v41, 0.7853982 }
  0x67   :  { %v617_v6 = vadd.s32 536870912, %v616_v43  ;;  %v190_v17 = vmul.f32 -0.00019511016, %v182_v2  ;;  %v183_v32 = vmul.f32 -0.001358992, %v182_v2  ;;  %v719_v42 = vand.u32 2139095040, %v3979_v24 }
  0x68   :  { %v485_v3 = vxor.u32 2147483648, %v484_v11  ;;  %v352_v21 = vadd.s32 3, %v181_v49  ;;  %v3993_v63 = vand.u32 3, %v181_v49 }
  0x69   :  { %v3950_v8 = vshrl.u32 %v617_v6, 30  ;;  %v191_v30 = vadd.f32 0.008332121, %v190_v17  ;;  %v184_v38 = vadd.f32 0.041655596, %v183_v32  ;;  %v720_v61 = vshrl.u32 %v719_v42, 23 }
  0x6a   :  { %v486_v55 = vsel %vm365_vm5, %v485_v3, %v484_v11  ;;  %vm203_vm10 = vcmp.eq.s32.totalorder %v3993_v63, 2  ;;  %vm200_vm12 = vcmp.eq.s32.totalorder %v3993_v63, 0  ;;  %vm199_vm15 = vcmp.lt.s32.totalorder %v3993_v63, 2 }
  0x6b   :  { %v619_v14 = vshll.u32 %v3950_v8, 30  ;;  %v192_v46 = vmul.f32 %v191_v30, %v182_v2  ;;  %v3976_v47 = vsel %vm3963_vm6, %v3691_v0, %v486_v55  ;;  %v185_v25 = vmul.f32 %v184_v38, %v182_v2 }
  0x6c   :  { %v3986_v52 = vmul.f32 %v3976_v47, %v3976_v47  ;;  %v3430_v6 = vadd.s32 4294967169, %v720_v61 }
  0x6d   :  { %v620_v15 = vsub.s32 %v616_v43, %v619_v14  ;;  %v193_v54 = vadd.f32 -0.16666654, %v192_v46  ;;  %v186_v60 = vadd.f32 -0.4999988, %v185_v25 }
  0x6e   :  { %v499_v62 = vmul.f32 -0.00019511016, %v3986_v52  ;;  %v492_v23 = vmul.f32 -0.001358992, %v3986_v52  ;;  %v726_v14 = vadd.s32 1, %v3430_v6 }
  0x6f   :  { %vm621_vm4 = vcmp.lt.s32.totalorder %v620_v15, 0  ;;  %v622_v10 = vsub.s32 0, %v620_v15  ;;  %v194_v7 = vmul.f32 %v193_v54, %v182_v2 }
  0x70   :  { %vm727_vm9 = vcmp.gt.s32.totalorder %v726_v14, 0  ;;  %v493_v17 = vadd.f32 0.041655596, %v492_v23 }
  0x71   :  { %v623_v16 = vsel %vm621_vm4, %v622_v10, %v620_v15  ;;  %v187_v10 = vmul.f32 %v186_v60, %v182_v2  ;;  %v195_v11 = vadd.f32 1.0, %v194_v7 }
  0x72   :  { %v624_v13 = vclz %v623_v16  ;;  %v3997_v16 = vand.u32 3, %v352_v21 }
  0x73   :  { %v188_v30 = vadd.f32 1.0, %v187_v10 }
  0x74   :  { %v3428_v18 = vadd.s32 4294967294, %v624_v13  ;;  %v728_v13 = vsel %vm727_vm9, %v726_v14, 0  ;;  %vm355_vm13 = vcmp.eq.s32.totalorder %v3997_v16, 0  ;;  %vm358_vm14 = vcmp.eq.s32.totalorder %v3997_v16, 2 }
  0x75   :  { %v730_v3 = vand.u32 31, %v728_v13  ;;  %vm354_vm0 = vcmp.lt.s32.totalorder %v3997_v16, 2 }
  0x76   :  { %vm3429_vm7 = vcmp.lt.s32.totalorder %v3428_v18, 0 }
  0x77   :  { %v627_v34 = vsel %vm3429_vm7, 0, %v3428_v18  ;;  %v4002_v18 = vsel %vm365_vm5, %v487_v12, %v3879_v56  ;;  %v5824_v56 = vand.u32 2147483647, %v3979_v24  ;;  %v4018_v55 = vsub.s32 32, %v730_v3 }
  0x78   :  { %v628_v59 = vsub.s32 32, %v627_v34  ;;  %v629_v36 = vshll.u32 %v620_v15, %v627_v34  ;;  %v632_v39 = vsub.s32 4294967266, %v627_v34  ;;  %v500_v15 = vadd.f32 0.008332121, %v499_v62  ;;  %v4061_v62 = vld [vmem:[#allocation2 + $0x10] sm:$0xff] }
  0x79   :  { %v196_v34 = vmul.f32 %v195_v11, %v3956_v9  ;;  %v490_v41 = vsel %vm3963_vm6, 0, %v4002_v18  ;;  %v736_v40 = vshll.u32 %v5837_v29, %v730_v3  ;;  %v739_v45 = vshll.u32 %v5835_v31, %v730_v3 }
  0x7a   :  { %v630_v19 = vshrl.u32 %v612_v22, %v628_v59  ;;  %v633_v5 = vadd.s32 127, %v632_v39  ;;  %v501_v22 = vmul.f32 %v500_v15, %v3986_v52  ;;  %v494_v59 = vmul.f32 %v493_v17, %v3986_v52 }
  0x7b   :  { %v734_v39 = vshrl.u32 %v5837_v29, %v4018_v55  ;;  %v740_v38 = vshrl.u32 %v5831_v33, %v4018_v55  ;;  %v201_v46 = vxor.u32 2147483648, %v196_v34  ;;  %v742_v37 = vshll.u32 %v5831_v33, %v730_v3 }
  0x7c   :  { %v631_v48 = vor.u32 %v630_v19, %v629_v36  ;;  %v634_v51 = vshll.u32 %v633_v5, 23  ;;  %v733_v36 = vshll.u32 %v5825_v27, %v730_v3  ;;  %v737_v19 = vshrl.u32 %v5835_v31, %v4018_v55 }
  0x7d   :  { %v502_v20 = vadd.f32 -0.16666654, %v501_v22  ;;  %v4037_v5 = vshrl.u32 %v728_v13, 5  ;;  %v743_v25 = vshrl.u32 %v5827_v35, %v4018_v55  ;;  %v4056_v49 = vor.u32 %v740_v38, %v739_v45 }
  0x7e   :  { %v635_v53 = vor.u32 4788187, %v634_v51  ;;  %v638_v58 = vcvt.s32.f32 %v631_v48  ;;  %v204_v48 = vxor.u32 2147483648, %v188_v30  ;;  %v723_v51 = vand.u32 8388607, %v5824_v56 }
  0x7f   :  { %v4050_v42 = vor.u32 %v734_v39, %v733_v36  ;;  %v4054_v54 = vor.u32 %v737_v19, %v736_v40  ;;  %v746_v61 = vshrl.u32 %v5829_v44, %v4018_v55  ;;  %v744_v6 = vor.u32 %v743_v25, %v742_v37 }
  0x80   :  { %v636_v57 = vand.u32 2147483647, %v635_v53  ;;  %v495_v53 = vadd.f32 -0.4999988, %v494_v59  ;;  %vm748_vm1 = vcmp.lt.s32.totalorder %v4037_v5, 1  ;;  %vm750_vm2 = vcmp.lt.s32.totalorder %v4037_v5, 3 }
  0x81   :  { %v707_v60 = vmul.f32 0.025, %v4061_v62  ;;  %v724_v7 = vor.u32 8388608, %v723_v51  ;;  %vm751_vm3 = vcmp.lt.s32.totalorder %v4037_v5, 4  ;;  %v205_v23 = vsel %vm203_vm10, %v204_v48, %v196_v34 }
  0x82   :  { %v639_v43 = vmul.f32 %v638_v58, %v636_v57  ;;  %v745_v57 = vshll.u32 %v5827_v35, %v730_v3  ;;  %vm749_vm4 = vcmp.lt.s32.totalorder %v4037_v5, 2  ;;  %v757_v12 = vsel %vm751_vm3, %v744_v6, 920167782 }
  0x83   :  { %v756_v15 = vsel %vm748_vm1, %v4050_v42, %v4054_v54  ;;  %v760_v10 = vsel %vm748_vm1, %v4054_v54, %v4056_v49  ;;  %v202_v13 = vsel %vm200_vm12, %v188_v30, %v201_v46  ;;  %v357_v17 = vsel %vm355_vm13, %v188_v30, %v201_v46 }
  0x84   :  { %v640_v28 = vxor.u32 2147483648, %v639_v43  ;;  %v747_v21 = vor.u32 %v746_v61, %v745_v57  ;;  %v360_v3 = vsel %vm358_vm14, %v204_v48, %v196_v34  ;;  %v496_v18 = vmul.f32 %v495_v53, %v3986_v52 }
  0x85   :  { %v4097_v36 = vshll.u32 %v724_v7, 8  ;;  %v4100_v40 = vadd.f32 %v707_v60, %v3691_v0  ;;  %vm197_vm5 = vweird.f32 %v3693_v1  ;;  %v642_v19 = vsub.s32 4, %v3950_v8 }
  0x86   :  { %v641_v2 = vsel %vm520_vm8, %v640_v28, %v639_v43  ;;  %v503_v43 = vmul.f32 %v502_v20, %v3986_v52  ;;  %v758_v28 = vsel %vm750_vm2, %v4056_v49, %v757_v12  ;;  %v761_v11 = vsel %vm751_vm3, %v747_v21, 1326507024 }
  0x87   :  { %v4029_v9 = vsel %vm4008_vm11, %v3699_v4, %v641_v2  ;;  %v762_v59 = vsel %vm750_vm2, %v744_v6, %v761_v11  ;;  %v4104_v30 = vsel %vm749_vm4, %v756_v15, %v758_v28  ;;  %v206_v52 = vsel %vm199_vm15, %v202_v13, %v205_v23 }
  0x88   :  { %v4048_v58 = vmul.f32 %v4029_v9, %v4029_v9  ;;  %v504_v22 = vadd.f32 1.0, %v503_v43  ;;  %v763_v34 = vsel %vm749_vm4, %v760_v10, %v762_v59  ;;  %v361_v20 = vsel %vm354_vm0, %v357_v17, %v360_v3 }
  0x89   :  { %v765_v0 = vand.u32 65535, %v4097_v36  ;;  %v768_v45 = vshrl.u32 %v763_v34, 16  ;;  %v1028_v38 = vand.u32 2139095040, %v4100_v40  ;;  %v4116_v46 = vand.u32 3, %v490_v41 }
  0x8a   :  { %v654_v14 = vmul.f32 -0.00019511016, %v4048_v58  ;;  %v647_v2 = vmul.f32 -0.001358992, %v4048_v58  ;;  %v790_v51 = vshrl.u32 %v4104_v30, 16  ;;  %v497_v37 = vadd.f32 1.0, %v496_v18 }
  0x8b   :  { %v505_v1 = vmul.f32 %v504_v22, %v3976_v47  ;;  %v207_v53 = vsel %vm197_vm5, nan, %v206_v52  ;;  %v362_v25 = vsel %vm197_vm5, nan, %v361_v20  ;;  %v643_v16 = vsel %vm520_vm8, %v642_v19, %v3950_v8 }
  0x8c   :  { %v655_v39 = vadd.f32 0.008332121, %v654_v14  ;;  %v648_v48 = vadd.f32 0.041655596, %v647_v2  ;;  %v766_v57 = vshrl.u32 %v4097_v36, 16  ;;  %v767_v61 = vand.u32 65535, %v763_v34 }
  0x8d   :  { %v4125_v43 = vmul.u32 %v768_v45, %v765_v0  ;;  %v1029_v41 = vshrl.u32 %v1028_v38, 23  ;;  %vm509_vm6 = vcmp.eq.s32.totalorder %v4116_v46, 0  ;;  %v789_v47 = vand.u32 65535, %v4104_v30 }
  0x8e   :  { %v656_v63 = vmul.f32 %v655_v39, %v4048_v58  ;;  %v649_v6 = vmul.f32 %v648_v48, %v4048_v58  ;;  %v4130_v60 = vmul.u32 %v790_v51, %v765_v0  ;;  %v510_v7 = vxor.u32 2147483648, %v505_v1 }
  0x8f   :  { %v513_v21 = vxor.u32 2147483648, %v497_v37  ;;  %v673_v14 = vmul.f32 0.5, %v207_v53  ;;  %vm512_vm7 = vcmp.eq.s32.totalorder %v4116_v46, 2  ;;  %v645_v8 = vsel %vm4008_vm11, 0, %v643_v16 }
  0x90   :  { %v657_v23 = vadd.f32 -0.16666654, %v656_v63  ;;  %v4135_v12 = vadd.f32 3.5, %v207_v53  ;;  %v4137_v15 = vmul.f32 0.5, %v362_v25  ;;  %v769_v28 = vmul.u32 %v767_v61, %v765_v0 }
  0x91   :  { %v4139_v10 = vmul.u32 %v767_v61, %v766_v57  ;;  %v773_v11 = vshll.u32 %v4125_v43, 16  ;;  %v3436_v13 = vadd.s32 4294967169, %v1029_v41  ;;  %v650_v17 = vadd.f32 -0.4999988, %v649_v6 }
  0x92   :  { %v791_v3 = vmul.u32 %v789_v47, %v765_v0  ;;  %v4142_v18 = vmul.u32 %v789_v47, %v766_v57  ;;  %v795_v22 = vshll.u32 %v4130_v60, 16  ;;  %v4147_v32 = vsel %vm509_vm6, %v497_v37, %v510_v7 }
  0x93   :  { %v4149_v2 = vsel %vm512_vm7, %v513_v21, %v505_v1  ;;  %v658_v59 = vmul.f32 %v657_v23, %v4048_v58  ;;  %v4152_v39 = vadd.f32 1.25, %v673_v14  ;;  %v4154_v30 = vand.u32 3, %v645_v8 }
  0x94   :  { %v676_v34 = vsub.f32 0.0, %v4137_v15  ;;  %v4158_v52 = vmul.f32 1.25, %v4135_v12  ;;  %v4162_v19 = vadd.f32 %v3979_v24, %v4100_v40  ;;  %v775_v20 = vshll.u32 %v4139_v10, 16 }
  0x95   :  { %vm777_vm8 = vc.u32 %v769_v28, %v773_v11  ;;  %v779_v0 = vadd.s32 %v773_v11, %v769_v28  ;;  %v1035_v38 = vadd.s32 1, %v3436_v13  ;;  %v651_v48 = vmul.f32 %v650_v17, %v4048_v58 }
  0x96   :  { %v797_v37 = vshll.u32 %v4142_v18, 16  ;;  %vm799_vm9 = vc.u32 %v791_v3, %v795_v22  ;;  %v4167_v1 = vadd.s32 %v795_v22, %v791_v3  ;;  %v659_v63 = vadd.f32 1.0, %v658_v59 }
  0x97   :  { %v679_v53 = vmul.f32 2.0, %v4137_v15  ;;  %v772_v25 = vmul.u32 %v768_v45, %v766_v57  ;;  %vm1036_vm10 = vcmp.gt.s32.totalorder %v1035_v38, 0  ;;  %v4172_v16 = vmul.f32 %v4152_v39, %v4152_v39 }
  0x98   :  { %v778_v61 = vsel %vm777_vm8, 1, %v3652_v50  ;;  %v794_v41 = vmul.u32 %v790_v51, %v766_v57  ;;  %v1037_v6 = vsel %vm1036_vm10, %v1035_v38, 0  ;;  %v4176_v58 = vmul.f32 %v676_v34, %v3967_v26 }
  0x99   :  { %vm781_vm11 = vc.u32 %v779_v0, %v775_v20  ;;  %v800_v47 = vsel %vm799_vm9, 1, %v3652_v50  ;;  %v1183_v7 = vand.u32 2139095040, %v4162_v19  ;;  %v4180_v21 = vadd.f32 1.0, %v651_v48 }
  0x9a   :  { %v732_v45 = vshrl.u32 %v5825_v27, %v4018_v55  ;;  %vm803_vm12 = vc.u32 %v4167_v1, %v797_v37  ;;  %v1039_v23 = vand.u32 31, %v1037_v6  ;;  %v660_v51 = vmul.f32 %v659_v63, %v4029_v9 }
  0x9b   :  { %v753_v57 = vsel %vm751_vm3, %v4056_v49, 2102212464  ;;  %v780_v14 = vadd.s32 %v778_v61, %v772_v25  ;;  %v1025_v8 = vand.u32 2147483647, %v4100_v40  ;;  %v782_v28 = vsel %vm781_vm11, 1, %v3652_v50 }
  0x9c   :  { %v802_v11 = vadd.s32 %v800_v47, %v794_v41  ;;  %v4193_v13 = vshrl.u32 %v1037_v6, 5  ;;  %v4195_v55 = vsub.s32 32, %v1039_v23  ;;  %vm664_vm13 = vcmp.eq.s32.totalorder %v4154_v30, 0 }
  0x9d   :  { %vm667_vm14 = vcmp.eq.s32.totalorder %v4154_v30, 2  ;;  %v804_v9 = vsel %vm803_vm12, 1, %v3652_v50  ;;  %v1042_v17 = vshll.u32 %v5825_v27, %v1039_v23  ;;  %v1051_v49 = vshll.u32 %v5831_v33, %v1039_v23 }
  0x9e   :  { %v1054_v3 = vshll.u32 %v5827_v35, %v1039_v23  ;;  %v1043_v22 = vshrl.u32 %v5837_v29, %v4195_v55  ;;  %v1045_v59 = vshll.u32 %v5837_v29, %v1039_v23  ;;  %v1046_v34 = vshrl.u32 %v5835_v31, %v4195_v55 }
  0x9f   :  { %v1048_v20 = vshll.u32 %v5835_v31, %v1039_v23  ;;  %vm508_vm15 = vcmp.lt.s32.totalorder %v4116_v46, 2  ;;  %v668_v0 = vxor.u32 2147483648, %v4180_v21  ;;  %v1049_v38 = vshrl.u32 %v5831_v33, %v4195_v55 }
  0xa0   :  { %v1052_v48 = vshrl.u32 %v5827_v35, %v4195_v55  ;;  %v1055_v63 = vshrl.u32 %v5829_v44, %v4195_v55  ;;  %vm663_vm0 = vcmp.lt.s32.totalorder %v4154_v30, 2  ;;  %v796_v25 = vshrl.u32 %v4130_v60, 16 }
  0xa1   :  { %v806_v61 = vadd.s32 %v804_v9, %v802_v11  ;;  %v1032_v41 = vand.u32 8388607, %v1025_v8  ;;  %vm1060_vm3 = vcmp.lt.s32.totalorder %v4193_v13, 4  ;;  %v774_v6 = vshrl.u32 %v4125_v43, 16 }
  0xa2   :  { %v784_v47 = vadd.s32 %v782_v28, %v780_v14  ;;  %v1053_v23 = vor.u32 %v1052_v48, %v1051_v49  ;;  %v1056_v56 = vor.u32 %v1055_v63, %v1054_v3  ;;  %v4223_v27 = vor.u32 %v1043_v22, %v1042_v17 }
  0xa3   :  { %v4225_v35 = vor.u32 %v1046_v34, %v1045_v59  ;;  %v4227_v44 = vor.u32 %v1049_v38, %v1048_v20  ;;  %v1184_v33 = vshrl.u32 %v1183_v7, 23  ;;  %vm1057_vm5 = vcmp.lt.s32.totalorder %v4193_v13, 1 }
  0xa4   :  { %vm1059_vm6 = vcmp.lt.s32.totalorder %v4193_v13, 3  ;;  %v1066_v60 = vsel %vm1060_vm3, %v1053_v23, 920167782  ;;  %v1070_v43 = vsel %vm1060_vm3, %v1056_v56, 1326507024  ;;  %v665_v14 = vxor.u32 2147483648, %v660_v51 }
  0xa5   :  { %v798_v28 = vshrl.u32 %v4142_v18, 16  ;;  %v807_v11 = vadd.s32 %v806_v61, %v796_v25  ;;  %v1033_v9 = vor.u32 8388608, %v1032_v41  ;;  %v680_v17 = vmul.f32 %v679_v53, %v3967_v26 }
  0xa6   :  { %v776_v49 = vshrl.u32 %v4139_v10, 16  ;;  %v785_v7 = vadd.s32 %v784_v47, %v774_v6  ;;  %vm1058_vm7 = vcmp.lt.s32.totalorder %v4193_v13, 2  ;;  %v1065_v3 = vsel %vm1057_vm5, %v4223_v27, %v4225_v35 }
  0xa7   :  { %v1067_v56 = vsel %vm1059_vm6, %v4227_v44, %v1066_v60  ;;  %v1069_v22 = vsel %vm1057_vm5, %v4225_v35, %v4227_v44  ;;  %v1071_v10 = vsel %vm1059_vm6, %v1053_v23, %v1070_v43  ;;  %v694_v53 = vsub.f32 %v4158_v52, %v4172_v16  ;;  %v4278_v16 = vld [vmem:[#allocation2] sm:$0xff] }
  0xa8   :  { %v752_v59 = vsel %vm748_vm1, %v732_v45, %v4050_v42  ;;  %v754_v34 = vsel %vm750_vm2, %v4054_v54, %v753_v57  ;;  %v3439_v20 = vadd.s32 4294967169, %v1184_v33  ;;  %v666_v38 = vsel %vm664_vm13, %v4180_v21, %v665_v14 }
  0xa9   :  { %v669_v48 = vsel %vm667_vm14, %v668_v0, %v660_v51  ;;  %v808_v63 = vadd.s32 %v807_v11, %v798_v28  ;;  %v4265_v25 = vshll.u32 %v1033_v9, 8  ;;  %v4267_v52 = vadd.s32 %v785_v7, %v776_v49  ;;  %v53_v9 = vld [vmem:[#allocation5] sm:$0xff] }
  0xaa   :  { %v4272_v42 = vadd.s32 %v4167_v1, %v797_v37  ;;  %v1068_v33 = vsel %vm1058_vm7, %v1065_v3, %v1067_v56  ;;  %v1072_v54 = vsel %vm1058_vm7, %v1069_v22, %v1071_v10  ;;  %vm506_vm1 = vweird.f32 %v4278_v16 }
  0xab   :  { %v515_v21 = vsel %vm508_vm15, %v4147_v32, %v4149_v2  ;;  %vm661_vm2 = vweird.f32 %v3699_v4  ;;  %v670_v18 = vsel %vm663_vm0, %v666_v38, %v669_v48  ;;  %3496 = vrcp.f32 %v694_v53 }
  0xac   :  { %v755_v37 = vsel %vm749_vm4, %v752_v59, %v754_v34  ;;  %v1190_v1 = vadd.s32 1, %v3439_v20  ;;  %v812_v45 = vadd.s32 1, %v808_v63  ;;  %v1074_v51 = vand.u32 65535, %v4265_v25 }
  0xad   :  { %v1077_v57 = vshrl.u32 %v1072_v54, 16  ;;  %v1099_v0 = vshrl.u32 %v1068_v33, 16  ;;  %v678_v61 = vmul.f32 %v4176_v58, %v3967_v26  ;;  %v681_v46 = vmul.f32 %v680_v17, %v4061_v62 }
  0xae   :  { %vm811_vm8 = vc.u32 %v4267_v52, %v4272_v42  ;;  %v516_v4 = vsel %vm506_vm1, nan, %v515_v21  ;;  %v671_v32 = vsel %vm661_vm2, nan, %v670_v18  ;;  %v683_v5 = vmul.f32 %v4137_v15, %v4061_v62 }
  0xaf   :  { %v809_v2 = vmul.u32 %v4097_v36, %v755_v37  ;;  %v1075_v30 = vshrl.u32 %v4265_v25, 16  ;;  %v1076_v41 = vand.u32 65535, %v1072_v54  ;;  %v1098_v6 = vand.u32 65535, %v1068_v33 }
  0xb0   :  { %vm1191_vm4 = vcmp.gt.s32.totalorder %v1190_v1, 0  ;;  %v813_v47 = vsel %vm811_vm8, %v812_v45, %v808_v63  ;;  %v4300_v23 = vmul.u32 %v1077_v57, %v1074_v51  ;;  %v4302_v58 = vmul.u32 %v1099_v0, %v1074_v51 }
  0xb1   :  { %v4304_v60 = vpop.eup %3496  ;;  %v682_v43 = vsub.f32 %v678_v61, %v681_v46  ;;  %v684_v14 = vmul.f32 %v683_v5, %v4061_v62  ;;  %v685_v28 = vmul.f32 4.9, %v671_v32  ;;  %v686_v11 = vmul.f32 14.7, %v516_v4 }
  0xb2   :  { %v1192_v15 = vsel %vm1191_vm4, %v1190_v1, 0  ;;  %v814_v36 = vadd.s32 %v813_v47, %v809_v2  ;;  %v4307_v17 = vmul.u32 %v1076_v41, %v1075_v30  ;;  %v4309_v49 = vmul.u32 %v1098_v6, %v1075_v30 }
  0xb3   :  { %v1078_v7 = vmul.u32 %v1076_v41, %v1074_v51  ;;  %v1082_v3 = vshll.u32 %v4300_v23, 16  ;;  %v1100_v56 = vmul.u32 %v1098_v6, %v1074_v51  ;;  %v1104_v22 = vshll.u32 %v4302_v58, 16 }
  0xb4   :  { %v696_v10 = vmul.f32 %v4304_v60, %v694_v53  ;;  %v1194_v59 = vand.u32 31, %v1192_v15  ;;  %v687_v34 = vadd.f32 %v686_v11, %v685_v28  ;;  %v688_v20 = vsub.f32 0.0, %v682_v43 }
  0xb5   :  { %v690_v38 = vsub.f32 %v53_v9, %v684_v14  ;;  %v1180_v48 = vand.u32 2147483647, %v4162_v19  ;;  %v815_v63 = vadd.s32 536870912, %v814_v36  ;;  %v1084_v33 = vshll.u32 %v4307_v17, 16 }
  0xb6   :  { %v1106_v54 = vshll.u32 %v4309_v49, 16  ;;  %vm1086_vm9 = vc.u32 %v1078_v7, %v1082_v3  ;;  %v1088_v21 = vadd.s32 %v1082_v3, %v1078_v7  ;;  %vm1108_vm10 = vc.u32 %v1100_v56, %v1104_v22 }
  0xb7   :  { %v4317_v18 = vadd.s32 %v1104_v22, %v1100_v56  ;;  %v697_v37 = vsub.f32 2.0, %v696_v10  ;;  %v4319_v1 = vsub.s32 32, %v1194_v59  ;;  %v4321_v53 = vsub.f32 %v688_v20, %v687_v34 }
  0xb8   :  { %v4323_v45 = vsub.f32 %v690_v38, %v685_v28  ;;  %v1103_v51 = vmul.u32 %v1099_v0, %v1075_v30  ;;  %v1187_v61 = vand.u32 8388607, %v1180_v48  ;;  %v4327_v46 = vshrl.u32 %v815_v63, 30 }
  0xb9   :  { %v1081_v4 = vmul.u32 %v1077_v57, %v1075_v30  ;;  %v1087_v32 = vsel %vm1086_vm9, 1, %v3652_v50  ;;  %v1109_v5 = vsel %vm1108_vm10, 1, %v3652_v50  ;;  %vm4331_vm11 = vc.u32 %v1088_v21, %v1084_v33 }
  0xba   :  { %vm1112_vm12 = vc.u32 %v4317_v18, %v1106_v54  ;;  %v4338_v41 = vshrl.u32 %v1192_v15, 5  ;;  %v1200_v0 = vshll.u32 %v5837_v29, %v1194_v59  ;;  %v1201_v6 = vshrl.u32 %v5835_v31, %v4319_v1 }
  0xbb   :  { %v1203_v57 = vshll.u32 %v5835_v31, %v1194_v59  ;;  %v5855_v30 = vmov 2102212464   ;;  %v5856_v43 = vmov 920167782   ;;  %v1111_v28 = vadd.s32 %v1109_v5, %v1103_v51 }
  0xbc   :  { %v1204_v47 = vshrl.u32 %v5855_v30, %v4319_v1  ;;  %v1209_v14 = vshll.u32 %v5856_v43, %v1194_v59  ;;  %v1206_v11 = vshll.u32 %v5855_v30, %v1194_v59  ;;  %v1207_v9 = vshrl.u32 %v5856_v43, %v4319_v1 }
  0xbd   :  { %v5857_v15 = vmov 1326507024   ;;  %v703_v3 = vmul.f32 %v4323_v45, %v4135_v12  ;;  %v1089_v56 = vadd.s32 %v1087_v32, %v1081_v4  ;;  %v1113_v22 = vsel %vm1112_vm12, 1, %v3652_v50 }
  0xbe   :  { %v1210_v7 = vshrl.u32 %v5857_v15, %v4319_v1  ;;  %v1188_v10 = vor.u32 8388608, %v1187_v61  ;;  %v817_v34 = vshll.u32 %v4327_v46, 30  ;;  %v1091_v20 = vsel %vm4331_vm11, 1, %v3652_v50 }
  0xbf   :  { %v5858_v38 = vmov 683565275   ;;  %v1198_v21 = vshrl.u32 %v5837_v29, %v4319_v1  ;;  %v4362_v51 = vor.u32 %v1201_v6, %v1200_v0  ;;  %v4364_v5 = vor.u32 %v1204_v47, %v1203_v57 }
  0xc0   :  { %v1197_v63 = vshll.u32 %v5858_v38, %v1194_v59  ;;  %v1211_v33 = vor.u32 %v1210_v7, %v1209_v14  ;;  %vm1215_vm13 = vcmp.lt.s32.totalorder %v4338_v41, 4  ;;  %v1105_v12 = vshrl.u32 %v4302_v58, 16 }
  0xc1   :  { %v1115_v61 = vadd.s32 %v1113_v22, %v1111_v28  ;;  %v1208_v4 = vor.u32 %v1207_v9, %v1206_v11  ;;  %vm1212_vm14 = vcmp.lt.s32.totalorder %v4338_v41, 1  ;;  %v704_v32 = vmul.f32 %v4321_v53, %v4152_v39 }
  0xc2   :  { %v1083_v59 = vshrl.u32 %v4300_v23, 16  ;;  %v1093_v2 = vadd.s32 %v1091_v20, %v1089_v56  ;;  %vm1214_vm15 = vcmp.lt.s32.totalorder %v4338_v41, 3  ;;  %v4373_v0 = vsub.s32 %v814_v36, %v817_v34 }
  0xc3   :  { %v1225_v6 = vsel %vm1215_vm13, %v1211_v33, 1326507024  ;;  %v4377_v57 = vshll.u32 %v1188_v10, 8  ;;  %v4380_v58 = vmul.f32 %v4304_v60, %v697_v37  ;;  %v4382_v47 = vor.u32 %v1198_v21, %v1197_v63 }
  0xc4   :  { %vm1213_vm0 = vcmp.lt.s32.totalorder %v4338_v41, 2  ;;  %v1224_v23 = vsel %vm1212_vm14, %v4362_v51, %v4364_v5  ;;  %v1107_v36 = vshrl.u32 %v4309_v49, 16  ;;  %v1116_v14 = vadd.s32 %v1115_v61, %v1105_v12 }
  0xc5   :  { %v1221_v28 = vsel %vm1215_vm13, %v1208_v4, 920167782  ;;  %v1226_v11 = vsel %vm1214_vm15, %v1208_v4, %v1225_v6  ;;  %v705_v60 = vsub.f32 %v703_v3, %v704_v32  ;;  %v1041_v37 = vshrl.u32 %v5858_v38, %v4195_v55 }
  0xc6   :  { %v1085_v9 = vshrl.u32 %v4307_v17, 16  ;;  %v1094_v7 = vadd.s32 %v1093_v2, %v1083_v59  ;;  %v820_v56 = vsub.s32 0, %v4373_v0  ;;  %v1062_v22 = vsel %vm1060_vm3, %v4227_v44, 2102212464 }
  0xc7   :  { %v1227_v10 = vsel %vm1213_vm0, %v1224_v23, %v1226_v11  ;;  %v1229_v34 = vand.u32 65535, %v4377_v57  ;;  %v1220_v3 = vsel %vm1212_vm14, %v4382_v47, %v4362_v51  ;;  %v1222_v55 = vsel %vm1214_vm15, %v4364_v5, %v1221_v28 }
  0xc8   :  { %v1230_v17 = vshrl.u32 %v4377_v57, 16  ;;  %v1231_v20 = vand.u32 65535, %v1227_v10  ;;  %vm819_vm1 = vcmp.lt.s32.totalorder %v4373_v0, 0  ;;  %v1117_v44 = vadd.s32 %v1116_v14, %v1107_v36 }
  0xc9   :  { %v1232_v63 = vshrl.u32 %v1227_v10, 16  ;;  %v1061_v33 = vsel %vm1057_vm5, %v1041_v37, %v4223_v27  ;;  %v1063_v21 = vsel %vm1059_vm6, %v4225_v35, %v1062_v22  ;;  %v4419_v12 = vadd.s32 %v1094_v7, %v1085_v9 }
  0xca   :  { %v4424_v61 = vadd.s32 %v4317_v18, %v1106_v54  ;;  %v1223_v4 = vsel %vm1213_vm0, %v1220_v3, %v1222_v55  ;;  %v4429_v59 = vmul.f32 %v705_v60, %v4380_v58  ;;  %v821_v27 = vsel %vm819_vm1, %v820_v56, %v4373_v0 }
  0xcb   :  { %v1234_v32 = vmul.u32 %v1232_v63, %v1229_v34  ;;  %v1235_v2 = vmul.u32 %v1231_v20, %v1230_v17  ;;  %v1064_v35 = vsel %vm1058_vm7, %v1061_v33, %v1063_v21  ;;  %v1121_v6 = vadd.s32 1, %v1117_v44 }
  0xcc   :  { %v1233_v23 = vmul.u32 %v1231_v20, %v1229_v34  ;;  %vm1120_vm3 = vc.u32 %v4419_v12, %v4424_v61  ;;  %v1254_v49 = vshrl.u32 %v1223_v4, 16  ;;  %v822_v54 = vclz %v821_v27 }
  0xcd   :  { %v1237_v36 = vshll.u32 %v1234_v32, 16  ;;  %v1118_v18 = vmul.u32 %v4265_v25, %v1064_v35  ;;  %v1236_v14 = vmul.u32 %v1232_v63, %v1230_v17  ;;  %v1239_v28 = vshll.u32 %v1235_v2, 16 }
  0xce   :  { %v1253_v11 = vand.u32 65535, %v1223_v4  ;;  %v713_v60 = vmul.f32 0.025, %v4429_v59  ;;  %v1122_v37 = vsel %vm1120_vm3, %v1121_v6, %v1117_v44  ;;  %v1256_v7 = vmul.u32 %v1254_v49, %v1229_v34 }
  0xcf   :  { %vm1241_vm5 = vc.u32 %v1233_v23, %v1237_v36  ;;  %v1243_v9 = vadd.s32 %v1237_v36, %v1233_v23  ;;  %v3431_v56 = vadd.s32 4294967294, %v822_v54  ;;  %v1123_v22 = vadd.s32 %v1122_v37, %v1118_v18 }
  0xd0   :  { %v1242_v13 = vsel %vm1241_vm5, 1, %v3652_v50  ;;  %v1255_v3 = vmul.u32 %v1253_v11, %v1229_v34  ;;  %v4440_v55 = vadd.f32 %v713_v60, %v3967_v26  ;;  %v1238_v25 = vshrl.u32 %v1234_v32, 16 }
  0xd1   :  { %v1244_v10 = vadd.s32 %v1242_v13, %v1236_v14  ;;  %vm1245_vm6 = vc.u32 %v1243_v9, %v1239_v28  ;;  %v1257_v63 = vmul.u32 %v1253_v11, %v1230_v17  ;;  %v1258_v21 = vmul.u32 %v1254_v49, %v1230_v17 }
  0xd2   :  { %v1246_v20 = vsel %vm1245_vm6, 1, %v3652_v50  ;;  %v1259_v44 = vshll.u32 %v1256_v7, 16  ;;  %v699_v4 = vmul.f32 1.25, %v4321_v53  ;;  %v700_v27 = vmul.f32 %v4323_v45, %v4152_v39 }
  0xd3   :  { %v1248_v33 = vadd.s32 %v1246_v20, %v1244_v10  ;;  %vm3432_vm7 = vcmp.lt.s32.totalorder %v3431_v56, 0  ;;  %v1261_v35 = vshll.u32 %v1257_v63, 16  ;;  %v1124_v6 = vadd.s32 536870912, %v1123_v22 }
  0xd4   :  { %v1196_v34 = vshrl.u32 %v5858_v38, %v4319_v1  ;;  %vm1263_vm2 = vc.u32 %v1255_v3, %v1259_v44  ;;  %v1265_v26 = vadd.s32 %v1259_v44, %v1255_v3  ;;  %v1240_v32 = vshrl.u32 %v1235_v2, 16  ;;  %v3505_v1 = vld [vmem:[#allocation2 + $0x8] sm:$0xff] }
  0xd5   :  { %v1249_v23 = vadd.s32 %v1248_v33, %v1238_v25  ;;  %v1264_v36 = vsel %vm1263_vm2, 1, %v3652_v50  ;;  %v1371_v17 = vmul.f32 0.025, %v4440_v55  ;;  %v1217_v53 = vsel %vm1215_vm13, %v4364_v5, 2102212464 }
  0xd6   :  { %v1260_v49 = vshrl.u32 %v1256_v7, 16  ;;  %v1266_v39 = vadd.s32 %v1264_v36, %v1258_v21  ;;  %vm1267_vm8 = vc.u32 %v1265_v26, %v1261_v35  ;;  %v701_v45 = vsub.f32 %v699_v4, %v700_v27 }
  0xd7   :  { %v825_v54 = vsel %vm3432_vm7, 0, %v3431_v56  ;;  %v1268_v18 = vsel %vm1267_vm8, 1, %v3652_v50  ;;  %v4454_v14 = vadd.f32 %v3505_v1, %v1371_v17  ;;  %v4456_v2 = vshrl.u32 %v1124_v6, 30 }
  0xd8   :  { %v1216_v28 = vsel %vm1212_vm14, %v1196_v34, %v4382_v47  ;;  %v1262_v11 = vshrl.u32 %v1257_v63, 16  ;;  %v1270_v60 = vadd.s32 %v1268_v18, %v1266_v39  ;;  %v1218_v5 = vsel %vm1214_vm15, %v4362_v51, %v1217_v53 }
  0xd9   :  { %v4464_v37 = vadd.s32 %v1249_v23, %v1240_v32  ;;  %v4466_v13 = vadd.s32 %v1265_v26, %v1261_v35  ;;  %v1380_v9 = vand.u32 2139095040, %v4454_v14  ;;  %v830_v7 = vsub.s32 4294967266, %v825_v54 }
  0xda   :  { %v1271_v56 = vadd.s32 %v1270_v60, %v1260_v49  ;;  %v4470_v10 = vmul.f32 %v701_v45, %v4380_v58  ;;  %v1126_v47 = vshll.u32 %v4456_v2, 30  ;;  %v1219_v25 = vsel %vm1213_vm0, %v1216_v28, %v1218_v5 }
  0xdb   :  { %v1381_v3 = vshrl.u32 %v1380_v9, 23  ;;  %vm1275_vm4 = vc.u32 %v4464_v37, %v4466_v13  ;;  %v810_v63 = vadd.s32 %v4272_v42, %v4267_v52  ;;  %v826_v33 = vsub.s32 32, %v825_v54 }
  0xdc   :  { %v1272_v20 = vadd.s32 %v1271_v56, %v1262_v11  ;;  %v831_v21 = vadd.s32 127, %v830_v7  ;;  %v711_v58 = vmul.f32 0.025, %v4470_v10  ;;  %v1273_v4 = vmul.u32 %v4377_v57, %v1219_v25 }
  0xdd   :  { %v3442_v51 = vadd.s32 4294967169, %v1381_v3  ;;  %v4481_v35 = vsub.s32 %v1123_v22, %v1126_v47  ;;  %v827_v6 = vshll.u32 %v4373_v0, %v825_v54  ;;  %v828_v34 = vshrl.u32 %v810_v63, %v826_v33 }
  0xde   :  { %v1276_v44 = vadd.s32 1, %v1272_v20  ;;  %v832_v26 = vshll.u32 %v831_v21, 23  ;;  %v4485_v23 = vadd.f32 %v711_v58, %v4061_v62  ;;  %v5834_v0 = vand.u32 2147483647, %v4454_v14 }
  0xdf   :  { %v1387_v27 = vadd.s32 1, %v3442_v51  ;;  %v1129_v42 = vsub.s32 0, %v4481_v35  ;;  %vm1128_vm10 = vcmp.lt.s32.totalorder %v4481_v35, 0  ;;  %v829_v57 = vor.u32 %v828_v34, %v827_v6 }
  0xe0   :  { %v1277_v41 = vsel %vm1275_vm4, %v1276_v44, %v1272_v20  ;;  %v833_v17 = vor.u32 4788187, %v832_v26  ;;  %v1369_v53 = vmul.f32 0.025, %v4485_v23  ;;  %v1384_v28 = vand.u32 8388607, %v5834_v0 }
  0xe1   :  { %vm1388_vm9 = vcmp.gt.s32.totalorder %v1387_v27, 0  ;;  %v1278_v52 = vadd.s32 %v1277_v41, %v1273_v4  ;;  %v1130_v49 = vsel %vm1128_vm10, %v1129_v42, %v4481_v35  ;;  %v836_v62 = vcvt.s32.f32 %v829_v57 }
  0xe2   :  { %v1389_v32 = vsel %vm1388_vm9, %v1387_v27, 0  ;;  %v834_v45 = vand.u32 2147483647, %v833_v17  ;;  %v1131_v54 = vclz %v1130_v49  ;;  %v4497_v1 = vadd.f32 %v4278_v16, %v1369_v53 }
  0xe3   :  { %v1391_v36 = vand.u32 31, %v1389_v32  ;;  %v1279_v22 = vadd.s32 536870912, %v1278_v52  ;;  %v4501_v11 = vshrl.u32 %v1389_v32, 5  ;;  %v1385_v21 = vor.u32 8388608, %v1384_v28 }
  0xe4   :  { %v837_v3 = vmul.f32 %v836_v62, %v834_v45  ;;  %v1689_v47 = vand.u32 2139095040, %v4497_v1  ;;  %v3437_v25 = vadd.s32 4294967294, %v1131_v54  ;;  %vm718_vm14 = vcmp.lt.s32.totalorder %v3979_v24, 0 }
  0xe5   :  { %v4492_v39 = vsub.s32 32, %v1391_v36  ;;  %v4494_v18 = vshrl.u32 %v1279_v22, 30  ;;  %v1403_v60 = vshll.u32 %v5855_v30, %v1391_v36  ;;  %v1394_v9 = vshll.u32 %v5858_v38, %v1391_v36 }
  0xe6   :  { %v1397_v56 = vshll.u32 %v5837_v29, %v1391_v36  ;;  %v1400_v51 = vshll.u32 %v5835_v31, %v1391_v36  ;;  %vm1412_vm11 = vcmp.lt.s32.totalorder %v4501_v11, 4  ;;  %v1406_v4 = vshll.u32 %v5856_v43, %v1391_v36 }
  0xe7   :  { %v1404_v5 = vshrl.u32 %v5856_v43, %v4492_v39  ;;  %v1395_v7 = vshrl.u32 %v5837_v29, %v4492_v39  ;;  %v1398_v16 = vshrl.u32 %v5835_v31, %v4492_v39  ;;  %v1281_v20 = vshll.u32 %v4494_v18, 30 }
  0xe8   :  { %v1401_v63 = vshrl.u32 %v5855_v30, %v4492_v39  ;;  %v1407_v27 = vshrl.u32 %v5857_v15, %v4492_v39  ;;  %vm1409_vm12 = vcmp.lt.s32.totalorder %v4501_v11, 1  ;;  %v1690_v41 = vshrl.u32 %v1689_v47, 23 }
  0xe9   :  { %v1405_v33 = vor.u32 %v1404_v5, %v1403_v60  ;;  %v4517_v44 = vor.u32 %v1395_v7, %v1394_v9  ;;  %v4519_v58 = vor.u32 %v1398_v16, %v1397_v56  ;;  %v838_v6 = vxor.u32 2147483648, %v837_v3 }
  0xea   :  { %vm3438_vm13 = vcmp.lt.s32.totalorder %v3437_v25, 0  ;;  %v4526_v34 = vsub.s32 %v1278_v52, %v1281_v20  ;;  %v1402_v26 = vor.u32 %v1401_v63, %v1400_v51  ;;  %vm1411_vm15 = vcmp.lt.s32.totalorder %v4501_v11, 3 }
  0xeb   :  { %v1418_v32 = vsel %vm1412_vm11, %v1405_v33, 920167782  ;;  %vm1410_vm0 = vcmp.lt.s32.totalorder %v4501_v11, 2  ;;  %v1417_v42 = vsel %vm1409_vm12, %v4517_v44, %v4519_v58  ;;  %v4537_v36 = vshll.u32 %v1385_v21, 8 }
  0xec   :  { %v4539_v57 = vsel %vm3438_vm13, 0, %v3437_v25  ;;  %v1408_v52 = vor.u32 %v1407_v27, %v1406_v4  ;;  %v3448_v17 = vadd.s32 4294967169, %v1690_v41  ;;  %v5859_v22 = vand.u32 2147483647, %v3979_v24 }
  0xed   :  { %v839_v49 = vsel %vm718_vm14, %v838_v6, %v837_v3  ;;  %v1284_v45 = vsub.s32 0, %v4526_v34  ;;  %v1419_v62 = vsel %vm1411_vm15, %v1402_v26, %v1418_v32  ;;  %v840_v54 = vsub.s32 4, %v4327_v46 }
  0xee   :  { %vm4543_vm1 = vcmp.le.f32.partialorder %v5859_v22, 0.7853982  ;;  %vm1283_vm3 = vcmp.lt.s32.totalorder %v4526_v34, 0  ;;  %v1420_v28 = vsel %vm1410_vm0, %v1417_v42, %v1419_v62  ;;  %v1139_v60 = vsub.s32 4294967266, %v4539_v57 }
  0xef   :  { %v1421_v5 = vsel %vm1409_vm12, %v4519_v58, %v1402_v26  ;;  %v1426_v9 = vand.u32 65535, %v4537_v36  ;;  %v4564_v7 = vsel %vm4543_vm1, %v3979_v24, %v839_v49  ;;  %v1422_v56 = vsel %vm1412_vm11, %v1408_v52, 1326507024 }
  0xf0   :  { %v1427_v16 = vshrl.u32 %v4537_v36, 16  ;;  %v1696_v3 = vadd.s32 1, %v3448_v17  ;;  %v1285_v47 = vsel %vm1283_vm3, %v1284_v45, %v4526_v34  ;;  %v1423_v25 = vsel %vm1411_vm15, %v1405_v33, %v1422_v56 }
  0xf1   :  { %v1450_v20 = vand.u32 65535, %v1420_v28  ;;  %v1451_v51 = vshrl.u32 %v1420_v28, 16  ;;  %v4575_v63 = vsel %vm718_vm14, %v840_v54, %v4327_v46  ;;  %v1119_v21 = vadd.s32 %v4424_v61, %v4419_v12 }
  0xf2   :  { %v1135_v4 = vsub.s32 32, %v4539_v57  ;;  %v1424_v27 = vsel %vm1410_vm0, %v1421_v5, %v1423_v25  ;;  %v1140_v41 = vadd.s32 127, %v1139_v60  ;;  %v4584_v33 = vmul.f32 %v4564_v7, %v4564_v7 }
  0xf3   :  { %v1428_v6 = vand.u32 65535, %v1424_v27  ;;  %v1429_v32 = vshrl.u32 %v1424_v27, 16  ;;  %v1453_v42 = vmul.u32 %v1451_v51, %v1426_v9  ;;  %v1136_v46 = vshll.u32 %v4481_v35, %v4539_v57 }
  0xf4   :  { %v1286_v52 = vclz %v1285_v47  ;;  %vm1697_vm5 = vcmp.gt.s32.totalorder %v1696_v3, 0  ;;  %v1454_v22 = vmul.u32 %v1450_v20, %v1427_v16  ;;  %v1137_v49 = vshrl.u32 %v1119_v21, %v1135_v4 }
  0xf5   :  { %v1430_v17 = vmul.u32 %v1428_v6, %v1426_v9  ;;  %v1431_v12 = vmul.u32 %v1429_v32, %v1426_v9  ;;  %v1432_v61 = vmul.u32 %v1428_v6, %v1427_v16  ;;  %v1393_v45 = vshrl.u32 %v5858_v38, %v4492_v39 }
  0xf6   :  { %v1452_v62 = vmul.u32 %v1450_v20, %v1426_v9  ;;  %v1456_v54 = vshll.u32 %v1453_v42, 16  ;;  %v1141_v28 = vshll.u32 %v1140_v41, 23  ;;  %v1433_v60 = vmul.u32 %v1429_v32, %v1427_v16 }
  0xf7   :  { %v1434_v5 = vshll.u32 %v1431_v12, 16  ;;  %v5833_v56 = vand.u32 2147483647, %v4497_v1  ;;  %v3440_v25 = vadd.s32 4294967294, %v1286_v52  ;;  %v1436_v27 = vshll.u32 %v1432_v61, 16 }
  0xf8   :  { %v1455_v35 = vmul.u32 %v1451_v51, %v1427_v16  ;;  %v1698_v57 = vsel %vm1697_vm5, %v1696_v3, 0  ;;  %v1414_v47 = vsel %vm1412_vm11, %v1402_v26, 2102212464  ;;  %v1458_v4 = vshll.u32 %v1454_v22, 16 }
  0xf9   :  { %vm1438_vm6 = vc.u32 %v1430_v17, %v1434_v5  ;;  %v1440_v21 = vadd.s32 %v1434_v5, %v1430_v17  ;;  %v1413_v39 = vsel %vm1409_vm12, %v1393_v45, %v4517_v44  ;;  %vm1460_vm7 = vc.u32 %v1452_v62, %v1456_v54 }
  0xfa   :  { %v1439_v9 = vsel %vm1438_vm6, 1, %v3652_v50  ;;  %v1462_v20 = vadd.s32 %v1456_v54, %v1452_v62  ;;  %v1435_v41 = vshrl.u32 %v1431_v12, 16  ;;  %v1461_v16 = vsel %vm1460_vm7, 1, %v3652_v50 }
  0xfb   :  { %v1441_v6 = vadd.s32 %v1439_v9, %v1433_v60  ;;  %vm1442_vm2 = vc.u32 %v1440_v21, %v1436_v27  ;;  %vm3441_vm8 = vcmp.lt.s32.totalorder %v3440_v25, 0  ;;  %v1415_v26 = vsel %vm1411_vm15, %v4519_v58, %v1414_v47 }
  0xfc   :  { %v1443_v3 = vsel %vm1442_vm2, 1, %v3652_v50  ;;  %v1463_v51 = vadd.s32 %v1461_v16, %v1455_v35  ;;  %v1437_v32 = vshrl.u32 %v1432_v61, 16  ;;  %v1457_v44 = vshrl.u32 %v1453_v42, 16 }
  0xfd   :  { %v1445_v52 = vadd.s32 %v1443_v3, %v1441_v6  ;;  %vm1464_vm4 = vc.u32 %v1462_v20, %v1458_v4  ;;  %v852_v17 = vmul.f32 -0.00019511016, %v4584_v33  ;;  %v1138_v45 = vor.u32 %v1137_v49, %v1136_v46 }
  0xfe   :  { %v1142_v12 = vor.u32 4788187, %v1141_v28  ;;  %v1465_v62 = vsel %vm1464_vm4, 1, %v3652_v50  ;;  %v1459_v60 = vshrl.u32 %v1454_v22, 16  ;;  %v1700_v27 = vand.u32 31, %v1698_v57 }
  0xff   :  { %v1446_v54 = vadd.s32 %v1445_v52, %v1435_v41  ;;  %v1467_v5 = vadd.s32 %v1465_v62, %v1463_v51  ;;  %v4606_v21 = vsel %vm3441_vm8, 0, %v3440_v25  ;;  %v1416_v58 = vsel %vm1410_vm0, %v1413_v39, %v1415_v26 }
 0x100   :  { %v4610_v61 = vadd.s32 %v1462_v20, %v1458_v4  ;;  %v1693_v46 = vand.u32 8388607, %v5833_v56  ;;  %v4616_v49 = vsub.s32 32, %v1700_v27  ;;  %v4621_v22 = vsel %vm4543_vm1, 0, %v4575_v63 }
 0x101   :  { %v4612_v42 = vadd.s32 %v1446_v54, %v1437_v32  ;;  %v1468_v35 = vadd.s32 %v1467_v5, %v1457_v44  ;;  %v845_v28 = vmul.f32 -0.001358992, %v4584_v33  ;;  %v1143_v25 = vand.u32 2147483647, %v1142_v12 }
 0x102   :  { %v1145_v11 = vcvt.s32.f32 %v1138_v45  ;;  %v853_v47 = vadd.f32 0.008332121, %v852_v17  ;;  %v1294_v4 = vsub.s32 4294967266, %v4606_v21  ;;  %v1470_v9 = vmul.u32 %v4537_v36, %v1416_v58 }
 0x103   :  { %v1469_v39 = vadd.s32 %v1468_v35, %v1459_v60  ;;  %vm1472_vm9 = vc.u32 %v4612_v42, %v4610_v61  ;;  %v1706_v20 = vshll.u32 %v5837_v29, %v1700_v27  ;;  %v1707_v53 = vshrl.u32 %v5835_v31, %v4616_v49 }
 0x104   :  { %v1709_v63 = vshll.u32 %v5835_v31, %v1700_v27  ;;  %vm1027_vm10 = vcmp.lt.s32.totalorder %v4100_v40, 0  ;;  %v1694_v6 = vor.u32 8388608, %v1693_v46  ;;  %v4633_v16 = vshrl.u32 %v1698_v57, 5 }
 0x105   :  { %v1473_v41 = vadd.s32 1, %v1469_v39  ;;  %v1710_v26 = vshrl.u32 %v5855_v30, %v4616_v49  ;;  %v1146_v36 = vmul.f32 %v1145_v11, %v1143_v25  ;;  %v1274_v3 = vadd.s32 %v4466_v13, %v4464_v37 }
 0x106   :  { %v1712_v51 = vshll.u32 %v5855_v30, %v1700_v27  ;;  %v1713_v32 = vshrl.u32 %v5856_v43, %v4616_v49  ;;  %v1290_v52 = vsub.s32 32, %v4606_v21  ;;  %v1295_v44 = vadd.s32 127, %v1294_v4 }
 0x107   :  { %v1474_v17 = vsel %vm1472_vm9, %v1473_v41, %v1469_v39  ;;  %v1715_v45 = vshll.u32 %v5856_v43, %v1700_v27  ;;  %v4644_v12 = vor.u32 %v1707_v53, %v1706_v20  ;;  %v4646_v62 = vor.u32 %v1710_v26, %v1709_v63 }
 0x108   :  { %v1475_v57 = vadd.s32 %v1474_v17, %v1470_v9  ;;  %v1716_v54 = vshrl.u32 %v5857_v15, %v4616_v49  ;;  %vm4652_vm11 = vcmp.le.f32.partialorder %v1025_v8, 0.7853982  ;;  %v1703_v13 = vshll.u32 %v5858_v38, %v1700_v27 }
 0x109   :  { %v1704_v60 = vshrl.u32 %v5837_v29, %v4616_v49  ;;  %vm1718_vm12 = vcmp.lt.s32.totalorder %v4633_v16, 1  ;;  %v4660_v5 = vshll.u32 %v1694_v6, 8  ;;  %v1714_v35 = vor.u32 %v1713_v32, %v1712_v51 }
 0x10a   :  { %v1476_v58 = vadd.s32 536870912, %v1475_v57  ;;  %v1717_v46 = vor.u32 %v1716_v54, %v1715_v45  ;;  %vm1721_vm13 = vcmp.lt.s32.totalorder %v4633_v16, 4  ;;  %v846_v25 = vadd.f32 0.041655596, %v845_v28 }
 0x10b   :  { %v854_v8 = vmul.f32 %v853_v47, %v4584_v33  ;;  %v1147_v11 = vxor.u32 2147483648, %v1146_v36  ;;  %vm1720_vm14 = vcmp.lt.s32.totalorder %v4633_v16, 3  ;;  %v1291_v27 = vshll.u32 %v4526_v34, %v4606_v21 }
 0x10c   :  { %v4667_v4 = vshrl.u32 %v1476_v58, 30  ;;  %vm1719_vm15 = vcmp.lt.s32.totalorder %v4633_v16, 2  ;;  %v1730_v39 = vsel %vm1718_vm12, %v4644_v12, %v4646_v62  ;;  %v1292_v9 = vshrl.u32 %v1274_v3, %v1290_v52 }
 0x10d   :  { %v1296_v20 = vshll.u32 %v1295_v44, 23  ;;  %v4674_v28 = vor.u32 %v1704_v60, %v1703_v13  ;;  %v1731_v47 = vsel %vm1721_vm13, %v1717_v46, 1326507024  ;;  %v1727_v34 = vsel %vm1721_vm13, %v1714_v35, 920167782 }
 0x10e   :  { %v1478_v53 = vshll.u32 %v4667_v4, 30  ;;  %v1732_v21 = vsel %vm1720_vm14, %v1714_v35, %v1731_v47  ;;  %v1735_v63 = vand.u32 65535, %v4660_v5  ;;  %v847_v41 = vmul.f32 %v846_v25, %v4584_v33 }
 0x10f   :  { %v855_v6 = vadd.f32 -0.16666654, %v854_v8  ;;  %v1733_v26 = vsel %vm1719_vm15, %v1730_v39, %v1732_v21  ;;  %v4688_v3 = vshrl.u32 %v4660_v5, 16  ;;  %v1148_v51 = vsel %vm1027_vm10, %v1147_v11, %v1146_v36 }
 0x110   :  { %v4692_v32 = vsub.s32 %v1475_v57, %v1478_v53  ;;  %v1737_v52 = vand.u32 65535, %v1733_v26  ;;  %v1738_v44 = vshrl.u32 %v1733_v26, 16  ;;  %v1293_v17 = vor.u32 %v1292_v9, %v1291_v27 }
 0x111   :  { %v1297_v45 = vor.u32 4788187, %v1296_v20  ;;  %v1726_v54 = vsel %vm1718_vm12, %v4674_v28, %v4644_v12  ;;  %v1728_v13 = vsel %vm1720_vm14, %v4646_v62, %v1727_v34  ;;  %v848_v58 = vadd.f32 -0.4999988, %v847_v41 }
 0x112   :  { %vm1480_vm0 = vcmp.lt.s32.totalorder %v4692_v32, 0  ;;  %v1481_v60 = vsub.s32 0, %v4692_v32  ;;  %v1739_v36 = vmul.u32 %v1737_v52, %v1735_v63  ;;  %v4703_v57 = vmul.u32 %v1738_v44, %v1735_v63 }
 0x113   :  { %v856_v35 = vmul.f32 %v855_v6, %v4584_v33  ;;  %v4707_v46 = vmul.u32 %v1737_v52, %v4688_v3  ;;  %v4712_v25 = vsel %vm4652_vm11, %v4100_v40, %v1148_v51  ;;  %v1729_v11 = vsel %vm1719_vm15, %v1726_v54, %v1728_v13 }
 0x114   :  { %v1482_v8 = vsel %vm1480_vm0, %v1481_v60, %v4692_v32  ;;  %v1743_v27 = vshll.u32 %v4703_v57, 16  ;;  %v1014_v39 = vadd.s32 3, %v4621_v22  ;;  %v1298_v9 = vand.u32 2147483647, %v1297_v45 }
 0x115   :  { %v1300_v20 = vcvt.s32.f32 %v1293_v17  ;;  %v1483_v47 = vclz %v1482_v8  ;;  %v4721_v53 = vmul.f32 %v4712_v25, %v4712_v25  ;;  %v1742_v34 = vmul.u32 %v1738_v44, %v4688_v3 }
 0x116   :  { %vm1747_vm1 = vc.u32 %v1739_v36, %v1743_v27  ;;  %v1745_v21 = vshll.u32 %v4707_v46, 16  ;;  %v1760_v41 = vshrl.u32 %v1729_v11, 16  ;;  %v849_v6 = vmul.f32 %v848_v58, %v4584_v33 }
 0x117   :  { %v857_v26 = vadd.f32 1.0, %v856_v35  ;;  %v1748_v51 = vsel %vm1747_vm1, 1, %v3652_v50  ;;  %v1749_v52 = vadd.s32 %v1743_v27, %v1739_v36  ;;  %v1154_v45 = vmul.f32 -0.001358992, %v4721_v53 }
 0x118   :  { %v1759_v17 = vand.u32 65535, %v1729_v11  ;;  %v4729_v54 = vand.u32 3, %v4621_v22  ;;  %v4731_v13 = vand.u32 3, %v1014_v39  ;;  %v1301_v60 = vmul.f32 %v1300_v20, %v1298_v9 }
 0x119   :  { %v3443_v8 = vadd.s32 4294967294, %v1483_v47  ;;  %v1149_v44 = vsub.s32 4, %v4456_v2  ;;  %v1750_v56 = vadd.s32 %v1748_v51, %v1742_v34  ;;  %vm1751_vm3 = vc.u32 %v1749_v52, %v1745_v21 }
 0x11a   :  { %v1762_v0 = vmul.u32 %v1760_v41, %v1735_v63  ;;  %v4734_v33 = vadd.f32 1.0, %v849_v6  ;;  %v4737_v58 = vmul.f32 %v857_v26, %v4564_v7  ;;  %v1161_v36 = vmul.f32 -0.00019511016, %v4721_v53 }
 0x11b   :  { %v1155_v35 = vadd.f32 0.041655596, %v1154_v45  ;;  %vm4742_vm5 = vcmp.le.f32.partialorder %v1180_v48, 0.7853982  ;;  %vm1182_vm6 = vcmp.lt.s32.totalorder %v4162_v19, 0  ;;  %v1763_v11 = vmul.u32 %v1759_v17, %v4688_v3 }
 0x11c   :  { %vm862_vm7 = vcmp.eq.s32.totalorder %v4729_v54, 0  ;;  %vm865_vm2 = vcmp.eq.s32.totalorder %v4729_v54, 2  ;;  %vm1020_vm8 = vcmp.eq.s32.totalorder %v4731_v13, 2  ;;  %v1302_v7 = vxor.u32 2147483648, %v1301_v60 }
 0x11d   :  { %vm3444_vm4 = vcmp.lt.s32.totalorder %v3443_v8, 0  ;;  %v1752_v27 = vsel %vm1751_vm3, 1, %v3652_v50  ;;  %v1761_v39 = vmul.u32 %v1759_v17, %v1735_v63  ;;  %vm1017_vm9 = vcmp.eq.s32.totalorder %v4731_v13, 0 }
 0x11e   :  { %v4756_v48 = vsel %vm1027_vm10, %v1149_v44, %v4456_v2  ;;  %v1744_v9 = vshrl.u32 %v4703_v57, 16  ;;  %v1754_v20 = vadd.s32 %v1752_v27, %v1750_v56  ;;  %v1765_v47 = vshll.u32 %v1762_v0, 16 }
 0x11f   :  { %v863_v34 = vxor.u32 2147483648, %v4737_v58  ;;  %v866_v21 = vxor.u32 2147483648, %v4734_v33  ;;  %v1162_v6 = vadd.f32 0.008332121, %v1161_v36  ;;  %v1764_v26 = vmul.u32 %v1760_v41, %v4688_v3 }
 0x120   :  { %v1156_v63 = vmul.f32 %v1155_v35, %v4721_v53  ;;  %v4763_v51 = vsel %vm3444_vm4, 0, %v3443_v8  ;;  %v1702_v52 = vshrl.u32 %v5858_v38, %v4616_v49  ;;  %v1767_v2 = vshll.u32 %v1763_v11, 16 }
 0x121   :  { %vm861_vm10 = vcmp.lt.s32.totalorder %v4729_v54, 2  ;;  %vm1016_vm0 = vcmp.lt.s32.totalorder %v4731_v13, 2  ;;  %v1303_v56 = vsel %vm1182_vm6, %v1302_v7, %v1301_v60  ;;  %v1723_v57 = vsel %vm1721_vm13, %v4646_v62, 2102212464 }
 0x122   :  { %vm1769_vm1 = vc.u32 %v1761_v39, %v1765_v47  ;;  %v1771_v3 = vadd.s32 %v1765_v47, %v1761_v39  ;;  %v1746_v41 = vshrl.u32 %v4707_v46, 16  ;;  %v1755_v45 = vadd.s32 %v1754_v20, %v1744_v9 }
 0x123   :  { %v1770_v17 = vsel %vm1769_vm1, 1, %v3652_v50  ;;  %v4778_v49 = vadd.f32 %v4454_v14, %v4497_v1  ;;  %v1491_v8 = vsub.s32 4294967266, %v4763_v51  ;;  %v1766_v44 = vshrl.u32 %v1762_v0, 16 }
 0x124   :  { %v1772_v36 = vadd.s32 %v1770_v17, %v1764_v26  ;;  %vm1773_vm3 = vc.u32 %v1771_v3, %v1767_v2  ;;  %v1722_v62 = vsel %vm1718_vm12, %v1702_v52, %v4674_v28  ;;  %v1724_v46 = vsel %vm1720_vm14, %v4644_v12, %v1723_v57 }
 0x125   :  { %v1774_v60 = vsel %vm1773_vm3, 1, %v3652_v50  ;;  %v1844_v35 = vand.u32 2139095040, %v4778_v49  ;;  %v1163_v7 = vmul.f32 %v1162_v6, %v4721_v53  ;;  %v4793_v0 = vsel %vm4742_vm5, %v4162_v19, %v1303_v56 }
 0x126   :  { %v1768_v27 = vshrl.u32 %v1763_v11, 16  ;;  %v1776_v39 = vadd.s32 %v1774_v60, %v1772_v36  ;;  %vm859_vm13 = vweird.f32 %v3979_v24  ;;  %v1471_v28 = vadd.s32 %v4610_v61, %v4612_v42 }
 0x127   :  { %v4798_v9 = vadd.s32 %v1755_v45, %v1746_v41  ;;  %v4800_v12 = vadd.s32 %v1771_v3, %v1767_v2  ;;  %v1845_v20 = vshrl.u32 %v1844_v35, 23  ;;  %v1487_v47 = vsub.s32 32, %v4763_v51 }
 0x128   :  { %v1492_v6 = vadd.s32 127, %v1491_v8  ;;  %v1725_v26 = vsel %vm1719_vm15, %v1722_v62, %v1724_v46  ;;  %v1777_v52 = vadd.s32 %v1776_v39, %v1766_v44  ;;  %v864_v11 = vsel %vm862_vm7, %v4734_v33, %v863_v34 }
 0x129   :  { %v867_v61 = vsel %vm865_vm2, %v866_v21, %v4737_v58  ;;  %v1022_v42 = vsel %vm1020_vm8, %v866_v21, %v4737_v58  ;;  %v3451_v2 = vadd.s32 4294967169, %v1845_v20  ;;  %v1019_v56 = vsel %vm1017_vm9, %v4734_v33, %v863_v34 }
 0x12a   :  { %v1157_v16 = vadd.f32 -0.4999988, %v1156_v63  ;;  %v1164_v57 = vadd.f32 -0.16666654, %v1163_v7  ;;  %v1778_v3 = vadd.s32 %v1777_v52, %v1768_v27  ;;  %v4819_v41 = vmul.f32 %v4793_v0, %v4793_v0 }
 0x12b   :  { %v1779_v45 = vmul.u32 %v4660_v5, %v1725_v26  ;;  %vm1781_vm12 = vc.u32 %v4798_v9, %v4800_v12  ;;  %v1851_v17 = vadd.s32 1, %v3451_v2  ;;  %v1488_v58 = vshll.u32 %v4692_v32, %v4763_v51 }
 0x12c   :  { %v1489_v21 = vshrl.u32 %v1471_v28, %v1487_v47  ;;  %v1493_v8 = vshll.u32 %v1492_v6, 23  ;;  %v1782_v44 = vadd.s32 1, %v1778_v3  ;;  %v868_v33 = vsel %vm861_vm10, %v864_v11, %v867_v61 }
 0x12d   :  { %v1023_v34 = vsel %vm1016_vm0, %v1019_v56, %v1022_v42  ;;  %v1152_v5 = vsel %vm4652_vm11, 0, %v4756_v48  ;;  %vm1852_vm14 = vcmp.gt.s32.totalorder %v1851_v17, 0  ;;  %v1158_v63 = vmul.f32 %v1157_v16, %v4721_v53 }
 0x12e   :  { %v1165_v36 = vmul.f32 %v1164_v57, %v4721_v53  ;;  %v1783_v62 = vsel %vm1781_vm12, %v1782_v44, %v1778_v3  ;;  %v1853_v32 = vsel %vm1852_vm14, %v1851_v17, 0  ;;  %v1309_v51 = vmul.f32 -0.001358992, %v4819_v41 }
 0x12f   :  { %v1316_v46 = vmul.f32 -0.00019511016, %v4819_v41  ;;  %v1784_v54 = vadd.s32 %v1783_v62, %v1779_v45  ;;  %v1855_v60 = vand.u32 31, %v1853_v32  ;;  %v1490_v35 = vor.u32 %v1489_v21, %v1488_v58 }
 0x130   :  { %v1494_v13 = vor.u32 4788187, %v1493_v8  ;;  %v5839_v7 = vand.u32 2147483647, %v4778_v49  ;;  %v4838_v27 = vand.u32 3, %v1152_v5  ;;  %v4844_v53 = vsel %vm859_vm13, nan, %v868_v33 }
 0x131   :  { %v1785_v37 = vadd.s32 536870912, %v1784_v54  ;;  %v4840_v48 = vsub.s32 32, %v1855_v60  ;;  %v4848_v39 = vsel %vm859_vm13, nan, %v1023_v34  ;;  %v4850_v28 = vadd.f32 1.0, %v1158_v63 }
 0x132   :  { %v1166_v20 = vadd.f32 1.0, %v1165_v36  ;;  %v1304_v47 = vsub.s32 4, %v4494_v18  ;;  %v1310_v6 = vadd.f32 0.041655596, %v1309_v51  ;;  %v1317_v26 = vadd.f32 0.008332121, %v1316_v46 }
 0x133   :  { %v4853_v52 = vshrl.u32 %v1785_v37, 30  ;;  %v1495_v11 = vand.u32 2147483647, %v1494_v13  ;;  %v1497_v61 = vcvt.s32.f32 %v1490_v35  ;;  %v1848_v42 = vand.u32 8388607, %v5839_v7 }
 0x134   :  { %v4857_v2 = vshrl.u32 %v1853_v32, 5  ;;  %v1858_v56 = vshll.u32 %v5858_v38, %v1855_v60  ;;  %v1867_v16 = vshll.u32 %v5855_v30, %v1855_v60  ;;  %v1868_v57 = vshrl.u32 %v5856_v43, %v4840_v48 }
 0x135   :  { %v1787_v24 = vshll.u32 %v4853_v52, 30  ;;  %v1861_v3 = vshll.u32 %v5837_v29, %v1855_v60  ;;  %v1862_v45 = vshrl.u32 %v5835_v31, %v4840_v48  ;;  %v1864_v17 = vshll.u32 %v5835_v31, %v1855_v60 }
 0x136   :  { %v1865_v58 = vshrl.u32 %v5855_v30, %v4840_v48  ;;  %v1859_v8 = vshrl.u32 %v5837_v29, %v4840_v48  ;;  %v1870_v44 = vshll.u32 %v5856_v43, %v1855_v60  ;;  %v1871_v33 = vshrl.u32 %v5857_v15, %v4840_v48 }
 0x137   :  { %v4870_v21 = vsub.s32 %v1784_v54, %v1787_v24  ;;  %v4878_v34 = vmul.f32 %v1166_v20, %v4712_v25  ;;  %v1318_v5 = vmul.f32 %v1317_v26, %v4819_v41  ;;  %v1498_v63 = vmul.f32 %v1497_v61, %v1495_v11 }
 0x138   :  { %v1849_v36 = vor.u32 8388608, %v1848_v42  ;;  %v1869_v32 = vor.u32 %v1868_v57, %v1867_v16  ;;  %v1872_v51 = vor.u32 %v1871_v33, %v1870_v44  ;;  %v1335_v46 = vmul.f32 0.5, %v4844_v53 }
 0x139   :  { %vm1789_vm11 = vcmp.lt.s32.totalorder %v4870_v21, 0  ;;  %v1790_v62 = vsub.s32 0, %v4870_v21  ;;  %v4884_v54 = vor.u32 %v1862_v45, %v1861_v3  ;;  %v1866_v60 = vor.u32 %v1865_v58, %v1864_v17 }
 0x13a   :  { %vm1876_vm15 = vcmp.lt.s32.totalorder %v4857_v2, 4  ;;  %v1311_v25 = vmul.f32 %v1310_v6, %v4819_v41  ;;  %v4889_v13 = vor.u32 %v1859_v8, %v1858_v56  ;;  %vm1873_vm7 = vcmp.lt.s32.totalorder %v4857_v2, 1 }
 0x13b   :  { %v1791_v35 = vsel %vm1789_vm11, %v1790_v62, %v4870_v21  ;;  %v1319_v37 = vadd.f32 -0.16666654, %v1318_v5  ;;  %v1499_v20 = vxor.u32 2147483648, %v1498_v63  ;;  %vm1875_vm2 = vcmp.lt.s32.totalorder %v4857_v2, 3 }
 0x13c   :  { %v1792_v26 = vclz %v1791_v35  ;;  %vm1379_vm8 = vcmp.lt.s32.totalorder %v4454_v14, 0  ;;  %v1882_v11 = vsel %vm1876_vm15, %v1869_v32, 920167782  ;;  %v1886_v61 = vsel %vm1876_vm15, %v1872_v51, 1326507024 }
 0x13d   :  { %v4898_v6 = vshll.u32 %v1849_v36, 8  ;;  %v5866_v42 = vand.u32 2147483647, %v4454_v14  ;;  %vm1874_vm9 = vcmp.lt.s32.totalorder %v4857_v2, 2  ;;  %v1885_v16 = vsel %vm1873_vm7, %v4884_v54, %v1866_v60 }
 0x13e   :  { %v3449_v56 = vadd.s32 4294967294, %v1792_v26  ;;  %v1312_v57 = vadd.f32 -0.4999988, %v1311_v25  ;;  %v1881_v3 = vsel %vm1873_vm7, %v4889_v13, %v4884_v54  ;;  %v1883_v45 = vsel %vm1875_vm2, %v1866_v60, %v1882_v11 }
 0x13f   :  { %vm4902_vm4 = vcmp.le.f32.partialorder %v5866_v42, 0.7853982  ;;  %v1887_v17 = vsel %vm1875_vm2, %v1869_v32, %v1886_v61  ;;  %v1500_v58 = vsel %vm1379_vm8, %v1499_v20, %v1498_v63  ;;  %v1780_v8 = vadd.s32 %v4800_v12, %v4798_v9 }
 0x140   :  { %vm3450_vm10 = vcmp.lt.s32.totalorder %v3449_v56, 0  ;;  %v1891_v44 = vshrl.u32 %v4898_v6, 16  ;;  %v1320_v33 = vmul.f32 %v1319_v37, %v4819_v41  ;;  %v1888_v36 = vsel %vm1874_vm9, %v1885_v16, %v1887_v17 }
 0x141   :  { %v1795_v5 = vsel %vm3450_vm10, 0, %v3449_v56  ;;  %v1890_v62 = vand.u32 65535, %v4898_v6  ;;  %v1884_v32 = vsel %vm1874_vm9, %v1881_v3, %v1883_v45  ;;  %v1892_v63 = vand.u32 65535, %v1888_v36 }
 0x142   :  { %v1796_v51 = vsub.s32 32, %v1795_v5  ;;  %v1800_v25 = vsub.s32 4294967266, %v1795_v5  ;;  %v4934_v9 = vsel %vm1182_vm6, %v1304_v47, %v4494_v18  ;;  %v4937_v12 = vadd.f32 3.5, %v4844_v53 }
 0x143   :  { %v4942_v35 = vsel %vm4902_vm4, %v4454_v14, %v1500_v58  ;;  %v1893_v37 = vshrl.u32 %v1888_v36, 16  ;;  %v1797_v20 = vshll.u32 %v4870_v21, %v1795_v5  ;;  %v1896_v61 = vmul.u32 %v1892_v63, %v1891_v44 }
 0x144   :  { %v1798_v26 = vshrl.u32 %v1780_v8, %v1796_v51  ;;  %v1801_v11 = vadd.s32 127, %v1800_v25  ;;  %v1894_v42 = vmul.u32 %v1892_v63, %v1890_v62  ;;  %v1914_v16 = vand.u32 65535, %v1884_v32 }
 0x145   :  { %v1895_v56 = vmul.u32 %v1893_v37, %v1890_v62  ;;  %v1915_v3 = vshrl.u32 %v1884_v32, 16  ;;  %v1313_v18 = vmul.f32 %v1312_v57, %v4819_v41  ;;  %v1321_v47 = vadd.f32 1.0, %v1320_v33 }
 0x146   :  { %v4946_v53 = vadd.f32 1.25, %v1335_v46  ;;  %v4950_v45 = vmul.f32 %v4942_v35, %v4942_v35  ;;  %v1802_v17 = vshll.u32 %v1801_v11, 23  ;;  %v1897_v58 = vmul.u32 %v1893_v37, %v1891_v44 }
 0x147   :  { %v1898_v36 = vshll.u32 %v1895_v56, 16  ;;  %v1900_v21 = vshll.u32 %v1896_v61, 16  ;;  %v1857_v8 = vshrl.u32 %v5858_v38, %v4840_v48  ;;  %v1878_v5 = vsel %vm1876_vm15, %v1866_v60, 2102212464 }
 0x148   :  { %v1916_v51 = vmul.u32 %v1914_v16, %v1890_v62  ;;  %v1917_v25 = vmul.u32 %v1915_v3, %v1890_v62  ;;  %v1799_v41 = vor.u32 %v1798_v26, %v1797_v20  ;;  %v1918_v57 = vmul.u32 %v1914_v16, %v1891_v44 }
 0x149   :  { %vm1902_vm6 = vc.u32 %v1894_v42, %v1898_v36  ;;  %v1904_v46 = vadd.s32 %v1898_v36, %v1894_v42  ;;  %v1899_v33 = vshrl.u32 %v1895_v56, 16  ;;  %v1919_v63 = vmul.u32 %v1915_v3, %v1891_v44 }
 0x14a   :  { %v1903_v32 = vsel %vm1902_vm6, 1, %v3652_v50  ;;  %v1920_v11 = vshll.u32 %v1917_v25, 16  ;;  %v1803_v37 = vor.u32 4788187, %v1802_v17  ;;  %v1922_v29 = vshll.u32 %v1918_v57, 16 }
 0x14b   :  { %v1905_v31 = vadd.s32 %v1903_v32, %v1897_v58  ;;  %vm1906_vm0 = vc.u32 %v1904_v46, %v1900_v21  ;;  %v1513_v48 = vmul.f32 -0.00019511016, %v4950_v45  ;;  %vm1171_vm3 = vcmp.eq.s32.totalorder %v4838_v27, 0 }
 0x14c   :  { %v1907_v7 = vsel %vm1906_vm0, 1, %v3652_v50  ;;  %vm1924_vm1 = vc.u32 %v1916_v51, %v1920_v11  ;;  %v1926_v60 = vadd.s32 %v1920_v11, %v1916_v51  ;;  %vm1174_vm13 = vcmp.eq.s32.totalorder %v4838_v27, 2 }
 0x14d   :  { %v1877_v62 = vsel %vm1873_vm7, %v1857_v8, %v4889_v13  ;;  %v1901_v44 = vshrl.u32 %v1896_v61, 16  ;;  %v1909_v20 = vadd.s32 %v1907_v7, %v1905_v31  ;;  %v1925_v26 = vsel %vm1924_vm1, 1, %v3652_v50 }
 0x14e   :  { %v1879_v42 = vsel %vm1875_vm2, %v4884_v54, %v1878_v5  ;;  %v1921_v56 = vshrl.u32 %v1917_v25, 16  ;;  %v1927_v16 = vadd.s32 %v1925_v26, %v1919_v63  ;;  %vm1928_vm12 = vc.u32 %v1926_v60, %v1922_v29 }
 0x14f   :  { %v1804_v3 = vand.u32 2147483647, %v1803_v37  ;;  %v1806_v17 = vcvt.s32.f32 %v1799_v41  ;;  %v1910_v58 = vadd.s32 %v1909_v20, %v1899_v33  ;;  %v1929_v36 = vsel %vm1928_vm12, 1, %v3652_v50 }
 0x150   :  { %v1307_v13 = vsel %vm4742_vm5, 0, %v4934_v9  ;;  %v1337_v31 = vmul.f32 0.5, %v4848_v39  ;;  %v1923_v7 = vshrl.u32 %v1918_v57, 16  ;;  %v1931_v61 = vadd.s32 %v1929_v36, %v1927_v16 }
 0x151   :  { %vm1170_vm14 = vcmp.lt.s32.totalorder %v4838_v27, 2  ;;  %v1506_v54 = vmul.f32 -0.001358992, %v4950_v45  ;;  %v1514_v21 = vadd.f32 0.008332121, %v1513_v48  ;;  %v4975_v8 = vadd.s32 %v1910_v58, %v1901_v44 }
 0x152   :  { %v4977_v5 = vadd.s32 %v1926_v60, %v1922_v29  ;;  %v1314_v51 = vadd.f32 1.0, %v1313_v18  ;;  %v1322_v25 = vmul.f32 %v1321_v47, %v4793_v0  ;;  %v1880_v22 = vsel %vm1874_vm9, %v1877_v62, %v1879_v42 }
 0x153   :  { %v1932_v9 = vadd.s32 %v1931_v61, %v1921_v56  ;;  %v1324_v41 = vand.u32 3, %v1307_v13  ;;  %v1354_v39 = vmul.f32 1.25, %v4937_v12  ;;  %v1355_v46 = vmul.f32 %v4946_v53, %v4946_v53 }
 0x154   :  { %v1807_v57 = vmul.f32 %v1806_v17, %v1804_v3  ;;  %v1172_v33 = vxor.u32 2147483648, %v4878_v34  ;;  %v1175_v32 = vxor.u32 2147483648, %v4850_v28  ;;  %v1338_v29 = vsub.f32 0.0, %v1337_v31 }
 0x155   :  { %v1933_v63 = vadd.s32 %v1932_v9, %v1923_v7  ;;  %v1507_v18 = vadd.f32 0.041655596, %v1506_v54  ;;  %v1515_v0 = vmul.f32 %v1514_v21, %v4950_v45  ;;  %v1934_v2 = vmul.u32 %v4898_v6, %v1880_v22 }
 0x156   :  { %vm1936_vm5 = vc.u32 %v4975_v8, %v4977_v5  ;;  %v1327_v47 = vxor.u32 2147483648, %v1322_v25  ;;  %v1330_v11 = vxor.u32 2147483648, %v1314_v51  ;;  %v1341_v37 = vmul.f32 2.0, %v1337_v31 }
 0x157   :  { %v1937_v48 = vadd.s32 1, %v1933_v63  ;;  %vm1326_vm11 = vcmp.eq.s32.totalorder %v1324_v41, 0  ;;  %vm1329_vm15 = vcmp.eq.s32.totalorder %v1324_v41, 2  ;;  %v1356_v60 = vsub.f32 %v1354_v39, %v1355_v46 }
 0x158   :  { %v1808_v62 = vxor.u32 2147483648, %v1807_v57  ;;  %v1173_v44 = vsel %vm1171_vm3, %v4850_v28, %v1172_v33  ;;  %v1176_v20 = vsel %vm1174_vm13, %v1175_v32, %v4878_v34  ;;  %vm1688_vm7 = vcmp.lt.s32.totalorder %v4497_v1, 0 }
 0x159   :  { %v1938_v6 = vsel %vm1936_vm5, %v1937_v48, %v1933_v63  ;;  %vm1325_vm2 = vcmp.lt.s32.totalorder %v1324_v41, 2  ;;  %v1508_v26 = vmul.f32 %v1507_v18, %v4950_v45  ;;  %v1516_v42 = vadd.f32 -0.16666654, %v1515_v0 }
 0x15a   :  { %v1939_v56 = vadd.s32 %v1938_v6, %v1934_v2  ;;  %v1328_v16 = vsel %vm1326_vm11, %v1314_v51, %v1327_v47  ;;  %v1331_v3 = vsel %vm1329_vm15, %v1330_v11, %v1322_v25  ;;  %v1339_v17 = vmul.f32 %v1338_v29, %v4440_v55 }
 0x15b   :  { %v1342_v58 = vmul.f32 %v1341_v37, %v4440_v55  ;;  %3498 = vrcp.f32 %v1356_v60  ;;  %v5869_v28 = vand.u32 2147483647, %v4497_v1  ;;  %v1809_v34 = vsel %vm1688_vm7, %v1808_v62, %v1807_v57 }
 0x15c   :  { %v1940_v13 = vadd.s32 536870912, %v1939_v56  ;;  %vm1168_vm10 = vweird.f32 %v4100_v40  ;;  %v1177_v7 = vsel %vm1170_vm14, %v1173_v44, %v1176_v20  ;;  %vm1323_vm6 = vweird.f32 %v4162_v19 }
 0x15d   :  { %vm5003_vm9 = vcmp.le.f32.partialorder %v5869_v28, 0.7853982  ;;  %v1501_v61 = vsub.s32 4, %v4667_v4  ;;  %v1332_v54 = vsel %vm1325_vm2, %v1328_v16, %v1331_v3  ;;  %v1509_v21 = vadd.f32 -0.4999988, %v1508_v26 }
 0x15e   :  { %v1517_v51 = vmul.f32 %v1516_v42, %v4950_v45  ;;  %v5016_v25 = vshrl.u32 %v1940_v13, 30  ;;  %v1340_v22 = vmul.f32 %v1339_v17, %v4440_v55  ;;  %v1343_v9 = vmul.f32 %v1342_v58, %v4485_v23  ;;  %v5040_v42 = vld [vmem:[#allocation5] sm:$0xff] }
 0x15f   :  { %v1345_v40 = vmul.f32 %v1337_v31, %v4485_v23  ;;  %v5024_v27 = vsel %vm5003_vm9, %v4497_v1, %v1809_v34  ;;  %v1178_v19 = vsel %vm1168_vm10, nan, %v1177_v7  ;;  %v1333_v39 = vsel %vm1323_vm6, nan, %v1332_v54 }
 0x160   :  { %v1942_v41 = vshll.u32 %v5016_v25, 30  ;;  %v1502_v46 = vsel %vm1379_vm8, %v1501_v61, %v4667_v4  ;;  %v1510_v33 = vmul.f32 %v1509_v21, %v4950_v45  ;;  %v1518_v32 = vadd.f32 1.0, %v1517_v51 }
 0x161   :  { %v3499_v57 = vpop.eup %3498  ;;  %v5033_v31 = vmul.f32 %v5024_v27, %v5024_v27  ;;  %v1344_v63 = vsub.f32 %v1340_v22, %v1343_v9  ;;  %v1346_v18 = vmul.f32 %v1345_v40, %v4485_v23  ;;  %v1348_v0 = vmul.f32 14.7, %v1178_v19 }
 0x162   :  { %v1943_v29 = vsub.s32 %v1939_v56, %v1942_v41  ;;  %v1347_v2 = vmul.f32 4.9, %v1333_v39  ;;  %v1504_v47 = vsel %vm4902_vm4, 0, %v1502_v46  ;;  %v1358_v4 = vmul.f32 %v3499_v57, %v1356_v60 }
 0x163   :  { %v1511_v37 = vadd.f32 1.0, %v1510_v33  ;;  %v1519_v45 = vmul.f32 %v1518_v32, %v4942_v35  ;;  %v1822_v48 = vmul.f32 -0.00019511016, %v5033_v31  ;;  %v1521_v44 = vand.u32 3, %v1504_v47 }
 0x164   :  { %vm1944_vm0 = vcmp.lt.s32.totalorder %v1943_v29, 0  ;;  %v1945_v11 = vsub.s32 0, %v1943_v29  ;;  %v1349_v6 = vadd.f32 %v1348_v0, %v1347_v2  ;;  %v1350_v26 = vsub.f32 0.0, %v1344_v63 }
 0x165   :  { %v1352_v56 = vsub.f32 %v5040_v42, %v1346_v18  ;;  %v1359_v16 = vsub.f32 2.0, %v1358_v4  ;;  %v1815_v24 = vmul.f32 -0.001358992, %v5033_v31  ;;  %v1524_v17 = vxor.u32 2147483648, %v1519_v45 }
 0x166   :  { %v1946_v62 = vsel %vm1944_vm0, %v1945_v11, %v1943_v29  ;;  %v1527_v60 = vxor.u32 2147483648, %v1511_v37  ;;  %v1675_v58 = vadd.s32 3, %v1504_v47  ;;  %v1823_v28 = vadd.f32 0.008332121, %v1822_v48 }
 0x167   :  { %v1947_v20 = vclz %v1946_v62  ;;  %vm1523_vm8 = vcmp.eq.s32.totalorder %v1521_v44, 0  ;;  %vm1526_vm4 = vcmp.eq.s32.totalorder %v1521_v44, 2  ;;  %v1935_v35 = vadd.s32 %v4977_v5, %v4975_v8 }
 0x168   :  { %v1351_v34 = vsub.f32 %v1350_v26, %v1349_v6  ;;  %v1353_v13 = vsub.f32 %v1352_v56, %v1347_v2  ;;  %vm1522_vm3 = vcmp.lt.s32.totalorder %v1521_v44, 2  ;;  %v1816_v61 = vadd.f32 0.041655596, %v1815_v24 }
 0x169   :  { %v3452_v3 = vadd.s32 4294967294, %v1947_v20  ;;  %v1525_v22 = vsel %vm1523_vm8, %v1511_v37, %v1524_v17  ;;  %v1528_v9 = vsel %vm1526_vm4, %v1527_v60, %v1519_v45  ;;  %v1676_v40 = vand.u32 3, %v1675_v58 }
 0x16a   :  { %v1824_v19 = vmul.f32 %v1823_v28, %v5033_v31  ;;  %v1365_v46 = vmul.f32 %v1353_v13, %v4937_v12  ;;  %v1366_v8 = vmul.f32 %v1351_v34, %v4946_v53  ;;  %vm1520_vm13 = vweird.f32 %v4454_v14 }
 0x16b   :  { %vm3453_vm1 = vcmp.lt.s32.totalorder %v3452_v3, 0  ;;  %v1529_v5 = vsel %vm1522_vm3, %v1525_v22, %v1528_v9  ;;  %v1817_v33 = vmul.f32 %v1816_v61, %v5033_v31  ;;  %vm1678_vm12 = vcmp.eq.s32.totalorder %v1676_v40, 0 }
 0x16c   :  { %v1950_v7 = vsel %vm3453_vm1, 0, %v3452_v3  ;;  %vm1681_vm14 = vcmp.eq.s32.totalorder %v1676_v40, 2  ;;  %v1825_v18 = vadd.f32 -0.16666654, %v1824_v19  ;;  %v1362_v0 = vmul.f32 %v1353_v13, %v4946_v53 }
 0x16d   :  { %v1951_v54 = vsub.s32 32, %v1950_v7  ;;  %v1952_v21 = vshll.u32 %v1943_v29, %v1950_v7  ;;  %v1955_v51 = vsub.s32 4294967266, %v1950_v7  ;;  %v1360_v29 = vmul.f32 %v3499_v57, %v1359_v16 }
 0x16e   :  { %v1810_v2 = vsub.s32 4, %v4853_v52  ;;  %v1361_v12 = vmul.f32 1.25, %v1351_v34  ;;  %v1367_v4 = vsub.f32 %v1365_v46, %v1366_v8  ;;  %v1530_v48 = vsel %vm1520_vm13, nan, %v1529_v5  ;;  %v5091_v46 = vld [vmem:[#allocation2 + $0x18] sm:$0xff] }
 0x16f   :  { %v1953_v41 = vshrl.u32 %v1935_v35, %v1951_v54  ;;  %v1956_v39 = vadd.s32 127, %v1955_v51  ;;  %vm1677_vm5 = vcmp.lt.s32.totalorder %v1676_v40, 2  ;;  %v1680_v62 = vsel %vm1678_vm12, %v1511_v37, %v1524_v17 }
 0x170   :  { %v1683_v44 = vsel %vm1681_vm14, %v1527_v60, %v1519_v45  ;;  %v1818_v20 = vadd.f32 -0.4999988, %v1817_v33  ;;  %v1826_v57 = vmul.f32 %v1825_v18, %v5033_v31  ;;  %v1811_v53 = vsel %vm1688_vm7, %v1810_v2, %v4853_v52 }
 0x171   :  { %v1954_v32 = vor.u32 %v1953_v41, %v1952_v21  ;;  %v1957_v63 = vshll.u32 %v1956_v39, 23  ;;  %v1996_v56 = vmul.f32 0.5, %v1530_v48  ;;  %v1363_v16 = vsub.f32 %v1361_v12, %v1362_v0  ;;  %v5101_v12 = vld [vmem:[#allocation2 + $0x10] sm:$0xff] }
 0x172   :  { %v5059_v24 = vmul.f32 %v1367_v4, %v1360_v29  ;;  %v1684_v3 = vsel %vm1677_vm5, %v1680_v62, %v1683_v44  ;;  %vm1843_vm11 = vcmp.lt.s32.totalorder %v4778_v49, 0  ;;  %v1819_v58 = vmul.f32 %v1818_v20, %v5033_v31 }
 0x173   :  { %v1958_v47 = vor.u32 4788187, %v1957_v63  ;;  %v1961_v11 = vcvt.s32.f32 %v1954_v32  ;;  %v5872_v37 = vand.u32 2147483647, %v4778_v49  ;;  %v1813_v52 = vsel %vm5003_vm9, 0, %v1811_v53 }
 0x174   :  { %v1827_v60 = vadd.f32 1.0, %v1826_v57  ;;  %v1685_v28 = vsel %vm1520_vm13, nan, %v1684_v3  ;;  %v5075_v34 = vadd.f32 3.5, %v1530_v48  ;;  %v5077_v31 = vadd.f32 1.25, %v1996_v56 }
 0x175   :  { %v1959_v6 = vand.u32 2147483647, %v1958_v47  ;;  %vm5065_vm15 = vcmp.le.f32.partialorder %v5872_v37, 0.7853982  ;;  %v5079_v13 = vmul.f32 %v1363_v16, %v1360_v29  ;;  %v1375_v7 = vmul.f32 0.025, %v5059_v24 }
 0x176   :  { %v1965_v61 = vsub.s32 4, %v5016_v25  ;;  %v1820_v54 = vadd.f32 1.0, %v1819_v58  ;;  %v1830_v14 = vand.u32 3, %v1813_v52  ;;  %v1828_v51 = vmul.f32 %v1827_v60, %v5024_v27 }
 0x177   :  { %v1962_v26 = vmul.f32 %v1961_v11, %v1959_v6  ;;  %v1998_v22 = vmul.f32 0.5, %v1685_v28  ;;  %v2015_v19 = vmul.f32 1.25, %v5075_v34  ;;  %v2016_v41 = vmul.f32 %v5077_v31, %v5077_v31 }
 0x178   :  { %v1373_v39 = vmul.f32 0.025, %v5079_v13  ;;  %v5094_v8 = vadd.f32 %v5091_v46, %v1375_v7  ;;  %v1966_v5 = vsel %vm1843_vm11, %v1965_v61, %v5016_v25  ;;  %vm1832_vm7 = vcmp.eq.s32.totalorder %v1830_v14, 0  ;;  %v5115_v7 = vld [vmem:[#allocation2 + $0x8] sm:$0xff] }
 0x179   :  { %v1963_v17 = vxor.u32 2147483648, %v1962_v26  ;;  %v1836_v27 = vxor.u32 2147483648, %v1820_v54  ;;  %v1833_v63 = vxor.u32 2147483648, %v1828_v51  ;;  %vm1835_vm2 = vcmp.eq.s32.totalorder %v1830_v14, 2 }
 0x17a   :  { %v1999_v29 = vsub.f32 0.0, %v1998_v22  ;;  %v2002_v18 = vmul.f32 2.0, %v1998_v22  ;;  %v1968_v0 = vsel %vm5065_vm15, 0, %v1966_v5  ;;  %v2017_v11 = vsub.f32 %v2015_v19, %v2016_v41 }
 0x17b   :  { %v1964_v35 = vsel %vm1843_vm11, %v1963_v17, %v1962_v26  ;;  %v5104_v4 = vadd.f32 %v5101_v12, %v1373_v39  ;;  %vm1831_vm9 = vcmp.lt.s32.totalorder %v1830_v14, 2  ;;  %v1837_v25 = vsel %vm1835_vm2, %v1836_v27, %v1828_v51 }
 0x17c   :  { %v1967_v36 = vsel %vm5065_vm15, %v4778_v49, %v1964_v35  ;;  %v1834_v44 = vsel %vm1832_vm7, %v1820_v54, %v1833_v63  ;;  %v1985_v20 = vand.u32 3, %v1968_v0  ;;  %v2000_v6 = vmul.f32 %v1999_v29, %v5094_v8 }
 0x17d   :  { %v1969_v21 = vmul.f32 %v1967_v36, %v1967_v36  ;;  %v2003_v57 = vmul.f32 %v2002_v18, %v5094_v8  ;;  %3500 = vrcp.f32 %v2017_v11  ;;  %v2006_v56 = vmul.f32 %v1998_v22, %v5104_v4 }
 0x17e   :  { %vm1829_vm10 = vweird.f32 %v4497_v1  ;;  %v1838_v16 = vsel %vm1831_vm9, %v1834_v44, %v1837_v25  ;;  %vm1990_vm6 = vcmp.eq.s32.totalorder %v1985_v20, 2  ;;  %v2001_v37 = vmul.f32 %v2000_v6, %v5094_v8 }
 0x17f   :  { %v1970_v9 = vmul.f32 -0.001358992, %v1969_v21  ;;  %v1977_v40 = vmul.f32 -0.00019511016, %v1969_v21  ;;  %v2004_v45 = vmul.f32 %v2003_v57, %v5104_v4  ;;  %v2032_v17 = vmul.f32 0.05, %v5094_v8 }
 0x180   :  { %v1839_v28 = vsel %vm1829_vm10, nan, %v1838_v16  ;;  %vm1987_vm0 = vcmp.eq.s32.totalorder %v1985_v20, 0  ;;  %v2007_v35 = vmul.f32 %v2006_v56, %v5104_v4  ;;  %vm1986_vm8 = vcmp.lt.s32.totalorder %v1985_v20, 2 }
 0x181   :  { %v1971_v33 = vadd.f32 0.041655596, %v1970_v9  ;;  %v1978_v32 = vadd.f32 0.008332121, %v1977_v40  ;;  %v5118_v1 = vadd.f32 %v5115_v7, %v2032_v17  ;;  %vm1984_vm4 = vweird.f32 %v4778_v49 }
 0x182   :  { %v2009_v22 = vmul.f32 14.7, %v1839_v28  ;;  %v2013_v40 = vsub.f32 %v5040_v42, %v2007_v35  ;;  %v2691_v5 = vmul.f32 2.0, %v4485_v23  ;;  %v2698_v63 = vmul.f32 2.0, %v4440_v55 }
 0x183   :  { %v1972_v2 = vmul.f32 %v1971_v33, %v1969_v21  ;;  %v1979_v47 = vmul.f32 %v1978_v32, %v1969_v21  ;;  %v3501_v61 = vpop.eup %3500  ;;  %v2041_v51 = vand.u32 2139095040, %v5118_v1 }
 0x184   :  { %v2019_v19 = vmul.f32 %v3501_v61, %v2017_v11  ;;  %v2693_v11 = vmul.f32 2.0, %v5104_v4  ;;  %v2699_v23 = vadd.f32 %v5091_v46, %v2698_v63 }
 0x185   :  { %v1973_v48 = vadd.f32 -0.4999988, %v1972_v2  ;;  %v1980_v62 = vadd.f32 -0.16666654, %v1979_v47  ;;  %v2042_v41 = vshrl.u32 %v2041_v51, 23  ;;  %v2692_v2 = vadd.f32 %v5101_v12, %v2691_v5 }
 0x186   :  { %v2020_v18 = vsub.f32 2.0, %v2019_v19 }
 0x187   :  { %v1974_v53 = vmul.f32 %v1973_v48, %v1969_v21  ;;  %v1981_v26 = vmul.f32 %v1980_v62, %v1969_v21  ;;  %v2005_v21 = vsub.f32 %v2001_v37, %v2004_v45  ;;  %v3454_v32 = vadd.s32 4294967169, %v2042_v41 }
 0x188   :  { %v2700_v48 = vmul.f32 2.0, %v5094_v8  ;;  %v2021_v55 = vmul.f32 %v3501_v61, %v2020_v18  ;;  %v2694_v56 = vadd.f32 %v2693_v11, %v2692_v2 }
 0x189   :  { %v1975_v3 = vadd.f32 1.0, %v1974_v53  ;;  %v1982_v58 = vadd.f32 1.0, %v1981_v26  ;;  %v2011_v33 = vsub.f32 0.0, %v2005_v21  ;;  %v2048_v0 = vadd.s32 1, %v3454_v32 }
 0x18a   :  { %v2701_v16 = vadd.f32 %v2700_v48, %v2699_v23 }
 0x18b   :  { %v1983_v52 = vmul.f32 %v1982_v58, %v1967_v36  ;;  %v1991_v60 = vxor.u32 2147483648, %v1975_v3  ;;  %vm2049_vm1 = vcmp.gt.s32.totalorder %v2048_v0, 0 }
 0x18c   :  { %v2050_v62 = vsel %vm2049_vm1, %v2048_v0, 0 }
 0x18d   :  { %v1988_v54 = vxor.u32 2147483648, %v1983_v52  ;;  %v1992_v14 = vsel %vm1990_vm6, %v1991_v60, %v1983_v52  ;;  %v2052_v6 = vand.u32 31, %v2050_v62  ;;  %v5144_v45 = vshrl.u32 %v2050_v62, 5 }
 0x18e   :  { %v5875_v52 = vmov 2475754826  }
 0x18f   :  { %v1989_v36 = vsel %vm1987_vm0, %v1975_v3, %v1988_v54  ;;  %v5132_v26 = vsub.s32 32, %v2052_v6  ;;  %v2064_v8 = vshll.u32 %v5855_v30, %v2052_v6  ;;  %v2055_v17 = vshll.u32 %v5858_v38, %v2052_v6 }
 0x190   :  { %v1993_v9 = vsel %vm1986_vm8, %v1989_v36, %v1992_v14  ;;  %v2058_v61 = vshll.u32 %v5875_v52, %v2052_v6  ;;  %v5876_v54 = vmov 2131351028   ;;  %v2067_v5 = vshll.u32 %v5856_v43, %v2052_v6 }
 0x191   :  { %v1994_v39 = vsel %vm1984_vm4, nan, %v1993_v9  ;;  %v2065_v37 = vshrl.u32 %v5856_v43, %v5132_v26  ;;  %v2056_v60 = vshrl.u32 %v5875_v52, %v5132_v26  ;;  %v2059_v14 = vshrl.u32 %v5876_v54, %v5132_v26 }
 0x192   :  { %v2008_v27 = vmul.f32 4.9, %v1994_v39  ;;  %v2061_v36 = vshll.u32 %v5876_v54, %v2052_v6  ;;  %vm2070_vm3 = vcmp.lt.s32.totalorder %v5144_v45, 1  ;;  %vm2072_vm13 = vcmp.lt.s32.totalorder %v5144_v45, 3 }
 0x193   :  { %v5154_v51 = vor.u32 %v2056_v60, %v2055_v17  ;;  %v5165_v19 = vor.u32 %v2059_v14, %v2058_v61  ;;  %v2066_v41 = vor.u32 %v2065_v37, %v2064_v8  ;;  %vm2071_vm12 = vcmp.lt.s32.totalorder %v5144_v45, 2 }
 0x194   :  { %v2010_v29 = vadd.f32 %v2009_v22, %v2008_v27  ;;  %v2014_v49 = vsub.f32 %v2013_v40, %v2008_v27  ;;  %v2062_v22 = vshrl.u32 %v5855_v30, %v5132_v26  ;;  %v2068_v27 = vshrl.u32 %v5857_v15, %v5132_v26 }
 0x195   :  { %vm2073_vm14 = vcmp.lt.s32.totalorder %v5144_v45, 4  ;;  %v2078_v32 = vsel %vm2070_vm3, %v5154_v51, %v5165_v19 }
 0x196   :  { %v2012_v47 = vsub.f32 %v2011_v33, %v2010_v29  ;;  %v2023_v25 = vmul.f32 %v2014_v49, %v5077_v31  ;;  %v2026_v42 = vmul.f32 %v2014_v49, %v5075_v34  ;;  %v5840_v34 = vand.u32 2147483647, %v5118_v1 }
 0x197   :  { %v5167_v39 = vor.u32 %v2062_v22, %v2061_v36  ;;  %v2079_v49 = vsel %vm2073_vm14, %v2066_v41, 920167782 }
 0x198   :  { %v2022_v44 = vmul.f32 1.25, %v2012_v47  ;;  %v2027_v20 = vmul.f32 %v2012_v47, %v5077_v31  ;;  %v2045_v31 = vand.u32 8388607, %v5840_v34 }
 0x199   :  { %v2082_v18 = vsel %vm2070_vm3, %v5165_v19, %v5167_v39  ;;  %v2080_v0 = vsel %vm2072_vm13, %v5167_v39, %v2079_v49 }
 0x19a   :  { %v2024_v57 = vsub.f32 %v2022_v44, %v2023_v25  ;;  %v2028_v53 = vsub.f32 %v2026_v42, %v2027_v20  ;;  %v2046_v21 = vor.u32 8388608, %v2045_v31  ;;  %v5195_v25 = vld [vmem:[#allocation2] sm:$0xff]  ;;  %v2081_v23 = vsel %vm2071_vm12, %v2078_v32, %v2080_v0 }
 0x19b   :  { %v2111_v37 = vand.u32 65535, %v2081_v23 }
 0x19c   :  { %v5135_v3 = vmul.f32 %v2024_v57, %v2021_v55  ;;  %v5137_v58 = vmul.f32 %v2028_v53, %v2021_v55  ;;  %v5193_v47 = vshll.u32 %v2046_v21, 8 }
 0x19e   :  { %v2034_v28 = vmul.f32 0.05, %v5135_v3  ;;  %v2036_v35 = vmul.f32 0.05, %v5137_v58  ;;  %v2087_v55 = vand.u32 65535, %v5193_v47  ;;  %v2088_v44 = vshrl.u32 %v5193_v47, 16 }
 0x1a0   :  { %v5160_v9 = vadd.f32 %v5101_v12, %v2034_v28  ;;  %v5163_v40 = vadd.f32 %v5091_v46, %v2036_v35  ;;  %v2069_v46 = vor.u32 %v2068_v27, %v2067_v5  ;;  %v2113_v36 = vmul.u32 %v2111_v37, %v2087_v55 }
 0x1a1   :  { %v5214_v22 = vmul.u32 %v2111_v37, %v2088_v44 }
 0x1a2   :  { %v2695_v33 = vadd.f32 %v2694_v56, %v5160_v9  ;;  %v2702_v12 = vadd.f32 %v2701_v16, %v5163_v40  ;;  %v2083_v2 = vsel %vm2073_vm14, %v2069_v46, 1326507024  ;;  %v2112_v56 = vshrl.u32 %v2081_v23, 16 }
 0x1a3   :  { %v2084_v48 = vsel %vm2072_vm13, %v2066_v41, %v2083_v2  ;;  %v2054_v23 = vshrl.u32 %v5858_v38, %v5132_v26 }
 0x1a4   :  { %v2696_v63 = vmul.f32 0.008333334, %v2695_v33  ;;  %v2703_v29 = vmul.f32 0.008333334, %v2702_v12  ;;  %v2085_v62 = vsel %vm2071_vm12, %v2082_v18, %v2084_v48  ;;  %v5211_v60 = vmul.u32 %v2112_v56, %v2087_v55 }
 0x1a5   :  { %v2089_v57 = vand.u32 65535, %v2085_v62  ;;  %v2090_v53 = vshrl.u32 %v2085_v62, 16  ;;  %v5843_v18 = vshll.u32 %v5214_v22, 16  ;;  %v2075_v62 = vsel %vm2073_vm14, %v5167_v39, 2102212464 }
 0x1a6   :  { %v2697_v42 = vadd.f32 %v5195_v25, %v2696_v63  ;;  %v2704_v11 = vadd.f32 %v5115_v7, %v2703_v29  ;;  %v2117_v27 = vshll.u32 %v5211_v60, 16 }
 0x1a7   :  { %v5207_v8 = vmul.u32 %v2090_v53, %v2087_v55  ;;  %v2091_v31 = vmul.u32 %v2089_v57, %v2087_v55  ;;  %v5209_v17 = vmul.u32 %v2089_v57, %v2088_v44  ;;  %v2094_v46 = vmul.u32 %v2090_v53, %v2088_v44 }
 0x1a8   :  { %v2719_v20 = vadd.f32 3.1415927, %v2697_v42  ;;  %v2724_v6 = vadd.f32 3.1415927, %v2704_v11  ;;  %vm2121_vm15 = vc.u32 %v2113_v36, %v2117_v27  ;;  %v5228_v0 = vadd.s32 %v2117_v27, %v2113_v36 }
 0x1a9   :  { %v2095_v61 = vshll.u32 %v5207_v8, 16  ;;  %v2097_v41 = vshll.u32 %v5209_v17, 16  ;;  %v2096_v39 = vshrl.u32 %v5207_v8, 16 }
 0x1aa   :  { %v2720_v16 = vmul.f32 0.15915494, %v2719_v20  ;;  %v2725_v7 = vmul.f32 0.15915494, %v2724_v6  ;;  %v2116_v20 = vmul.u32 %v2112_v56, %v2088_v44  ;;  %vm2125_vm7 = vc.u32 %v5228_v0, %v5843_v18 }
 0x1ab   :  { %vm2099_vm5 = vc.u32 %v2091_v31, %v2095_v61  ;;  %v2101_v5 = vadd.s32 %v2095_v61, %v2091_v31  ;;  %v2074_v31 = vsel %vm2070_vm3, %v2054_v23, %v5154_v51  ;;  %v2076_v56 = vsel %vm2072_vm13, %v5165_v19, %v2075_v62 }
 0x1ac   :  { %v2721_v28 = vfloor.f32 %v2720_v16  ;;  %v2726_v35 = vfloor.f32 %v2725_v7  ;;  %v2100_v49 = vsel %vm2099_vm5, 1, %v3652_v50  ;;  %v2122_v16 = vsel %vm2121_vm15, 1, %v3652_v50 }
 0x1ad   :  { %vm2103_vm11 = vc.u32 %v2101_v5, %v2097_v41  ;;  %v2102_v55 = vadd.s32 %v2100_v49, %v2094_v46  ;;  %v2118_v51 = vshrl.u32 %v5211_v60, 16  ;;  %v5260_v5 = vsel %vm2071_vm12, %v2074_v31, %v2076_v56 }
 0x1ae   :  { %v2722_v14 = vmul.f32 6.2831855, %v2721_v28  ;;  %v2727_v21 = vmul.f32 6.2831855, %v2726_v35  ;;  %v2104_v53 = vsel %vm2103_vm11, 1, %v3652_v50  ;;  %v2124_v35 = vadd.s32 %v2122_v16, %v2116_v20 }
 0x1af   :  { %v2106_v28 = vadd.s32 %v2104_v53, %v2102_v55 }
 0x1b0   :  { %v5218_v33 = vsub.f32 %v2697_v42, %v2722_v14  ;;  %v2728_v12 = vsub.f32 %v2704_v11, %v2727_v21  ;;  %v2126_v14 = vsel %vm2125_vm7, 1, %v3652_v50 }
 0x1b1   :  { %v5263_v46 = vadd.s32 %v2106_v28, %v2096_v39 }
 0x1b2   :  { %v5221_v32 = vadd.f32 %v2728_v12, %v5218_v33  ;;  %v5842_v63 = vand.u32 2147483647, %v5218_v33  ;;  %v2744_v29 = vand.u32 2139095040, %v5218_v33  ;;  %2733 = vst [vmem:[#allocation7] sm:$0xff] %v5218_v33 }
 0x1b3   :  { %2735 = vst [vmem:[#allocation7 + $0x8] sm:$0xff] %v2728_v12 }
 0x1b4   :  { %v2745_v2 = vshrl.u32 %v2744_v29, 23  ;;  %v2748_v42 = vand.u32 8388607, %v5842_v63  ;;  %v2899_v11 = vand.u32 2139095040, %v5221_v32  ;;  %v5841_v48 = vand.u32 2147483647, %v5221_v32 }
 0x1b5   :  { %v5265_v29 = vadd.s32 %v2126_v14, %v2124_v35 }
 0x1b6   :  { %v3468_v6 = vadd.s32 4294967169, %v2745_v2  ;;  %v2900_v57 = vshrl.u32 %v2899_v11, 23  ;;  %v2749_v7 = vor.u32 8388608, %v2748_v42  ;;  %v2903_v44 = vand.u32 8388607, %v5841_v48 }
 0x1b8   :  { %v2751_v26 = vadd.s32 1, %v3468_v6  ;;  %v3471_v37 = vadd.s32 4294967169, %v2900_v57  ;;  %v5254_v36 = vshll.u32 %v2749_v7, 8  ;;  %v2904_v12 = vor.u32 8388608, %v2903_v44 }
 0x1ba   :  { %vm2752_vm2 = vcmp.gt.s32.totalorder %v2751_v26, 0  ;;  %v2906_v61 = vadd.s32 1, %v3471_v37  ;;  %v2790_v62 = vand.u32 65535, %v5254_v36 }
 0x1bb   :  { %v2753_v21 = vsel %vm2752_vm2, %v2751_v26, 0 }
 0x1bc   :  { %v2755_v41 = vand.u32 31, %v2753_v21  ;;  %vm2907_vm9 = vcmp.gt.s32.totalorder %v2906_v61, 0  ;;  %v2754_v27 = vshrl.u32 %v2753_v21, 5 }
 0x1bd   :  { %v2908_v55 = vsel %vm2907_vm9, %v2906_v61, 0 }
 0x1be   :  { %v2756_v49 = vsub.s32 32, %v2755_v41  ;;  %v2758_v2 = vshll.u32 %v5858_v38, %v2755_v41  ;;  %v2761_v42 = vshll.u32 %v5875_v52, %v2755_v41  ;;  %v2764_v11 = vshll.u32 %v5876_v54, %v2755_v41 }
 0x1bf   :  { %v2767_v23 = vshll.u32 %v5855_v30, %v2755_v41  ;;  %v2770_v45 = vshll.u32 %v5856_v43, %v2755_v41  ;;  %vm2773_vm10 = vcmp.lt.s32.totalorder %v2754_v27, 1  ;;  %vm2774_vm6 = vcmp.lt.s32.totalorder %v2754_v27, 2 }
 0x1c0   :  { %v2757_v20 = vshrl.u32 %v5858_v38, %v2756_v49  ;;  %v2759_v6 = vshrl.u32 %v5875_v52, %v2756_v49  ;;  %v2762_v57 = vshrl.u32 %v5876_v54, %v2756_v49  ;;  %v2765_v53 = vshrl.u32 %v5855_v30, %v2756_v49 }
 0x1c1   :  { %v2768_v16 = vshrl.u32 %v5856_v43, %v2756_v49  ;;  %v2771_v7 = vshrl.u32 %v5857_v15, %v2756_v49  ;;  %vm2776_vm0 = vcmp.lt.s32.totalorder %v2754_v27, 4  ;;  %vm2775_vm8 = vcmp.lt.s32.totalorder %v2754_v27, 3 }
 0x1c2   :  { %v2760_v26 = vor.u32 %v2759_v6, %v2758_v2  ;;  %v2763_v37 = vor.u32 %v2762_v57, %v2761_v42  ;;  %v2766_v31 = vor.u32 %v2765_v53, %v2764_v11  ;;  %v2910_v56 = vand.u32 31, %v2908_v55 }
 0x1c3   :  { %v2769_v39 = vor.u32 %v2768_v16, %v2767_v23  ;;  %v2772_v44 = vor.u32 %v2771_v7, %v2770_v45  ;;  %v2791_v2 = vshrl.u32 %v5254_v36, 16  ;;  %v5282_v42 = vshll.u32 %v2904_v12, 8 }
 0x1c4   :  { %v2777_v28 = vsel %vm2773_vm10, %v2757_v20, %v2760_v26  ;;  %v2778_v35 = vsel %vm2776_vm0, %v2766_v31, 2102212464  ;;  %v2781_v61 = vsel %vm2773_vm10, %v2760_v26, %v2763_v37  ;;  %v2785_v14 = vsel %vm2773_vm10, %v2763_v37, %v2766_v31 }
 0x1c5   :  { %v2779_v21 = vsel %vm2775_vm8, %v2763_v37, %v2778_v35  ;;  %v2782_v41 = vsel %vm2776_vm0, %v2769_v39, 920167782  ;;  %v2786_v34 = vsel %vm2776_vm0, %v2772_v44, 1326507024  ;;  %v5279_v48 = vsub.s32 32, %v2910_v56 }
 0x1c6   :  { %v2783_v49 = vsel %vm2775_vm8, %v2766_v31, %v2782_v41  ;;  %v2787_v63 = vsel %vm2775_vm8, %v2769_v39, %v2786_v34  ;;  %v5285_v11 = vsel %vm2774_vm6, %v2777_v28, %v2779_v21  ;;  %v5289_v20 = vshrl.u32 %v2908_v55, 5 }
 0x1c7   :  { %v2784_v23 = vsel %vm2774_vm6, %v2781_v61, %v2783_v49  ;;  %v2788_v45 = vsel %vm2774_vm6, %v2785_v14, %v2787_v63  ;;  %v2913_v7 = vshll.u32 %v5858_v38, %v2910_v56  ;;  %v2914_v34 = vshrl.u32 %v5875_v52, %v5279_v48 }
 0x1c8   :  { %v2792_v6 = vand.u32 65535, %v2788_v45  ;;  %v2793_v57 = vshrl.u32 %v2788_v45, 16  ;;  %v2814_v53 = vand.u32 65535, %v2784_v23  ;;  %v2815_v16 = vshrl.u32 %v2784_v23, 16 }
 0x1c9   :  { %v2916_v12 = vshll.u32 %v5875_v52, %v2910_v56  ;;  %v2917_v26 = vshrl.u32 %v5876_v54, %v5279_v48  ;;  %v2919_v63 = vshll.u32 %v5876_v54, %v2910_v56  ;;  %v5298_v19 = vor.u32 %v2914_v34, %v2913_v7 }
 0x1ca   :  { %v2794_v37 = vmul.u32 %v2792_v6, %v2790_v62  ;;  %v2795_v31 = vmul.u32 %v2793_v57, %v2790_v62  ;;  %v2796_v27 = vmul.u32 %v2792_v6, %v2791_v2  ;;  %v2797_v55 = vmul.u32 %v2793_v57, %v2791_v2 }
 0x1cb   :  { %v2816_v39 = vmul.u32 %v2814_v53, %v2790_v62  ;;  %v2817_v44 = vmul.u32 %v2815_v16, %v2790_v62  ;;  %v2818_v28 = vmul.u32 %v2814_v53, %v2791_v2  ;;  %v2819_v21 = vmul.u32 %v2815_v16, %v2791_v2 }
 0x1cc   :  { %v2798_v35 = vshll.u32 %v2795_v31, 16  ;;  %v2799_v61 = vshrl.u32 %v2795_v31, 16  ;;  %v2800_v14 = vshll.u32 %v2796_v27, 16  ;;  %v2801_v41 = vshrl.u32 %v2796_v27, 16 }
 0x1cd   :  { %v2820_v49 = vshll.u32 %v2817_v44, 16  ;;  %v2821_v23 = vshrl.u32 %v2817_v44, 16  ;;  %v2822_v45 = vshll.u32 %v2818_v28, 16  ;;  %v2823_v18 = vshrl.u32 %v2818_v28, 16 }
 0x1ce   :  { %vm2802_vm4 = vc.u32 %v2794_v37, %v2798_v35  ;;  %v2804_v8 = vadd.s32 %v2798_v35, %v2794_v37  ;;  %v2920_v62 = vshrl.u32 %v5855_v30, %v5279_v48  ;;  %v2922_v16 = vshll.u32 %v5855_v30, %v2910_v56 }
 0x1cf   :  { %v2803_v6 = vsel %vm2802_vm4, 1, %v3652_v50  ;;  %vm2824_vm1 = vc.u32 %v2816_v39, %v2820_v49  ;;  %v2826_v57 = vadd.s32 %v2820_v49, %v2816_v39  ;;  %v5306_v37 = vor.u32 %v2917_v26, %v2916_v12 }
 0x1d0   :  { %v2805_v53 = vadd.s32 %v2803_v6, %v2797_v55  ;;  %vm2806_vm3 = vc.u32 %v2804_v8, %v2800_v14  ;;  %v2825_v2 = vsel %vm2824_vm1, 1, %v3652_v50  ;;  %v2921_v44 = vor.u32 %v2920_v62, %v2919_v63 }
 0x1d1   :  { %v2807_v31 = vsel %vm2806_vm3, 1, %v3652_v50  ;;  %v2827_v27 = vadd.s32 %v2825_v2, %v2819_v21  ;;  %vm2828_vm13 = vc.u32 %v2826_v57, %v2822_v45  ;;  %v2923_v39 = vshrl.u32 %v5856_v43, %v5279_v48 }
 0x1d2   :  { %v2809_v7 = vadd.s32 %v2807_v31, %v2805_v53  ;;  %v2829_v34 = vsel %vm2828_vm13, 1, %v3652_v50  ;;  %v2925_v8 = vshll.u32 %v5856_v43, %v2910_v56  ;;  %v2926_v55 = vshrl.u32 %v5857_v15, %v5279_v48 }
 0x1d3   :  { %v2831_v28 = vadd.s32 %v2829_v34, %v2827_v27  ;;  %vm2928_vm12 = vcmp.lt.s32.totalorder %v5289_v20, 1  ;;  %v5315_v14 = vadd.s32 %v2826_v57, %v2822_v45  ;;  %v2924_v12 = vor.u32 %v2923_v39, %v2922_v16 }
 0x1d4   :  { %v2810_v35 = vadd.s32 %v2809_v7, %v2799_v61  ;;  %vm2930_vm14 = vcmp.lt.s32.totalorder %v5289_v20, 3  ;;  %v2927_v21 = vor.u32 %v2926_v55, %v2925_v8  ;;  %vm2929_vm5 = vcmp.lt.s32.totalorder %v5289_v20, 2 }
 0x1d5   :  { %v2832_v26 = vadd.s32 %v2831_v28, %v2821_v23  ;;  %vm2931_vm11 = vcmp.lt.s32.totalorder %v5289_v20, 4  ;;  %v2936_v56 = vsel %vm2928_vm12, %v5298_v19, %v5306_v37  ;;  %v2129_v49 = vadd.s32 %v5265_v29, %v2118_v51 }
 0x1d6   :  { %v5320_v63 = vadd.s32 %v2810_v35, %v2801_v41  ;;  %v2937_v61 = vsel %vm2931_vm11, %v2924_v12, 920167782  ;;  %v2945_v6 = vand.u32 65535, %v5282_v42  ;;  %v2946_v41 = vshrl.u32 %v5282_v42, 16 }
 0x1d7   :  { %v2833_v23 = vadd.s32 %v2832_v26, %v2823_v18  ;;  %v2938_v45 = vsel %vm2930_vm14, %v2921_v44, %v2937_v61  ;;  %v2834_v57 = vmul.u32 %v5254_v36, %v5285_v11  ;;  %v2940_v60 = vsel %vm2928_vm12, %v5306_v37, %v2921_v44 }
 0x1d8   :  { %vm2836_vm15 = vc.u32 %v5320_v63, %v5315_v14  ;;  %v2939_v62 = vsel %vm2929_vm5, %v2936_v56, %v2938_v45  ;;  %v2941_v51 = vsel %vm2931_vm11, %v2927_v21, 1326507024  ;;  %v5877_v36 = vshrl.u32 %v5209_v17, 16 }
 0x1d9   :  { %v2837_v18 = vadd.s32 1, %v2833_v23  ;;  %v2969_v29 = vand.u32 65535, %v2939_v62  ;;  %v2970_v53 = vshrl.u32 %v2939_v62, 16  ;;  %v2942_v2 = vsel %vm2930_vm14, %v2924_v12, %v2941_v51 }
 0x1da   :  { %v5351_v11 = vadd.s32 %v5263_v46, %v5877_v36  ;;  %v5878_v16 = vshll.u32 %v5214_v22, 16  ;;  %v5879_v27 = vshrl.u32 %v5214_v22, 16  ;;  %v2912_v39 = vshrl.u32 %v5858_v38, %v5279_v48 }
 0x1db   :  { %v2838_v34 = vsel %vm2836_vm15, %v2837_v18, %v2833_v23  ;;  %v2943_v28 = vsel %vm2929_vm5, %v2940_v60, %v2942_v2  ;;  %v2972_v8 = vmul.u32 %v2970_v53, %v2945_v6  ;;  %v2973_v35 = vmul.u32 %v2969_v29, %v2946_v41 }
 0x1dc   :  { %v5356_v31 = vadd.s32 %v5228_v0, %v5878_v16  ;;  %v2130_v7 = vadd.s32 %v2129_v49, %v5879_v27  ;;  %v2839_v17 = vadd.s32 %v2838_v34, %v2834_v57  ;;  %v2947_v55 = vand.u32 65535, %v2943_v28 }
 0x1dd   :  { %v2948_v46 = vshrl.u32 %v2943_v28, 16  ;;  %v2971_v12 = vmul.u32 %v2969_v29, %v2945_v6  ;;  %v2975_v26 = vshll.u32 %v2972_v8, 16  ;;  %v2030_v0 = vmul.f32 0.05, %v5104_v4 }
 0x1de   :  { %v2131_v22 = vmul.u32 %v5193_v47, %v5260_v5  ;;  %v2840_v21 = vadd.s32 536870912, %v2839_v17  ;;  %v2949_v56 = vmul.u32 %v2947_v55, %v2945_v6  ;;  %vm2133_vm7 = vc.u32 %v5351_v11, %v5356_v31 }
 0x1df   :  { %v2950_v61 = vmul.u32 %v2948_v46, %v2945_v6  ;;  %v2933_v48 = vsel %vm2931_vm11, %v2921_v44, 2102212464  ;;  %v2951_v49 = vmul.u32 %v2947_v55, %v2946_v41  ;;  %v2977_v23 = vshll.u32 %v2973_v35, 16 }
 0x1e0   :  { %v2134_v45 = vadd.s32 1, %v2130_v7  ;;  %v5371_v57 = vshrl.u32 %v2840_v21, 30  ;;  %v2932_v4 = vsel %vm2928_vm12, %v2912_v39, %v5298_v19  ;;  %v2952_v62 = vmul.u32 %v2948_v46, %v2946_v41 }
 0x1e1   :  { %v2953_v47 = vshll.u32 %v2950_v61, 16  ;;  %v2955_v5 = vshll.u32 %v2951_v49, 16  ;;  %v2974_v60 = vmul.u32 %v2970_v53, %v2946_v41  ;;  %vm2979_vm2 = vc.u32 %v2971_v12, %v2975_v26 }
 0x1e2   :  { %v2981_v6 = vadd.s32 %v2975_v26, %v2971_v12  ;;  %v2842_v18 = vshll.u32 %v5371_v57, 30  ;;  %v2934_v44 = vsel %vm2930_vm14, %v5306_v37, %v2933_v48  ;;  %v2976_v2 = vshrl.u32 %v2972_v8, 16 }
 0x1e3   :  { %vm2957_vm9 = vc.u32 %v2949_v56, %v2953_v47  ;;  %v2959_v51 = vadd.s32 %v2953_v47, %v2949_v56  ;;  %v2980_v36 = vsel %vm2979_vm2, 1, %v3652_v50  ;;  %v2954_v16 = vshrl.u32 %v2950_v61, 16 }
 0x1e4   :  { %v2958_v29 = vsel %vm2957_vm9, 1, %v3652_v50  ;;  %vm2983_vm10 = vc.u32 %v2981_v6, %v2977_v23  ;;  %v2843_v19 = vsub.s32 %v2839_v17, %v2842_v18  ;;  %v2956_v41 = vshrl.u32 %v2951_v49, 16 }
 0x1e5   :  { %v2960_v27 = vadd.s32 %v2958_v29, %v2952_v62  ;;  %vm2961_vm6 = vc.u32 %v2959_v51, %v2955_v5  ;;  %v2982_v34 = vadd.s32 %v2980_v36, %v2974_v60  ;;  %v2984_v39 = vsel %vm2983_vm10, 1, %v3652_v50 }
 0x1e6   :  { %v2962_v53 = vsel %vm2961_vm6, 1, %v3652_v50  ;;  %vm2844_vm0 = vcmp.lt.s32.totalorder %v2843_v19, 0  ;;  %v2845_v37 = vsub.s32 0, %v2843_v19  ;;  %v2135_v8 = vsel %vm2133_vm7, %v2134_v45, %v2130_v7 }
 0x1e7   :  { %v2964_v28 = vadd.s32 %v2962_v53, %v2960_v27  ;;  %v2978_v55 = vshrl.u32 %v2973_v35, 16  ;;  %v2986_v46 = vadd.s32 %v2984_v39, %v2982_v34  ;;  %v2985_v26 = vadd.s32 %v2981_v6, %v2977_v23 }
 0x1e8   :  { %v2846_v12 = vsel %vm2844_vm0, %v2845_v37, %v2843_v19  ;;  %v5388_v21 = vadd.f32 %v5195_v25, %v2030_v0  ;;  %v2935_v61 = vsel %vm2929_vm5, %v2932_v4, %v2934_v44  ;;  %v2136_v49 = vadd.s32 %v2135_v8, %v2131_v22 }
 0x1e9   :  { %v2965_v17 = vadd.s32 %v2964_v28, %v2954_v16  ;;  %v2847_v56 = vclz %v2846_v12  ;;  %v2987_v48 = vadd.s32 %v2986_v46, %v2976_v2  ;;  %v2989_v7 = vmul.u32 %v5282_v42, %v2935_v61 }
 0x1ea   :  { %v2350_v47 = vand.u32 2139095040, %v5388_v21  ;;  %v2835_v35 = vadd.s32 %v5315_v14, %v5320_v63  ;;  %v2137_v0 = vadd.s32 536870912, %v2136_v49  ;;  %vm2743_vm1 = vcmp.lt.s32.totalorder %v5218_v33, 0 }
 0x1eb   :  { %v2966_v62 = vadd.s32 %v2965_v17, %v2956_v41  ;;  %v3469_v5 = vadd.s32 4294967294, %v2847_v56  ;;  %v2988_v60 = vadd.s32 %v2987_v48, %v2978_v55  ;;  %v5880_v55 = vand.u32 2147483647, %v5218_v33 }
 0x1ec   :  { %v2351_v45 = vshrl.u32 %v2350_v47, 23  ;;  %v5396_v29 = vshrl.u32 %v2137_v0, 30  ;;  %vm2898_vm11 = vcmp.lt.s32.totalorder %v5221_v32, 0 }
 0x1ed   :  { %vm2991_vm8 = vc.u32 %v2966_v62, %v2985_v26  ;;  %vm3470_vm4 = vcmp.lt.s32.totalorder %v3469_v5, 0  ;;  %v2992_v25 = vadd.s32 1, %v2988_v60  ;;  %vm5407_vm13 = vcmp.le.f32.partialorder %v5880_v55, 0.7853982 }
 0x1ee   :  { %v2850_v23 = vsel %vm3470_vm4, 0, %v3469_v5  ;;  %v3460_v16 = vadd.s32 4294967169, %v2351_v45  ;;  %v2139_v41 = vshll.u32 %v5396_v29, 30  ;;  %v2865_v45 = vsub.s32 4, %v5371_v57 }
 0x1ef   :  { %v2851_v20 = vsub.s32 32, %v2850_v23  ;;  %v2852_v4 = vshll.u32 %v2843_v19, %v2850_v23  ;;  %v2855_v6 = vsub.s32 4294967266, %v2850_v23  ;;  %v2993_v22 = vsel %vm2991_vm8, %v2992_v25, %v2988_v60 }
 0x1f0   :  { %v2994_v18 = vadd.s32 %v2993_v22, %v2989_v7  ;;  %v2357_v34 = vadd.s32 1, %v3460_v16  ;;  %v5402_v28 = vsub.s32 %v2136_v49, %v2139_v41  ;;  %v2990_v7 = vadd.s32 %v2985_v26, %v2966_v62 }
 0x1f1   :  { %v2853_v44 = vshrl.u32 %v2835_v35, %v2851_v20  ;;  %v2856_v51 = vadd.s32 127, %v2855_v6  ;;  %v5844_v6 = vand.u32 2147483647, %v5388_v21  ;;  %v5883_v41 = vand.u32 2147483647, %v5221_v32 }
 0x1f2   :  { %v2995_v2 = vadd.s32 536870912, %v2994_v18  ;;  %vm2358_vm12 = vcmp.gt.s32.totalorder %v2357_v34, 0  ;;  %v2142_v48 = vsub.s32 0, %v5402_v28  ;;  %vm2141_vm14 = vcmp.lt.s32.totalorder %v5402_v28, 0 }
 0x1f3   :  { %v2854_v42 = vor.u32 %v2853_v44, %v2852_v4  ;;  %v2857_v36 = vshll.u32 %v2856_v51, 23  ;;  %v2359_v47 = vsel %vm2358_vm12, %v2357_v34, 0  ;;  %vm5441_vm15 = vcmp.le.f32.partialorder %v5883_v41, 0.7853982 }
 0x1f4   :  { %v5398_v27 = vshrl.u32 %v2995_v2, 30  ;;  %v2143_v25 = vsel %vm2141_vm14, %v2142_v48, %v5402_v28  ;;  %v2361_v0 = vand.u32 31, %v2359_v47  ;;  %vm2884_vm4 = vweird.f32 %v5218_v33 }
 0x1f5   :  { %v2858_v14 = vor.u32 4788187, %v2857_v36  ;;  %v2861_v63 = vcvt.s32.f32 %v2854_v42  ;;  %v2144_v44 = vclz %v2143_v25  ;;  %v5431_v42 = vadd.s32 %v5356_v31, %v5351_v11 }
 0x1f6   :  { %v2997_v53 = vshll.u32 %v5398_v27, 30  ;;  %v2362_v26 = vsub.s32 32, %v2361_v0  ;;  %v2866_v36 = vsel %vm2743_vm1, %v2865_v45, %v5371_v57  ;;  %v5445_v31 = vshrl.u32 %v2359_v47, 5 }
 0x1f7   :  { %v2859_v19 = vand.u32 2147483647, %v2858_v14  ;;  %v2354_v14 = vand.u32 8388607, %v5844_v6  ;;  %v3455_v11 = vadd.s32 4294967294, %v2144_v44  ;;  %v2364_v57 = vshll.u32 %v5858_v38, %v2361_v0 }
 0x1f8   :  { %v2998_v39 = vsub.s32 %v2994_v18, %v2997_v53  ;;  %v2368_v48 = vshrl.u32 %v5876_v54, %v2362_v26  ;;  %v2371_v47 = vshrl.u32 %v5855_v30, %v2362_v26  ;;  %v2376_v45 = vshll.u32 %v5856_v43, %v2361_v0 }
 0x1f9   :  { %v2862_v37 = vmul.f32 %v2861_v63, %v2859_v19  ;;  %vm3456_vm7 = vcmp.lt.s32.totalorder %v3455_v11, 0  ;;  %vm2382_vm2 = vcmp.lt.s32.totalorder %v5445_v31, 4  ;;  %vm2379_vm9 = vcmp.lt.s32.totalorder %v5445_v31, 1 }
 0x1fa   :  { %vm2999_vm3 = vcmp.lt.s32.totalorder %v2998_v39, 0  ;;  %v3000_v8 = vsub.s32 0, %v2998_v39  ;;  %vm2381_vm10 = vcmp.lt.s32.totalorder %v5445_v31, 3  ;;  %vm2380_vm6 = vcmp.lt.s32.totalorder %v5445_v31, 2 }
 0x1fb   :  { %v2863_v12 = vxor.u32 2147483648, %v2862_v37 }
 0x1fc   :  { %v3001_v17 = vsel %vm2999_vm3, %v3000_v8, %v2998_v39 }
 0x1fd   :  { %v2864_v56 = vsel %vm2743_vm1, %v2863_v12, %v2862_v37  ;;  %v3002_v61 = vclz %v3001_v17  ;;  %v2374_v37 = vshrl.u32 %v5856_v43, %v2362_v26  ;;  %v2367_v12 = vshll.u32 %v5875_v52, %v2361_v0 }
 0x1fe   :  { %v5417_v49 = vsel %vm5407_vm13, %v5218_v33, %v2864_v56  ;;  %v2370_v17 = vshll.u32 %v5876_v54, %v2361_v0  ;;  %v3020_v56 = vsub.s32 4, %v5398_v27 }
 0x1ff   :  { %v5422_v5 = vmul.f32 %v5417_v49, %v5417_v49  ;;  %v3472_v60 = vadd.s32 4294967294, %v3002_v61  ;;  %v2365_v61 = vshrl.u32 %v5875_v52, %v2362_v26 }
 0x200   :  { %v3021_v46 = vsel %vm2898_vm11, %v3020_v56, %v5398_v27 }
 0x201   :  { %v2877_v35 = vmul.f32 -0.00019511016, %v5422_v5  ;;  %vm3473_vm5 = vcmp.lt.s32.totalorder %v3472_v60, 0  ;;  %v2870_v22 = vmul.f32 -0.001358992, %v5422_v5  ;;  %v5472_v44 = vor.u32 %v2365_v61, %v2364_v57 }
 0x202   :  { %v3005_v23 = vsel %vm3473_vm5, 0, %v3472_v60  ;;  %v5459_v60 = vsel %vm5407_vm13, 0, %v2866_v36  ;;  %v5478_v36 = vsel %vm3456_vm7, 0, %v3455_v11  ;;  %v5489_v41 = vsel %vm5441_vm15, 0, %v3021_v46 }
 0x203   :  { %v3006_v20 = vsub.s32 32, %v3005_v23  ;;  %v3007_v4 = vshll.u32 %v2998_v39, %v3005_v23  ;;  %v3010_v18 = vsub.s32 4294967266, %v3005_v23  ;;  %v2878_v51 = vadd.f32 0.008332121, %v2877_v35 }
 0x204   :  { %v2871_v63 = vadd.f32 0.041655596, %v2870_v22  ;;  %v2373_v39 = vshll.u32 %v5855_v30, %v2361_v0  ;;  %v2355_v22 = vor.u32 8388608, %v2354_v14  ;;  %v5493_v11 = vshrl.u32 %v5858_v38, %v2362_v26 }
 0x205   :  { %v3008_v2 = vshrl.u32 %v2990_v7, %v3006_v20  ;;  %v3011_v62 = vadd.s32 127, %v3010_v18  ;;  %v2879_v34 = vmul.f32 %v2878_v51, %v5422_v5  ;;  %v2377_v20 = vshrl.u32 %v5857_v15, %v2362_v26 }
 0x206   :  { %v2872_v7 = vmul.f32 %v2871_v63, %v5422_v5  ;;  %v2375_v23 = vor.u32 %v2374_v37, %v2373_v39  ;;  %v5467_v18 = vadd.f32 %v5118_v1, %v5388_v21  ;;  %v5474_v51 = vor.u32 %v2368_v48, %v2367_v12 }
 0x207   :  { %v3009_v16 = vor.u32 %v3008_v2, %v3007_v4  ;;  %v3012_v19 = vshll.u32 %v3011_v62, 23  ;;  %v2880_v25 = vadd.f32 -0.16666654, %v2879_v34  ;;  %v5476_v2 = vor.u32 %v2371_v47, %v2370_v17 }
 0x208   :  { %v2873_v0 = vadd.f32 -0.4999988, %v2872_v7  ;;  %v2378_v14 = vor.u32 %v2377_v20, %v2376_v45  ;;  %v2388_v27 = vsel %vm2382_vm2, %v2375_v23, 920167782  ;;  %v2148_v57 = vsub.s32 32, %v5478_v36 }
 0x209   :  { %v3013_v8 = vor.u32 4788187, %v3012_v19  ;;  %v3016_v55 = vcvt.s32.f32 %v3009_v16  ;;  %v2881_v16 = vmul.f32 %v2880_v25, %v5422_v5  ;;  %v3199_v19 = vadd.s32 3, %v5459_v60 }
 0x20a   :  { %v2152_v39 = vsub.s32 4294967266, %v5478_v36  ;;  %v2874_v37 = vmul.f32 %v2873_v0, %v5422_v5  ;;  %v2389_v26 = vsel %vm2381_vm10, %v5476_v2, %v2388_v27  ;;  %v2391_v12 = vsel %vm2379_vm9, %v5474_v51, %v5476_v2 }
 0x20b   :  { %v3014_v35 = vand.u32 2147483647, %v3013_v8  ;;  %v2882_v53 = vadd.f32 1.0, %v2881_v16  ;;  %v2392_v17 = vsel %vm2382_vm2, %v2378_v14, 1326507024  ;;  %v5515_v5 = vshll.u32 %v2355_v22, 8 }
 0x20c   :  { %v3200_v48 = vand.u32 3, %v3199_v19  ;;  %v3354_v47 = vadd.s32 3, %v5489_v41  ;;  %v5524_v20 = vadd.f32 1.0, %v2874_v37 }
 0x20d   :  { %v3017_v4 = vmul.f32 %v3016_v55, %v3014_v35  ;;  %v2387_v55 = vsel %vm2379_vm9, %v5472_v44, %v5474_v51  ;;  %v2393_v35 = vsel %vm2381_vm10, %v2375_v23, %v2392_v17  ;;  %v2396_v25 = vand.u32 65535, %v5515_v5 }
 0x20e   :  { %v2390_v7 = vsel %vm2380_vm6, %v2387_v55, %v2389_v26  ;;  %v2397_v45 = vshrl.u32 %v5515_v5, 16  ;;  %v2394_v46 = vsel %vm2380_vm6, %v2391_v12, %v2393_v35  ;;  %v5529_v0 = vmul.f32 %v2882_v53, %v5417_v49 }
 0x20f   :  { %v3018_v62 = vxor.u32 2147483648, %v3017_v4  ;;  %v2398_v16 = vand.u32 65535, %v2394_v46  ;;  %v2399_v14 = vshrl.u32 %v2394_v46, 16  ;;  %v2421_v19 = vshrl.u32 %v2390_v7, 16 }
 0x210   :  { %vm3202_vm0 = vcmp.eq.s32.totalorder %v3200_v48, 0  ;;  %v5845_v17 = vxor.u32 2147483648, %v5524_v20  ;;  %vm3205_vm8 = vcmp.eq.s32.totalorder %v3200_v48, 2  ;;  %v5846_v49 = vxor.u32 2147483648, %v5529_v0 }
 0x211   :  { %v3019_v63 = vsel %vm2898_vm11, %v3018_v62, %v3017_v4  ;;  %v5531_v62 = vadd.s32 127, %v2152_v39  ;;  %v2400_v55 = vmul.u32 %v2398_v16, %v2396_v25  ;;  %v2401_v37 = vmul.u32 %v2399_v14, %v2396_v25 }
 0x212   :  { %v3022_v34 = vsel %vm5441_vm15, %v5221_v32, %v3019_v63  ;;  %v3355_v63 = vand.u32 3, %v3354_v47  ;;  %v5533_v26 = vmul.u32 %v2398_v16, %v2397_v45  ;;  %v2403_v39 = vmul.u32 %v2399_v14, %v2397_v45 }
 0x213   :  { %v3024_v8 = vmul.f32 %v3022_v34, %v3022_v34  ;;  %v2404_v53 = vshll.u32 %v2401_v37, 16  ;;  %vm3201_vm1 = vcmp.lt.s32.totalorder %v3200_v48, 2  ;;  %v3207_v46 = vsel %vm3205_vm8, %v5845_v17, %v5529_v0 }
 0x214   :  { %vm3360_vm13 = vcmp.eq.s32.totalorder %v3355_v63, 2  ;;  %vm3357_vm14 = vcmp.eq.s32.totalorder %v3355_v63, 0  ;;  %vm3356_vm5 = vcmp.lt.s32.totalorder %v3355_v63, 2  ;;  %vm3039_vm11 = vweird.f32 %v5221_v32 }
 0x215   :  { %v3025_v56 = vmul.f32 -0.001358992, %v3024_v8  ;;  %v3032_v61 = vmul.f32 -0.00019511016, %v3024_v8  ;;  %vm2408_vm3 = vc.u32 %v2400_v55, %v2404_v53  ;;  %v2410_v16 = vadd.s32 %v2404_v53, %v2400_v55 }
 0x217   :  { %v3026_v4 = vadd.f32 0.041655596, %v3025_v56  ;;  %v3033_v22 = vadd.f32 0.008332121, %v3032_v61  ;;  %v2420_v61 = vand.u32 65535, %v2390_v7  ;;  %v3204_v7 = vsel %vm3202_vm0, %v5524_v20, %v5846_v49 }
 0x218   :  { %v3208_v53 = vsel %vm3201_vm1, %v3204_v7, %v3207_v46 }
 0x219   :  { %v3027_v27 = vmul.f32 %v3026_v4, %v3024_v8  ;;  %v3034_v23 = vmul.f32 %v3033_v22, %v3024_v8  ;;  %v2406_v4 = vshll.u32 %v5533_v26, 16  ;;  %v2423_v22 = vmul.u32 %v2421_v19, %v2396_v25 }
 0x21b   :  { %v3028_v56 = vadd.f32 -0.4999988, %v3027_v27  ;;  %v3035_v12 = vadd.f32 -0.16666654, %v3034_v23  ;;  %vm2412_vm12 = vc.u32 %v2410_v16, %v2406_v4  ;;  %v2426_v55 = vshll.u32 %v2423_v22, 16 }
 0x21d   :  { %v3029_v35 = vmul.f32 %v3028_v56, %v3024_v8  ;;  %v3036_v47 = vmul.f32 %v3035_v12, %v3024_v8  ;;  %v2409_v8 = vsel %vm2408_vm3, 1, %v3652_v50  ;;  %v2422_v56 = vmul.u32 %v2420_v61, %v2396_v25 }
 0x21e   :  { %v2411_v14 = vadd.s32 %v2409_v8, %v2403_v39  ;;  %v2424_v12 = vmul.u32 %v2420_v61, %v2397_v45  ;;  %v2425_v39 = vmul.u32 %v2421_v19, %v2397_v45  ;;  %v2407_v19 = vshrl.u32 %v5533_v26, 16 }
 0x21f   :  { %v5542_v27 = vadd.f32 1.0, %v3029_v35  ;;  %v3037_v23 = vadd.f32 1.0, %v3036_v47  ;;  %v2405_v35 = vshrl.u32 %v2401_v37, 16  ;;  %v2413_v47 = vsel %vm2412_vm12, 1, %v3652_v50 }
 0x220   :  { %v2415_v48 = vadd.s32 %v2413_v47, %v2411_v14  ;;  %v2428_v61 = vshll.u32 %v2424_v12, 16  ;;  %v3209_v37 = vsel %vm2884_vm4, nan, %v3208_v53  ;;  %vm2430_vm15 = vc.u32 %v2422_v56, %v2426_v55 }
 0x221   :  { %v5549_v6 = vmul.f32 %v3037_v23, %v3022_v34  ;;  %v3046_v17 = vxor.u32 2147483648, %v5542_v27  ;;  %v2384_v34 = vsel %vm2382_vm2, %v5476_v2, 2102212464  ;;  %v2432_v4 = vadd.s32 %v2426_v55, %v2422_v56 }
 0x222   :  { %v2416_v46 = vadd.s32 %v2415_v48, %v2405_v35  ;;  %v2431_v2 = vsel %vm2430_vm15, 1, %v3652_v50  ;;  %v2427_v23 = vshrl.u32 %v2423_v22, 16  ;;  %v2383_v14 = vsel %vm2379_vm9, %v5493_v11, %v5472_v44 }
 0x223   :  { %v3043_v49 = vxor.u32 2147483648, %v5549_v6  ;;  %v3362_v25 = vsel %vm3360_vm13, %v3046_v17, %v5549_v6  ;;  %v2433_v7 = vadd.s32 %v2431_v2, %v2425_v39  ;;  %vm2434_vm7 = vc.u32 %v2432_v4, %v2428_v61 }
 0x224   :  { %v2385_v26 = vsel %vm2381_vm10, %v5474_v51, %v2384_v34  ;;  %v2435_v56 = vsel %vm2434_vm7, 1, %v3652_v50  ;;  %v2429_v22 = vshrl.u32 %v2424_v12, 16  ;;  %v2505_v53 = vand.u32 2139095040, %v5467_v18 }
 0x225   :  { %v3359_v63 = vsel %vm3357_vm14, %v5542_v27, %v3043_v49  ;;  %v2437_v55 = vadd.s32 %v2435_v56, %v2433_v7  ;;  %v2149_v35 = vshll.u32 %v5402_v28, %v5478_v36  ;;  %v2150_v44 = vshrl.u32 %v5431_v42, %v2148_v57 }
 0x226   :  { %v3363_v45 = vsel %vm3356_vm5, %v3359_v63, %v3362_v25  ;;  %v5591_v11 = vadd.s32 %v2416_v46, %v2407_v19  ;;  %v5593_v47 = vadd.s32 %v2432_v4, %v2428_v61  ;;  %v2154_v51 = vshll.u32 %v5531_v62, 23 }
 0x227   :  { %v3364_v16 = vsel %vm3039_vm11, nan, %v3363_v45  ;;  %v2386_v12 = vsel %vm2380_vm6, %v2383_v14, %v2385_v26  ;;  %v2438_v25 = vadd.s32 %v2437_v55, %v2427_v23  ;;  %v2506_v39 = vshrl.u32 %v2505_v53, 23 }
 0x228   :  { %v3365_v8 = vadd.f32 %v3364_v16, %v3209_v37  ;;  %v2502_v34 = vand.u32 2147483647, %v5467_v18  ;;  %v2440_v36 = vmul.u32 %v5515_v5, %v2386_v12  ;;  %vm2442_vm2 = vc.u32 %v5591_v11, %v5593_v47 }
 0x229   :  { %v2439_v48 = vadd.s32 %v2438_v25, %v2429_v22  ;;  %v3463_v28 = vadd.s32 4294967169, %v2506_v39  ;;  %v2151_v42 = vor.u32 %v2150_v44, %v2149_v35  ;;  %v2155_v57 = vor.u32 4788187, %v2154_v51 }
 0x22a   :  { %3366 = vst [vmem:[#allocation8] sm:$0xff] %v3365_v8  ;;  %v2509_v31 = vand.u32 8388607, %v2502_v34  ;;  %vm2040_vm6 = vcmp.lt.s32.totalorder %v5118_v1, 0 }
 0x22b   :  { %3390 = dma.vmem_to_hbm [thread:$0]  %s3386_s1, 128, %s3388_s29, [#allocation9]   ;;  %v2443_v61 = vadd.s32 1, %v2439_v48  ;;  %v2512_v37 = vadd.s32 1, %v3463_v28  ;;  %v2156_v45 = vand.u32 2147483647, %v2155_v57  ;;  %v2158_v19 = vcvt.s32.f32 %v2151_v42 }
 0x22c   :  { %v2510_v16 = vor.u32 8388608, %v2509_v31 }
 0x22d   :  { %v2444_v62 = vsel %vm2442_vm2, %v2443_v61, %v2439_v48  ;;  %vm2513_vm9 = vcmp.gt.s32.totalorder %v2512_v37, 0  ;;  %v2159_v55 = vmul.f32 %v2158_v19, %v2156_v45 }
 0x22e   :  { %v2445_v63 = vadd.s32 %v2444_v62, %v2440_v36  ;;  %v2514_v4 = vsel %vm2513_vm9, %v2512_v37, 0  ;;  %v5626_v39 = vshll.u32 %v2510_v16, 8  ;;  %vm2349_vm9 = vcmp.lt.s32.totalorder %v5388_v21, 0 }
 0x22f   :  { %v2516_v46 = vand.u32 31, %v2514_v4  ;;  %v5604_v5 = vshrl.u32 %v2514_v4, 5  ;;  %v2160_v42 = vxor.u32 2147483648, %v2159_v55 }
 0x230   :  { %v2446_v2 = vadd.s32 536870912, %v2445_v63  ;;  %v2552_v31 = vshrl.u32 %v5626_v39, 16 }
 0x231   :  { %v5606_v23 = vsub.s32 32, %v2516_v46  ;;  %v2522_v7 = vshll.u32 %v5875_v52, %v2516_v46  ;;  %v2525_v8 = vshll.u32 %v5876_v54, %v2516_v46  ;;  %v2519_v26 = vshll.u32 %v5858_v38, %v2516_v46 }
 0x232   :  { %v5610_v14 = vshrl.u32 %v2446_v2, 30  ;;  %v2528_v56 = vshll.u32 %v5855_v30, %v2516_v46  ;;  %v2531_v22 = vshll.u32 %v5856_v43, %v2516_v46  ;;  %vm2534_vm10 = vcmp.lt.s32.totalorder %v5604_v5, 1 }
 0x233   :  { %v2520_v53 = vshrl.u32 %v5875_v52, %v5606_v23  ;;  %v2523_v35 = vshrl.u32 %v5876_v54, %v5606_v23  ;;  %v2526_v44 = vshrl.u32 %v5855_v30, %v5606_v23  ;;  %v2529_v12 = vshrl.u32 %v5856_v43, %v5606_v23 }
 0x234   :  { %v2448_v51 = vshll.u32 %v5610_v14, 30  ;;  %v2532_v25 = vshrl.u32 %v5857_v15, %v5606_v23  ;;  %vm2536_vm0 = vcmp.lt.s32.totalorder %v5604_v5, 3  ;;  %vm2537_vm8 = vcmp.lt.s32.totalorder %v5604_v5, 4 }
 0x235   :  { %v5628_v48 = vor.u32 %v2523_v35, %v2522_v7  ;;  %v5630_v28 = vor.u32 %v2526_v44, %v2525_v8  ;;  %v5633_v54 = vor.u32 %v2520_v53, %v2519_v26  ;;  %v2530_v30 = vor.u32 %v2529_v12, %v2528_v56 }
 0x236   :  { %v2449_v52 = vsub.s32 %v2445_v63, %v2448_v51  ;;  %v2533_v36 = vor.u32 %v2532_v25, %v2531_v22  ;;  %vm2535_vm3 = vcmp.lt.s32.totalorder %v5604_v5, 2  ;;  %v2551_v15 = vand.u32 65535, %v5626_v39 }
 0x237   :  { %v2543_v57 = vsel %vm2537_vm8, %v2530_v30, 920167782  ;;  %v2546_v61 = vsel %vm2534_vm10, %v5628_v48, %v5630_v28  ;;  %v2542_v63 = vsel %vm2534_vm10, %v5633_v54, %v5628_v48  ;;  %v5886_v2 = vand.u32 2147483647, %v5118_v1 }
 0x238   :  { %vm2450_vm1 = vcmp.lt.s32.totalorder %v2449_v52, 0  ;;  %v2451_v43 = vsub.s32 0, %v2449_v52  ;;  %v2547_v37 = vsel %vm2537_vm8, %v2533_v36, 1326507024  ;;  %v2544_v4 = vsel %vm2536_vm0, %v5630_v28, %v2543_v57 }
 0x239   :  { %v2548_v45 = vsel %vm2536_vm0, %v2530_v30, %v2547_v37  ;;  %vm5662_vm13 = vcmp.le.f32.partialorder %v5886_v2, 0.7853982  ;;  %v2161_v7 = vsel %vm2040_vm6, %v2160_v42, %v2159_v55  ;;  %v2545_v22 = vsel %vm2535_vm3, %v2542_v63, %v2544_v4 }
 0x23a   :  { %v2452_v62 = vsel %vm2450_vm1, %v2451_v43, %v2449_v52  ;;  %v2549_v46 = vsel %vm2535_vm3, %v2546_v61, %v2548_v45  ;;  %v5673_v44 = vsel %vm5662_vm13, %v5118_v1, %v2161_v7  ;;  %v2441_v51 = vadd.s32 %v5593_v47, %v5591_v11 }
 0x23b   :  { %v2453_v19 = vclz %v2452_v62  ;;  %v2553_v8 = vand.u32 65535, %v2549_v46  ;;  %v2554_v26 = vshrl.u32 %v2549_v46, 16  ;;  %v2575_v30 = vand.u32 65535, %v2545_v22 }
 0x23c   :  { %v2576_v36 = vshrl.u32 %v2545_v22, 16  ;;  %v5679_v37 = vmul.f32 %v5673_v44, %v5673_v44 }
 0x23d   :  { %v3461_v56 = vadd.s32 4294967294, %v2453_v19  ;;  %v2556_v53 = vmul.u32 %v2554_v26, %v2551_v15  ;;  %v2557_v35 = vmul.u32 %v2553_v8, %v2552_v31  ;;  %v2555_v12 = vmul.u32 %v2553_v8, %v2551_v15 }
 0x23e   :  { %v2558_v61 = vmul.u32 %v2554_v26, %v2552_v31  ;;  %v2577_v19 = vmul.u32 %v2575_v30, %v2551_v15  ;;  %v2578_v46 = vmul.u32 %v2576_v36, %v2551_v15  ;;  %v2579_v2 = vmul.u32 %v2575_v30, %v2552_v31 }
 0x23f   :  { %vm3462_vm12 = vcmp.lt.s32.totalorder %v3461_v56, 0  ;;  %v2559_v55 = vshll.u32 %v2556_v53, 16  ;;  %v2560_v62 = vshrl.u32 %v2556_v53, 16  ;;  %v2561_v63 = vshll.u32 %v2557_v35, 16 }
 0x240   :  { %v2456_v25 = vsel %vm3462_vm12, 0, %v3461_v56  ;;  %v2174_v26 = vmul.f32 -0.00019511016, %v5679_v37  ;;  %v2580_v22 = vmul.u32 %v2576_v36, %v2552_v31  ;;  %v2581_v53 = vshll.u32 %v2578_v46, 16 }
 0x241   :  { %v2457_v42 = vsub.s32 32, %v2456_v25  ;;  %v2458_v43 = vshll.u32 %v2449_v52, %v2456_v25  ;;  %v2461_v57 = vsub.s32 4294967266, %v2456_v25  ;;  %vm2563_vm14 = vc.u32 %v2555_v12, %v2559_v55 }
 0x242   :  { %v2565_v11 = vadd.s32 %v2559_v55, %v2555_v12  ;;  %v2564_v47 = vsel %vm2563_vm14, 1, %v3652_v50  ;;  %v2583_v55 = vshll.u32 %v2579_v2, 16  ;;  %v2539_v15 = vsel %vm2537_vm8, %v5630_v28, 2102212464 }
 0x243   :  { %v2459_v4 = vshrl.u32 %v2441_v51, %v2457_v42  ;;  %v2462_v45 = vadd.s32 127, %v2461_v57  ;;  %v2566_v52 = vadd.s32 %v2564_v47, %v2558_v61  ;;  %v2518_v51 = vshrl.u32 %v5858_v38, %v5606_v23 }
 0x244   :  { %vm2567_vm5 = vc.u32 %v2565_v11, %v2561_v63  ;;  %v2562_v30 = vshrl.u32 %v2557_v35, 16  ;;  %vm2585_vm15 = vc.u32 %v2577_v19, %v2581_v53  ;;  %v2587_v42 = vadd.s32 %v2581_v53, %v2577_v19 }
 0x245   :  { %v2460_v7 = vor.u32 %v2459_v4, %v2458_v43  ;;  %v2463_v8 = vshll.u32 %v2462_v45, 23  ;;  %v2568_v56 = vsel %vm2567_vm5, 1, %v3652_v50  ;;  %v2586_v63 = vsel %vm2585_vm15, 1, %v3652_v50 }
 0x246   :  { %v2570_v12 = vadd.s32 %v2568_v56, %v2566_v52  ;;  %v2582_v31 = vshrl.u32 %v2578_v46, 16  ;;  %v2588_v36 = vadd.s32 %v2586_v63, %v2580_v22  ;;  %vm2589_vm7 = vc.u32 %v2587_v42, %v2583_v55 }
 0x247   :  { %v2464_v25 = vor.u32 4788187, %v2463_v8  ;;  %v2467_v57 = vcvt.s32.f32 %v2460_v7  ;;  %v2538_v38 = vsel %vm2534_vm10, %v2518_v51, %v5633_v54  ;;  %v2540_v23 = vsel %vm2536_vm0, %v5628_v48, %v2539_v15 }
 0x248   :  { %v2571_v61 = vadd.s32 %v2570_v12, %v2560_v62  ;;  %v2590_v28 = vsel %vm2589_vm7, 1, %v3652_v50  ;;  %v2167_v35 = vmul.f32 -0.001358992, %v5679_v37  ;;  %v2584_v4 = vshrl.u32 %v2579_v2, 16 }
 0x249   :  { %v2465_v43 = vand.u32 2147483647, %v2464_v25  ;;  %v2592_v45 = vadd.s32 %v2590_v28, %v2588_v36  ;;  %v2175_v62 = vadd.f32 0.008332121, %v2174_v26  ;;  %v2591_v19 = vadd.s32 %v2587_v42, %v2583_v55 }
 0x24a   :  { %v2572_v47 = vadd.s32 %v2571_v61, %v2562_v30  ;;  %v2541_v46 = vsel %vm2535_vm3, %v2538_v38, %v2540_v23  ;;  %v2168_v8 = vadd.f32 0.041655596, %v2167_v35  ;;  %v5889_v2 = vand.u32 2147483647, %v5388_v21 }
 0x24b   :  { %v2468_v11 = vmul.f32 %v2467_v57, %v2465_v43  ;;  %v2593_v7 = vadd.s32 %v2592_v45, %v2582_v31  ;;  %v2176_v52 = vmul.f32 %v2175_v62, %v5679_v37  ;;  %v2595_v48 = vmul.u32 %v5626_v39, %v2541_v46 }
 0x24c   :  { %vm2597_vm2 = vc.u32 %v2572_v47, %v2591_v19  ;;  %vm5705_vm10 = vcmp.le.f32.partialorder %v5889_v2, 0.7853982  ;;  %v2169_v22 = vmul.f32 %v2168_v8, %v5679_v37  ;;  %v2162_v39 = vsub.s32 4, %v5396_v29 }
 0x24d   :  { %v2594_v54 = vadd.s32 %v2593_v7, %v2584_v4  ;;  %v2469_v56 = vxor.u32 2147483648, %v2468_v11  ;;  %v2177_v53 = vadd.f32 -0.16666654, %v2176_v52  ;;  %vm2181_vm14 = vweird.f32 %v5118_v1 }
 0x24e   :  { %v2170_v15 = vadd.f32 -0.4999988, %v2169_v22  ;;  %v2163_v43 = vsel %vm2040_vm6, %v2162_v39, %v5396_v29  ;;  %vm2504_vm15 = vcmp.lt.s32.totalorder %v5467_v18, 0  ;;  %vm5749_vm7 = vcmp.le.f32.partialorder %v2502_v34, 0.7853982 }
 0x24f   :  { %v2598_v50 = vadd.s32 1, %v2594_v54  ;;  %v2470_v25 = vsel %vm2349_vm9, %v2469_v56, %v2468_v11  ;;  %v2178_v30 = vmul.f32 %v2177_v53, %v5679_v37  ;;  %v2165_v38 = vsel %vm5662_vm13, 0, %v2163_v43 }
 0x250   :  { %v5716_v55 = vsel %vm5705_vm10, %v5388_v21, %v2470_v25  ;;  %v2171_v63 = vmul.f32 %v2170_v15, %v5679_v37  ;;  %v2182_v29 = vand.u32 3, %v2165_v38  ;;  %v2336_v11 = vadd.s32 3, %v2165_v38 }
 0x251   :  { %v2599_v5 = vsel %vm2597_vm2, %v2598_v50, %v2594_v54  ;;  %v2475_v57 = vmul.f32 %v5716_v55, %v5716_v55  ;;  %v2179_v31 = vadd.f32 1.0, %v2178_v30  ;;  %v2596_v56 = vadd.s32 %v2591_v19, %v2572_v47 }
 0x252   :  { %v2600_v51 = vadd.s32 %v2599_v5, %v2595_v48  ;;  %v2172_v4 = vadd.f32 1.0, %v2171_v63  ;;  %vm2184_vm6 = vcmp.eq.s32.totalorder %v2182_v29, 0  ;;  %vm2187_vm8 = vcmp.eq.s32.totalorder %v2182_v29, 2 }
 0x253   :  { %v2476_v23 = vmul.f32 -0.001358992, %v2475_v57  ;;  %v2483_v28 = vmul.f32 -0.00019511016, %v2475_v57  ;;  %v2180_v45 = vmul.f32 %v2179_v31, %v5673_v44  ;;  %v2337_v16 = vand.u32 3, %v2336_v11 }
 0x254   :  { %v2601_v12 = vadd.s32 536870912, %v2600_v51  ;;  %v2188_v52 = vxor.u32 2147483648, %v2172_v4  ;;  %v2471_v48 = vsub.s32 4, %v5610_v14  ;;  %vm2183_vm3 = vcmp.lt.s32.totalorder %v2182_v29, 2 }
 0x255   :  { %v2477_v7 = vadd.f32 0.041655596, %v2476_v23  ;;  %v2484_v8 = vadd.f32 0.008332121, %v2483_v28  ;;  %v2185_v37 = vxor.u32 2147483648, %v2180_v45  ;;  %vm2342_vm13 = vcmp.eq.s32.totalorder %v2337_v16, 2 }
 0x256   :  { %v5719_v42 = vshrl.u32 %v2601_v12, 30  ;;  %vm2339_vm12 = vcmp.eq.s32.totalorder %v2337_v16, 0  ;;  %v2472_v47 = vsel %vm2349_vm9, %v2471_v48, %v5610_v14  ;;  %vm2338_vm5 = vcmp.lt.s32.totalorder %v2337_v16, 2 }
 0x257   :  { %v2478_v50 = vmul.f32 %v2477_v7, %v2475_v57  ;;  %v2485_v2 = vmul.f32 %v2484_v8, %v2475_v57  ;;  %v2186_v25 = vsel %vm2184_vm6, %v2172_v4, %v2185_v37  ;;  %v2344_v63 = vsel %vm2342_vm13, %v2188_v52, %v2180_v45 }
 0x258   :  { %v2603_v61 = vshll.u32 %v5719_v42, 30  ;;  %v2341_v31 = vsel %vm2339_vm12, %v2172_v4, %v2185_v37  ;;  %v2626_v29 = vsub.s32 4, %v5719_v42  ;;  %v2885_v1 = vand.u32 3, %v5459_v60 }
 0x259   :  { %v2479_v19 = vadd.f32 -0.4999988, %v2478_v50  ;;  %v2486_v15 = vadd.f32 -0.16666654, %v2485_v2  ;;  %v2345_v11 = vsel %vm2338_vm5, %v2341_v31, %v2344_v63  ;;  %v5895_v60 = vxor.u32 2147483648, %v5524_v20 }
 0x25a   :  { %v2604_v36 = vsub.s32 %v2600_v51, %v2603_v61  ;;  %v2189_v51 = vsel %vm2187_vm8, %v2188_v52, %v2180_v45  ;;  %v2627_v8 = vsel %vm2504_vm15, %v2626_v29, %v5719_v42  ;;  %vm2886_vm6 = vcmp.lt.s32.totalorder %v2885_v1, 2 }
 0x25b   :  { %v2190_v30 = vsel %vm2183_vm3, %v2186_v25, %v2189_v51  ;;  %v2487_v14 = vmul.f32 %v2486_v15, %v2475_v57  ;;  %v2629_v42 = vsel %vm5749_vm7, 0, %v2627_v8  ;;  %v3040_v25 = vand.u32 3, %v5489_v41 }
 0x25c   :  { %vm2605_vm0 = vcmp.lt.s32.totalorder %v2604_v36, 0  ;;  %v2606_v35 = vsub.s32 0, %v2604_v36  ;;  %v2191_v28 = vsel %vm2181_vm14, nan, %v2190_v30  ;;  %vm2490_vm13 = vweird.f32 %v5388_v21 }
 0x25d   :  { %v2657_v4 = vmul.f32 0.5, %v2191_v28  ;;  %v2488_v26 = vadd.f32 1.0, %v2487_v14  ;;  %v5753_v52 = vadd.f32 3.5, %v2191_v28  ;;  %vm3041_vm8 = vcmp.lt.s32.totalorder %v3040_v25, 2 }
 0x25e   :  { %v2607_v62 = vsel %vm2605_vm0, %v2606_v35, %v2604_v36  ;;  %v2480_v35 = vmul.f32 %v2479_v19, %v2475_v57  ;;  %vm2890_vm0 = vcmp.eq.s32.totalorder %v2885_v1, 2  ;;  %vm3045_vm3 = vcmp.eq.s32.totalorder %v3040_v25, 2 }
 0x25f   :  { %v2608_v46 = vclz %v2607_v62  ;;  %v2489_v34 = vmul.f32 %v2488_v26, %v5716_v55  ;;  %v2892_v55 = vsel %vm2890_vm0, %v5895_v60, %v5529_v0  ;;  %v3047_v63 = vsel %vm3045_vm3, %v3046_v17, %v5549_v6 }
 0x260   :  { %v2481_v7 = vadd.f32 1.0, %v2480_v35  ;;  %v2646_v35 = vand.u32 3, %v2629_v42 }
 0x261   :  { %v3464_v54 = vadd.s32 4294967294, %v2608_v46  ;;  %v2494_v41 = vxor.u32 2147483648, %v2489_v34 }
 0x262   :  { %v2497_v48 = vxor.u32 2147483648, %v2481_v7  ;;  %vm2651_vm12 = vcmp.eq.s32.totalorder %v2646_v35, 2  ;;  %vm2647_vm5 = vcmp.lt.s32.totalorder %v2646_v35, 2 }
 0x263   :  { %vm3465_vm1 = vcmp.lt.s32.totalorder %v3464_v54, 0 }
 0x264   :  { %v2611_v5 = vsel %vm3465_vm1, 0, %v3464_v54  ;;  %v2346_v54 = vsel %vm2181_vm14, nan, %v2345_v11  ;;  %vm3042_vm1 = vcmp.eq.s32.totalorder %v3040_v25, 0  ;;  %vm2648_vm14 = vcmp.eq.s32.totalorder %v2646_v35, 0 }
 0x265   :  { %v2612_v44 = vsub.s32 32, %v2611_v5  ;;  %v2613_v22 = vshll.u32 %v2604_v36, %v2611_v5  ;;  %v2616_v53 = vsub.s32 4294967266, %v2611_v5  ;;  %v2474_v36 = vsel %vm5705_vm10, 0, %v2472_v47 }
 0x266   :  { %v5741_v46 = vand.u32 3, %v2474_v36  ;;  %v2659_v2 = vmul.f32 0.5, %v2346_v54  ;;  %vm2887_vm10 = vcmp.eq.s32.totalorder %v2885_v1, 0 }
 0x267   :  { %v2614_v39 = vshrl.u32 %v2596_v56, %v2612_v44  ;;  %v2617_v12 = vadd.s32 127, %v2616_v53  ;;  %v5759_v56 = vadd.f32 1.25, %v2657_v4  ;;  %v2676_v44 = vmul.f32 1.25, %v5753_v52 }
 0x268   :  { %vm2496_vm2 = vcmp.eq.s32.totalorder %v5741_v46, 2  ;;  %vm2493_vm9 = vcmp.eq.s32.totalorder %v5741_v46, 0  ;;  %v2667_v11 = vmul.f32 %v2659_v2, %v5160_v9 }
 0x269   :  { %v2615_v43 = vor.u32 %v2614_v39, %v2613_v22  ;;  %v2618_v61 = vshll.u32 %v2617_v12, 23  ;;  %v5894_v22 = vxor.u32 2147483648, %v5529_v0  ;;  %v2677_v12 = vmul.f32 %v5759_v56, %v5759_v56 }
 0x26a   :  { %v2660_v0 = vsub.f32 0.0, %v2659_v2  ;;  %v2668_v42 = vmul.f32 %v2667_v11, %v5160_v9 }
 0x26b   :  { %v2619_v38 = vor.u32 4788187, %v2618_v61  ;;  %v2622_v23 = vcvt.s32.f32 %v2615_v43  ;;  %v2889_v53 = vsel %vm2887_vm10, %v5524_v20, %v5894_v22  ;;  %v3044_v20 = vsel %vm3042_vm1, %v5542_v27, %v3043_v49 }
 0x26c   :  { %v2893_v47 = vsel %vm2886_vm6, %v2889_v53, %v2892_v55  ;;  %v2663_v61 = vmul.f32 2.0, %v2659_v2  ;;  %v2678_v36 = vsub.f32 %v2676_v44, %v2677_v12  ;;  %v2495_v27 = vsel %vm2493_vm9, %v2481_v7, %v2494_v41 }
 0x26d   :  { %v2620_v62 = vand.u32 2147483647, %v2619_v38  ;;  %v2894_v19 = vsel %vm2884_vm4, nan, %v2893_v47  ;;  %v3048_v38 = vsel %vm3041_vm8, %v3044_v20, %v3047_v63  ;;  %vm2492_vm4 = vcmp.lt.s32.totalorder %v5741_v46, 2 }
 0x26e   :  { %v2895_v43 = vsub.f32 0.0, %v2894_v19  ;;  %v3049_v28 = vsel %vm3039_vm11, nan, %v3048_v38  ;;  %v2661_v14 = vmul.f32 %v2660_v0, %v5163_v40  ;;  %v2664_v29 = vmul.f32 %v2663_v61, %v5163_v40 }
 0x26f   :  { %v2623_v45 = vmul.f32 %v2622_v23, %v2620_v62  ;;  %v2498_v23 = vsel %vm2496_vm2, %v2497_v48, %v2489_v34  ;;  %3502 = vrcp.f32 %v2678_v36  ;;  %v2712_v55 = vmul.f32 2.0, %v5059_v24 }
 0x270   :  { %v3050_v17 = vsub.f32 %v2895_v43, %v3049_v28  ;;  %v2499_v7 = vsel %vm2492_vm4, %v2495_v27, %v2498_v23  ;;  %v2662_v54 = vmul.f32 %v2661_v14, %v5163_v40  ;;  %v2665_v57 = vmul.f32 %v2664_v29, %v5160_v9  ;;  %v3511_v40 = vld [vmem:[#allocation5] sm:$0xff]  ;;  %v3512_v23 = vld [vmem:[#allocation2 + $0x10] sm:$0xff] }
 0x271   :  { %v2624_v37 = vxor.u32 2147483648, %v2623_v45  ;;  %v2500_v34 = vsel %vm2490_vm13, nan, %v2499_v7  ;;  %v2674_v22 = vsub.f32 %v3511_v40, %v2668_v42  ;;  %v2713_v19 = vadd.f32 %v2712_v55, %v4429_v59 }
 0x272   :  { %vm3051_vm11 = vcmp.gt.f32.partialorder %v3050_v17, 1.0  ;;  %v2666_v46 = vsub.f32 %v2662_v54, %v2665_v57  ;;  %v2670_v44 = vmul.f32 14.7, %v2500_v34 }
 0x273   :  { %v2625_v16 = vsel %vm2504_vm15, %v2624_v37, %v2623_v45  ;;  %v3655_v45 = vmov 0.0   ;;  %vm2645_vm15 = vweird.f32 %v5467_v18 }
 0x274   :  { %v2628_v50 = vsel %vm5749_vm7, %v5467_v18, %v2625_v16  ;;  %v3474_v4 = vsel %vm3051_vm11, 1.0, %v3655_v45  ;;  %v2672_v25 = vsub.f32 0.0, %v2666_v46  ;;  %v2707_v18 = vmul.f32 2.0, %v5135_v3 }
 0x275   :  { %v2630_v5 = vmul.f32 %v2628_v50, %v2628_v50  ;;  %3054 = vst [vmem:[#allocation10] sm:$0xff] %v3474_v4  ;;  %v3503_v1 = vpop.eup %3502 }
 0x276   :  { %3401 = dma.vmem_to_hbm [thread:$0]  %s3397_s30, 128, %s3399_s7, [#allocation9]   ;;  %v2680_v53 = vmul.f32 %v3503_v1, %v2678_v36 }
 0x277   :  { %v2631_v51 = vmul.f32 -0.001358992, %v2630_v5  ;;  %v2638_v39 = vmul.f32 -0.00019511016, %v2630_v5 }
 0x278   :  { %v2681_v12 = vsub.f32 2.0, %v2680_v53 }
 0x279   :  { %v2632_v15 = vadd.f32 0.041655596, %v2631_v51  ;;  %v2639_v30 = vadd.f32 0.008332121, %v2638_v39 }
 0x27a   :  { %v2682_v20 = vmul.f32 %v3503_v1, %v2681_v12 }
 0x27b   :  { %v2633_v31 = vmul.f32 %v2632_v15, %v2630_v5  ;;  %v2640_v33 = vmul.f32 %v2639_v30, %v2630_v5 }
 0x27d   :  { %v2634_v49 = vadd.f32 -0.4999988, %v2633_v31  ;;  %v2641_v6 = vadd.f32 -0.16666654, %v2640_v33 }
 0x27f   :  { %v2635_v62 = vmul.f32 %v2634_v49, %v2630_v5  ;;  %v2642_v32 = vmul.f32 %v2641_v6, %v2630_v5  ;;  %v3513_v49 = vld [vmem:[#allocation2 + $0x18] sm:$0xff] }
 0x281   :  { %v2636_v26 = vadd.f32 1.0, %v2635_v62  ;;  %v2643_v8 = vadd.f32 1.0, %v2642_v32 }
 0x283   :  { %v2644_v37 = vmul.f32 %v2643_v8, %v2628_v50  ;;  %v2652_v16 = vxor.u32 2147483648, %v2636_v26  ;;  %v2705_v50 = vmul.f32 2.0, %v5079_v13  ;;  %v2714_v13 = vmul.f32 2.0, %v5137_v58 }
 0x285   :  { %v2649_v21 = vxor.u32 2147483648, %v2644_v37  ;;  %v2653_v48 = vsel %vm2651_vm12, %v2652_v16, %v2644_v37  ;;  %v2706_v47 = vadd.f32 %v2705_v50, %v4470_v10  ;;  %v2715_v31 = vadd.f32 %v2714_v13, %v2713_v19 }
 0x287   :  { %v2650_v2 = vsel %vm2648_vm14, %v2636_v26, %v2649_v21  ;;  %v2708_v63 = vadd.f32 %v2707_v18, %v2706_v47 }
 0x288   :  { %v2654_v5 = vsel %vm2647_vm5, %v2650_v2, %v2653_v48 }
 0x289   :  { %v2655_v60 = vsel %vm2645_vm15, nan, %v2654_v5 }
 0x28a   :  { %v2669_v9 = vmul.f32 4.9, %v2655_v60 }
 0x28c   :  { %v2671_v51 = vadd.f32 %v2670_v44, %v2669_v9  ;;  %v2675_v39 = vsub.f32 %v2674_v22, %v2669_v9 }
 0x28e   :  { %v2673_v15 = vsub.f32 %v2672_v25, %v2671_v51  ;;  %v2684_v30 = vmul.f32 %v2675_v39, %v5759_v56  ;;  %v2687_v43 = vmul.f32 %v2675_v39, %v5753_v52 }
 0x290   :  { %v2683_v24 = vmul.f32 1.25, %v2673_v15  ;;  %v2688_v41 = vmul.f32 %v2673_v15, %v5759_v56 }
 0x292   :  { %v2685_v0 = vsub.f32 %v2683_v24, %v2684_v30  ;;  %v2689_v61 = vsub.f32 %v2687_v43, %v2688_v41 }
 0x294   :  { %v2686_v10 = vmul.f32 %v2685_v0, %v2682_v20  ;;  %v2690_v33 = vmul.f32 %v2689_v61, %v2682_v20 }
 0x296   :  { %v2709_v3 = vadd.f32 %v2708_v63, %v2686_v10  ;;  %v2716_v36 = vadd.f32 %v2715_v31, %v2690_v33 }
 0x298   :  { %v2710_v59 = vmul.f32 0.008333334, %v2709_v3  ;;  %v2717_v38 = vmul.f32 0.008333334, %v2716_v36 }
 0x29a   :  { %v2711_v28 = vadd.f32 %v3512_v23, %v2710_v59  ;;  %v2718_v52 = vadd.f32 %v3513_v49, %v2717_v38 }
 0x29c   :  { %v3466_v58 = vclamps-f32 %v2711_v28, 12.566371  ;;  %v3467_v56 = vclamps-f32 %v2718_v52, 28.274334 }
 0x29e   :  { %2737 = vst [vmem:[#allocation7 + $0x10] sm:$0xff] %v3466_v58 }
 0x29f   :  { %2739 = vst [vmem:[#allocation7 + $0x18] sm:$0xff] %v3467_v56 }
 0x2a0   :  { %3379 = dma.vmem_to_hbm [thread:$0]  %s3372_s8, 512, %s3374_s11, [#allocation4], %s3643_s23, %s3643_s23, %s3644_s24  }
 0x2a1   :  { %3638 = dma.done.wait [#allocation4], 512  }
 0x2a2   :  { %3639 = vsyncadd [#allocation4], 4294966784 }
 0x2a3   :  { %3640 = dma.done.wait [#allocation9], 256  }
 0x2a4   :  { %3641 = vsyncadd [#allocation9], 4294967040 }
 0x2a5   :  { %3414 = vsyncpa [#allocation3], 1 }
 0x2a6   :  { %3415 = vsyncpa [#allocation6], 1 }
 0x2a7   :  { %3416 = vsyncpa [#allocation4], 1 }
 0x2a8   :  { %3417 = vsyncpa [#allocation9], 1 }

</bundles_post_ra>
